<compile_context>
chip_gen: v7x
topology: tpu7x:2x2x1
jax: 0.10.0
libtpu: 0.0.40
codegen_flags: <defaults>
</compile_context>

<pallas_src>
import numpy as np
import jax
import jax.numpy as jnp
from jax.experimental import pallas as pl
from jax.experimental.pallas import tpu as pltpu

B = 5             # batch_size hard-coded in the reference module
BP = 8            # batch padded to sublane multiple
L = 68            # latent_dim / node count
LP = 128          # 68 padded to lane multiple
D = L * L         # 4624
DK = 37 * 128     # 4736 : flattened feature / K dim padded to lane multiple
DN = DK           # 4736 : fcintercept output dim (no extra padding)
H = 256           # fc1 hidden
TN = 1280         # fcintercept output tile -> cdiv(4736, 1280) = 4 grid steps (even)
NTILES = pl.cdiv(DN, TN)


def _pad(x, shape):
    return jnp.pad(x, [(0, t - s) for s, t in zip(x.shape, shape)])


def _vmem():
    return pl.BlockSpec(memory_space=pltpu.MemorySpace.VMEM)


# ------------------- fused encoder + reparameterize + decoder (part 1) -------------------
# h1 = relu(x @ W1^T + b1); mu = h1 @ W21^T + b21; logvar = h1 @ W22^T + b22
# trait = mu @ Wy^T + by
# z = mu + eps*exp(0.5*logvar)
# for i in 1..5:  h_i = sigmoid( sigmoid(z @ W3i^T + b3i) @ W4i^T + b4i )
# out[b] = a + sum_i w[i] * outer(h_i[b], h_i[b])       (bf16, shape (BP, LP, LP))
def encdec_kernel(x_ref, w1_ref, b1_ref, w21_ref, b21_ref, w22_ref, b22_ref,
                  wy_ref, by_ref, eps_ref, w3_ref, b3_ref, w4_ref, b4_ref,
                  a_ref, wcol_ref,
                  mu_ref, lv_ref, tr_ref, out_ref,
                  hmat_ref):
    x = x_ref[...]                                       # bf16 (BP, DK)
    h1 = jnp.maximum(
        jnp.dot(x, w1_ref[...], preferred_element_type=jnp.float32) + b1_ref[...], 0.0)
    mu = jnp.dot(h1, w21_ref[...], preferred_element_type=jnp.float32) + b21_ref[...]
    lv = jnp.dot(h1, w22_ref[...], preferred_element_type=jnp.float32) + b22_ref[...]
    tr = jnp.dot(mu, wy_ref[...], preferred_element_type=jnp.float32) + by_ref[...]
    mu_ref[...] = mu
    lv_ref[...] = lv
    tr_ref[...] = tr

    z = mu + eps_ref[...] * jnp.exp(0.5 * lv)
    lane = jax.lax.broadcasted_iota(jnp.int32, (BP, LP), 1)
    valid = lane < L

    # scratch layout: hmat[b, i, :] = h_i[b]  (rows 5..7 of the mix axis stay zero)
    hmat_ref[...] = jnp.zeros_like(hmat_ref)
    for i in range(5):                                   # unrolled, i static
        h = jax.nn.sigmoid(
            jnp.dot(z, w3_ref[i], preferred_element_type=jnp.float32) + b3_ref[i])
        h = jax.nn.sigmoid(
            jnp.dot(h, w4_ref[i], preferred_element_type=jnp.float32) + b4_ref[i])
        h = jnp.where(valid, h, 0.0)                     # load-bearing: sigmoid(0)=0.5 in pad lanes
        hmat_ref[:, i, :] = h

    a = a_ref[...]
    wcol = wcol_ref[...]                                 # (8,1) f32, rows 5..7 zero
    for b in range(B):                                   # unrolled over valid batch rows
        hb = hmat_ref[b]                                 # contiguous (8, LP) tile
        # out = a + Hb^T @ (wmix * Hb)  ==  a + sum_i wmix[i] * outer(h_i[b], h_i[b])
        prod = jax.lax.dot_general(hb, hb * wcol,
                                   (((0,), (0,)), ((), ())),
                                   preferred_element_type=jnp.float32)
        out_ref[b] = (a + prod).astype(out_ref.dtype)
    for b in range(B, BP):                               # keep padded rows well-defined
        out_ref[b] = jnp.zeros((LP, LP), out_ref.dtype)


def encdec_call(x_p, w1t, b1, w21t, b21, w22t, b22, wyt, by,
                eps_p, w3s, b3s, w4s, b4s, a_p, wcol):
    out_shape = (jax.ShapeDtypeStruct((BP, LP), jnp.float32),
                 jax.ShapeDtypeStruct((BP, LP), jnp.float32),
                 jax.ShapeDtypeStruct((BP, LP), jnp.float32),
                 jax.ShapeDtypeStruct((BP, LP, LP), jnp.bfloat16))
    return pl.pallas_call(
        encdec_kernel,
        out_shape=out_shape,
        in_specs=[_vmem()] * 16,
        out_specs=(_vmem(), _vmem(), _vmem(), _vmem()),
        scratch_shapes=[pltpu.VMEM((BP, 8, LP), jnp.float32)],
    )(x_p, w1t, b1, w21t, b21, w22t, b22, wyt, by,
      eps_p, w3s, b3s, w4s, b4s, a_p, wcol)


# ----------------------------- fcintercept kernel -----------------------------
# recon = h30 @ Wint^T + bint : bf16 weight/activation, f32 accumulate.
# Weight tiled over the output dim: cdiv(DN, TN) tiles of TN lanes, full K per step.
def fcint_kernel(x_ref, w_ref, b_ref, o_ref):
    o_ref[...] = (jnp.dot(x_ref[...], w_ref[...], preferred_element_type=jnp.float32)
                  + b_ref[...])


def fcint_call(h_p, wintt, bint):
    cost = pl.CostEstimate(
        flops=2 * BP * DK * DN,
        transcendentals=0,
        bytes_accessed=DK * DN * 2 + BP * DK * 2 + DN * 4 + BP * DN * 4)
    return pl.pallas_call(
        fcint_kernel,
        out_shape=jax.ShapeDtypeStruct((BP, DN), jnp.float32),
        grid_spec=pltpu.PrefetchScalarGridSpec(
            num_scalar_prefetch=0,
            grid=(NTILES,),
            in_specs=[pl.BlockSpec((BP, DK), lambda n: (0, 0)),
                      pl.BlockSpec((DK, TN), lambda n: (0, n)),
                      pl.BlockSpec((1, TN), lambda n: (0, n))],
            out_specs=pl.BlockSpec((BP, TN), lambda n: (0, n))),
        compiler_params=pltpu.CompilerParams(
            dimension_semantics=("parallel",),     # even tile count -> balanced v7x TC split
            vmem_limit_bytes=28 << 20),            # covers v5e's 16 MiB default scoped VMEM
        cost_estimate=cost,
    )(h_p, wintt, bint)


# ----------------------------- parameter init (deterministic) -----------------------------
def linear_init(key, out_f, in_f):
    k1, k2 = jax.random.split(key)
    bound = 1.0 / np.sqrt(in_f)
    W = jax.random.uniform(k1, (out_f, in_f), jnp.float32, -bound, bound)
    b = jax.random.uniform(k2, (out_f,), jnp.float32, -bound, bound)
    return W, b


def make_params(key):
    ks = jax.random.split(key, 20)
    p = {}
    p['W1'], p['b1'] = linear_init(ks[0], H, D)
    p['W21'], p['b21'] = linear_init(ks[1], L, H)
    p['W22'], p['b22'] = linear_init(ks[2], L, H)
    W3, b3, W4, b4 = [], [], [], []
    for i in range(5):
        w_, bb_ = linear_init(ks[3 + i], L, L); W3.append(w_); b3.append(bb_)
        w_, bb_ = linear_init(ks[8 + i], L, L); W4.append(w_); b4.append(bb_)
    p['W3'], p['b3'] = jnp.stack(W3), jnp.stack(b3)       # GraphCNN (mask_flag=False -> plain linear)
    p['W4'], p['b4'] = jnp.stack(W4), jnp.stack(b4)
    p['Wy'], p['by'] = linear_init(ks[13], 1, L)
    p['Wint'], p['bint'] = linear_init(ks[14], D, D)
    p['wmix'] = jax.random.normal(ks[15], (5,), jnp.float32)   # model.w (5,1) flattened
    p['a'] = jax.random.normal(ks[16], (D,), jnp.float32)      # model.a
    return p


# ----------------------------- full forward (Pallas) -----------------------------
def vae_forward_pallas(x, eps, p):
    xf = x.reshape(-1, D).astype(jnp.float32)
    x_p = _pad(xf, (BP, DK)).astype(jnp.bfloat16)

    w1t = _pad(p['W1'].T, (DK, H)).astype(jnp.bfloat16)       # bf16: DMA-bound encoder weight
    b1 = p['b1'].reshape(1, H)
    w21t = _pad(p['W21'].T, (H, LP))
    b21 = _pad(p['b21'].reshape(1, L), (1, LP))
    w22t = _pad(p['W22'].T, (H, LP))
    b22 = _pad(p['b22'].reshape(1, L), (1, LP))
    wyt = _pad(p['Wy'].T, (LP, LP))
    by = _pad(p['by'].reshape(1, 1), (1, LP))

    eps_p = _pad(eps.astype(jnp.float32), (BP, LP))
    w3s = _pad(jnp.transpose(p['W3'], (0, 2, 1)), (5, LP, LP))
    b3s = _pad(p['b3'].reshape(5, 1, L), (5, 1, LP))
    w4s = _pad(jnp.transpose(p['W4'], (0, 2, 1)), (5, LP, LP))
    b4s = _pad(p['b4'].reshape(5, 1, L), (5, 1, LP))
    a_p = _pad(p['a'].reshape(L, L), (LP, LP))
    wcol = _pad(p['wmix'].reshape(5, 1), (BP, 1))             # (8,1) wmix column, rows 5..7 zero

    mu_p, lv_p, tr_p, outer_p = encdec_call(
        x_p, w1t, b1, w21t, b21, w22t, b22, wyt, by,
        eps_p, w3s, b3s, w4s, b4s, a_p, wcol)

    # bf16 glue: 68x68 -> flat 4624 row-major, lane-pad to 4736; batch already at BP.
    h30_p = _pad(outer_p[:, :L, :L].reshape(BP, D), (BP, DK))

    wintt = _pad(p['Wint'].T, (DK, DN)).astype(jnp.bfloat16)  # bf16: halves dominant HBM stream
    bint = _pad(p['bint'].reshape(1, D), (1, DN))
    recon_p = fcint_call(h30_p, wintt, bint)

    recon = recon_p[:B, :D]
    mu = mu_p[:B, :L]
    logvar = lv_p[:B, :L]
    trait = tr_p[:B, :1]
    return recon, mu, logvar, trait


# ----------------------------- pure-JAX reference -----------------------------
def vae_forward_ref(x, eps, p):
    xf = x.reshape(-1, D).astype(jnp.float32)
    h1 = jnp.maximum(xf @ p['W1'].T + p['b1'], 0.0)
    mu = h1 @ p['W21'].T + p['b21']
    logvar = h1 @ p['W22'].T + p['b22']
    z = mu + eps * jnp.exp(0.5 * logvar)
    acc = jnp.zeros((B, L, L), jnp.float32)
    for i in range(5):
        h = jax.nn.sigmoid(z @ p['W3'][i].T + p['b3'][i])
        h = jax.nn.sigmoid(h @ p['W4'][i].T + p['b4'][i])
        acc = acc + p['wmix'][i] * (h[:, :, None] * h[:, None, :])
    h30 = p['a'][None, :] + acc.reshape(B, D)
    recon = h30 @ p['Wint'].T + p['bint']
    trait = (mu @ p['Wy'].T + p['by']).reshape(B, 1)
    return recon, mu, logvar, trait


if __name__ == "__main__":
    key = jax.random.PRNGKey(0)
    kp, kx, ke = jax.random.split(key, 3)
    params = make_params(kp)
    x = jax.random.normal(kx, (B, L, L), jnp.float32)      # input connectivity matrices
    # torch.randn_like(std) sampled host-side so both paths use the same eps (deterministic)
    eps = jax.random.normal(ke, (B, L), jnp.float32)

    recon, mu, logvar, trait = vae_forward_pallas(x, eps, params)
    jax.block_until_ready((recon, mu, logvar, trait))

    r_recon, r_mu, r_logvar, r_trait = vae_forward_ref(x, eps, params)
    np.testing.assert_allclose(np.asarray(mu), np.asarray(r_mu), rtol=5e-2, atol=5e-2)
    np.testing.assert_allclose(np.asarray(logvar), np.asarray(r_logvar), rtol=5e-2, atol=5e-2)
    np.testing.assert_allclose(np.asarray(trait), np.asarray(r_trait), rtol=5e-2, atol=5e-2)
    np.testing.assert_allclose(np.asarray(recon), np.asarray(r_recon), rtol=5e-2, atol=5e-2)

    assert recon.shape == (B, D) and mu.shape == (B, L) and logvar.shape == (B, L) and trait.shape == (B, 1)
    print("KERNEL_OK")
</pallas_src>

<mosaic_0001>
module attributes {stable_mosaic.version = 11 : i64} {
  func.func @encdec_kernel(%arg0: memref<8x4736xbf16, #tpu.memory_space<vmem>>, %arg1: memref<4736x256xbf16, #tpu.memory_space<vmem>>, %arg2: memref<1x256xf32, #tpu.memory_space<vmem>>, %arg3: memref<256x128xf32, #tpu.memory_space<vmem>>, %arg4: memref<1x128xf32, #tpu.memory_space<vmem>>, %arg5: memref<256x128xf32, #tpu.memory_space<vmem>>, %arg6: memref<1x128xf32, #tpu.memory_space<vmem>>, %arg7: memref<128x128xf32, #tpu.memory_space<vmem>>, %arg8: memref<1x128xf32, #tpu.memory_space<vmem>>, %arg9: memref<8x128xf32, #tpu.memory_space<vmem>>, %arg10: memref<5x128x128xf32, #tpu.memory_space<vmem>>, %arg11: memref<5x1x128xf32, #tpu.memory_space<vmem>>, %arg12: memref<5x128x128xf32, #tpu.memory_space<vmem>>, %arg13: memref<5x1x128xf32, #tpu.memory_space<vmem>>, %arg14: memref<128x128xf32, #tpu.memory_space<vmem>>, %arg15: memref<8x1xf32, #tpu.memory_space<vmem>>, %arg16: memref<8x128xf32, #tpu.memory_space<vmem>>, %arg17: memref<8x128xf32, #tpu.memory_space<vmem>>, %arg18: memref<8x128xf32, #tpu.memory_space<vmem>>, %arg19: memref<8x128x128xbf16, #tpu.memory_space<vmem>>, %arg20: memref<8x8x128xf32, #tpu.memory_space<vmem>>) attributes {dimension_semantics = [], scalar_prefetch = 0 : i64, scratch_operands = 1 : i64, tpu.core_type = #tpu.core_type<tc>} {
    %c0 = arith.constant 0 : index
    %c0_0 = arith.constant 0 : index
    %0 = vector.load %arg0[%c0, %c0_0] : memref<8x4736xbf16, #tpu.memory_space<vmem>>, vector<8x4736xbf16>
    %c0_1 = arith.constant 0 : index
    %c0_2 = arith.constant 0 : index
    %1 = vector.load %arg1[%c0_1, %c0_2] : memref<4736x256xbf16, #tpu.memory_space<vmem>>, vector<4736x256xbf16>
    %cst = arith.constant dense<0.000000e+00> : vector<8x256xf32>
    %2 = tpu.matmul %0, %1, %cst {dimension_numbers = #tpu.dot_dimension_numbers<[1], [0], [0], [1], [0, 0, 1, 1], [], []>} : vector<8x4736xbf16>, vector<4736x256xbf16>, vector<8x256xf32> -> vector<8x256xf32>
    %c0_3 = arith.constant 0 : index
    %c0_4 = arith.constant 0 : index
    %3 = vector.load %arg2[%c0_3, %c0_4] : memref<1x256xf32, #tpu.memory_space<vmem>>, vector<1x256xf32>
    %4 = vector.broadcast %3 : vector<1x256xf32> to vector<8x256xf32>
    %5 = arith.addf %2, %4 : vector<8x256xf32>
    %cst_5 = arith.constant 0.000000e+00 : f32
    %6 = vector.broadcast %cst_5 : f32 to vector<8x256xf32>
    %7 = arith.maximumf %5, %6 : vector<8x256xf32>
    %c0_6 = arith.constant 0 : index
    %c0_7 = arith.constant 0 : index
    %8 = vector.load %arg3[%c0_6, %c0_7] : memref<256x128xf32, #tpu.memory_space<vmem>>, vector<256x128xf32>
    %cst_8 = arith.constant dense<0.000000e+00> : vector<8x128xf32>
    %9 = tpu.matmul %7, %8, %cst_8 {dimension_numbers = #tpu.dot_dimension_numbers<[1], [0], [0], [1], [0, 0, 1, 1], [], []>} : vector<8x256xf32>, vector<256x128xf32>, vector<8x128xf32> -> vector<8x128xf32>
    %c0_9 = arith.constant 0 : index
    %c0_10 = arith.constant 0 : index
    %10 = vector.load %arg4[%c0_9, %c0_10] : memref<1x128xf32, #tpu.memory_space<vmem>>, vector<1x128xf32>
    %11 = vector.broadcast %10 : vector<1x128xf32> to vector<8x128xf32>
    %12 = arith.addf %9, %11 : vector<8x128xf32>
    %c0_11 = arith.constant 0 : index
    %c0_12 = arith.constant 0 : index
    %13 = vector.load %arg5[%c0_11, %c0_12] : memref<256x128xf32, #tpu.memory_space<vmem>>, vector<256x128xf32>
    %cst_13 = arith.constant dense<0.000000e+00> : vector<8x128xf32>
    %14 = tpu.matmul %7, %13, %cst_13 {dimension_numbers = #tpu.dot_dimension_numbers<[1], [0], [0], [1], [0, 0, 1, 1], [], []>} : vector<8x256xf32>, vector<256x128xf32>, vector<8x128xf32> -> vector<8x128xf32>
    %c0_14 = arith.constant 0 : index
    %c0_15 = arith.constant 0 : index
    %15 = vector.load %arg6[%c0_14, %c0_15] : memref<1x128xf32, #tpu.memory_space<vmem>>, vector<1x128xf32>
    %16 = vector.broadcast %15 : vector<1x128xf32> to vector<8x128xf32>
    %17 = arith.addf %14, %16 : vector<8x128xf32>
    %c0_16 = arith.constant 0 : index
    %c0_17 = arith.constant 0 : index
    %18 = vector.load %arg7[%c0_16, %c0_17] : memref<128x128xf32, #tpu.memory_space<vmem>>, vector<128x128xf32>
    %cst_18 = arith.constant dense<0.000000e+00> : vector<8x128xf32>
    %19 = tpu.matmul %12, %18, %cst_18 {dimension_numbers = #tpu.dot_dimension_numbers<[1], [0], [0], [1], [0, 0, 1, 1], [], []>} : vector<8x128xf32>, vector<128x128xf32>, vector<8x128xf32> -> vector<8x128xf32>
    %c0_19 = arith.constant 0 : index
    %c0_20 = arith.constant 0 : index
    %20 = vector.load %arg8[%c0_19, %c0_20] : memref<1x128xf32, #tpu.memory_space<vmem>>, vector<1x128xf32>
    %21 = vector.broadcast %20 : vector<1x128xf32> to vector<8x128xf32>
    %22 = arith.addf %19, %21 : vector<8x128xf32>
    %c0_21 = arith.constant 0 : index
    %c0_22 = arith.constant 0 : index
    %23 = vector.load %arg16[%c0_21, %c0_22] : memref<8x128xf32, #tpu.memory_space<vmem>>, vector<8x128xf32>
    tpu.vector_store %arg16[%c0_21, %c0_22], %12 {strides = array<i32>} : memref<8x128xf32, #tpu.memory_space<vmem>>, vector<8x128xf32>,
    %c0_23 = arith.constant 0 : index
    %c0_24 = arith.constant 0 : index
    %24 = vector.load %arg17[%c0_23, %c0_24] : memref<8x128xf32, #tpu.memory_space<vmem>>, vector<8x128xf32>
    tpu.vector_store %arg17[%c0_23, %c0_24], %17 {strides = array<i32>} : memref<8x128xf32, #tpu.memory_space<vmem>>, vector<8x128xf32>,
    %c0_25 = arith.constant 0 : index
    %c0_26 = arith.constant 0 : index
    %25 = vector.load %arg18[%c0_25, %c0_26] : memref<8x128xf32, #tpu.memory_space<vmem>>, vector<8x128xf32>
    tpu.vector_store %arg18[%c0_25, %c0_26], %22 {strides = array<i32>} : memref<8x128xf32, #tpu.memory_space<vmem>>, vector<8x128xf32>,
    %c0_27 = arith.constant 0 : index
    %c0_28 = arith.constant 0 : index
    %26 = vector.load %arg9[%c0_27, %c0_28] : memref<8x128xf32, #tpu.memory_space<vmem>>, vector<8x128xf32>
    %cst_29 = arith.constant 5.000000e-01 : f32
    %27 = vector.broadcast %cst_29 : f32 to vector<8x128xf32>
    %28 = arith.mulf %27, %17 : vector<8x128xf32>
    %29 = math.exp %28 : vector<8x128xf32>
    %30 = arith.mulf %26, %29 : vector<8x128xf32>
    %31 = arith.addf %12, %30 : vector<8x128xf32>
    %32 = tpu.iota {dimensions = array<i32: 1>} : vector<8x128xi32>
    %c68_i32 = arith.constant 68 : i32
    %33 = vector.broadcast %c68_i32 : i32 to vector<8x128xi32>
    %34 = arith.cmpi slt, %32, %33 : vector<8x128xi32>
    %cst_30 = arith.constant 0.000000e+00 : f32
    %35 = vector.broadcast %cst_30 : f32 to vector<8x8x128xf32>
    %c0_31 = arith.constant 0 : index
    %c0_32 = arith.constant 0 : index
    %c0_33 = arith.constant 0 : index
    %36 = vector.load %arg20[%c0_31, %c0_32, %c0_33] : memref<8x8x128xf32, #tpu.memory_space<vmem>>, vector<8x8x128xf32>
    tpu.vector_store %arg20[%c0_31, %c0_32, %c0_33], %35 {strides = array<i32>} : memref<8x8x128xf32, #tpu.memory_space<vmem>>, vector<8x8x128xf32>,
    %c0_34 = arith.constant 0 : index
    %c0_35 = arith.constant 0 : index
    %c0_36 = arith.constant 0 : index
    %37 = vector.load %arg10[%c0_34, %c0_35, %c0_36] : memref<5x128x128xf32, #tpu.memory_space<vmem>>, vector<1x128x128xf32>
    %38 = vector.shape_cast %37 : vector<1x128x128xf32> to vector<128x128xf32>
    %cst_37 = arith.constant dense<0.000000e+00> : vector<8x128xf32>
    %39 = tpu.matmul %31, %38, %cst_37 {dimension_numbers = #tpu.dot_dimension_numbers<[1], [0], [0], [1], [0, 0, 1, 1], [], []>} : vector<8x128xf32>, vector<128x128xf32>, vector<8x128xf32> -> vector<8x128xf32>
    %c0_38 = arith.constant 0 : index
    %c0_39 = arith.constant 0 : index
    %c0_40 = arith.constant 0 : index
    %40 = vector.load %arg11[%c0_38, %c0_39, %c0_40] : memref<5x1x128xf32, #tpu.memory_space<vmem>>, vector<1x1x128xf32>
    %41 = vector.shape_cast %40 : vector<1x1x128xf32> to vector<1x128xf32>
    %42 = vector.broadcast %41 : vector<1x128xf32> to vector<8x128xf32>
    %43 = arith.addf %39, %42 : vector<8x128xf32>
    %44 = arith.negf %43 : vector<8x128xf32>
    %45 = math.exp %44 : vector<8x128xf32>
    %cst_41 = arith.constant 1.000000e+00 : f32
    %46 = vector.broadcast %cst_41 : f32 to vector<8x128xf32>
    %47 = arith.addf %46, %45 : vector<8x128xf32>
    %48 = arith.divf %46, %47 : vector<8x128xf32>
    %c0_42 = arith.constant 0 : index
    %c0_43 = arith.constant 0 : index
    %c0_44 = arith.constant 0 : index
    %49 = vector.load %arg12[%c0_42, %c0_43, %c0_44] : memref<5x128x128xf32, #tpu.memory_space<vmem>>, vector<1x128x128xf32>
    %50 = vector.shape_cast %49 : vector<1x128x128xf32> to vector<128x128xf32>
    %cst_45 = arith.constant dense<0.000000e+00> : vector<8x128xf32>
    %51 = tpu.matmul %48, %50, %cst_45 {dimension_numbers = #tpu.dot_dimension_numbers<[1], [0], [0], [1], [0, 0, 1, 1], [], []>} : vector<8x128xf32>, vector<128x128xf32>, vector<8x128xf32> -> vector<8x128xf32>
    %c0_46 = arith.constant 0 : index
    %c0_47 = arith.constant 0 : index
    %c0_48 = arith.constant 0 : index
    %52 = vector.load %arg13[%c0_46, %c0_47, %c0_48] : memref<5x1x128xf32, #tpu.memory_space<vmem>>, vector<1x1x128xf32>
    %53 = vector.shape_cast %52 : vector<1x1x128xf32> to vector<1x128xf32>
    %54 = vector.broadcast %53 : vector<1x128xf32> to vector<8x128xf32>
    %55 = arith.addf %51, %54 : vector<8x128xf32>
    %56 = arith.negf %55 : vector<8x128xf32>
    %57 = math.exp %56 : vector<8x128xf32>
    %cst_49 = arith.constant 1.000000e+00 : f32
    %58 = vector.broadcast %cst_49 : f32 to vector<8x128xf32>
    %59 = arith.addf %58, %57 : vector<8x128xf32>
    %60 = arith.divf %58, %59 : vector<8x128xf32>
    %cst_50 = arith.constant 0.000000e+00 : f32
    %61 = vector.broadcast %cst_50 : f32 to vector<8x128xf32>
    %62 = arith.select %34, %60, %61 : vector<8x128xi1>, vector<8x128xf32>
    %c0_51 = arith.constant 0 : index
    %c0_52 = arith.constant 0 : index
    %c0_53 = arith.constant 0 : index
    %63 = vector.load %arg20[%c0_51, %c0_52, %c0_53] : memref<8x8x128xf32, #tpu.memory_space<vmem>>, vector<8x1x128xf32>
    %64 = vector.shape_cast %63 : vector<8x1x128xf32> to vector<8x128xf32>
    %65 = vector.shape_cast %62 : vector<8x128xf32> to vector<8x1x128xf32>
    tpu.vector_store %arg20[%c0_51, %c0_52, %c0_53], %65 {strides = array<i32>} : memref<8x8x128xf32, #tpu.memory_space<vmem>>, vector<8x1x128xf32>,
    %c1 = arith.constant 1 : index
    %c0_54 = arith.constant 0 : index
    %c0_55 = arith.constant 0 : index
    %66 = vector.load %arg10[%c1, %c0_54, %c0_55] : memref<5x128x128xf32, #tpu.memory_space<vmem>>, vector<1x128x128xf32>
    %67 = vector.shape_cast %66 : vector<1x128x128xf32> to vector<128x128xf32>
    %cst_56 = arith.constant dense<0.000000e+00> : vector<8x128xf32>
    %68 = tpu.matmul %31, %67, %cst_56 {dimension_numbers = #tpu.dot_dimension_numbers<[1], [0], [0], [1], [0, 0, 1, 1], [], []>} : vector<8x128xf32>, vector<128x128xf32>, vector<8x128xf32> -> vector<8x128xf32>
    %c1_57 = arith.constant 1 : index
    %c0_58 = arith.constant 0 : index
    %c0_59 = arith.constant 0 : index
    %69 = vector.load %arg11[%c1_57, %c0_58, %c0_59] : memref<5x1x128xf32, #tpu.memory_space<vmem>>, vector<1x1x128xf32>
    %70 = vector.shape_cast %69 : vector<1x1x128xf32> to vector<1x128xf32>
    %71 = vector.broadcast %70 : vector<1x128xf32> to vector<8x128xf32>
    %72 = arith.addf %68, %71 : vector<8x128xf32>
    %73 = arith.negf %72 : vector<8x128xf32>
    %74 = math.exp %73 : vector<8x128xf32>
    %cst_60 = arith.constant 1.000000e+00 : f32
    %75 = vector.broadcast %cst_60 : f32 to vector<8x128xf32>
    %76 = arith.addf %75, %74 : vector<8x128xf32>
    %77 = arith.divf %75, %76 : vector<8x128xf32>
    %c1_61 = arith.constant 1 : index
    %c0_62 = arith.constant 0 : index
    %c0_63 = arith.constant 0 : index
    %78 = vector.load %arg12[%c1_61, %c0_62, %c0_63] : memref<5x128x128xf32, #tpu.memory_space<vmem>>, vector<1x128x128xf32>
    %79 = vector.shape_cast %78 : vector<1x128x128xf32> to vector<128x128xf32>
    %cst_64 = arith.constant dense<0.000000e+00> : vector<8x128xf32>
    %80 = tpu.matmul %77, %79, %cst_64 {dimension_numbers = #tpu.dot_dimension_numbers<[1], [0], [0], [1], [0, 0, 1, 1], [], []>} : vector<8x128xf32>, vector<128x128xf32>, vector<8x128xf32> -> vector<8x128xf32>
    %c1_65 = arith.constant 1 : index
    %c0_66 = arith.constant 0 : index
    %c0_67 = arith.constant 0 : index
    %81 = vector.load %arg13[%c1_65, %c0_66, %c0_67] : memref<5x1x128xf32, #tpu.memory_space<vmem>>, vector<1x1x128xf32>
    %82 = vector.shape_cast %81 : vector<1x1x128xf32> to vector<1x128xf32>
    %83 = vector.broadcast %82 : vector<1x128xf32> to vector<8x128xf32>
    %84 = arith.addf %80, %83 : vector<8x128xf32>
    %85 = arith.negf %84 : vector<8x128xf32>
    %86 = math.exp %85 : vector<8x128xf32>
    %cst_68 = arith.constant 1.000000e+00 : f32
    %87 = vector.broadcast %cst_68 : f32 to vector<8x128xf32>
    %88 = arith.addf %87, %86 : vector<8x128xf32>
    %89 = arith.divf %87, %88 : vector<8x128xf32>
    %cst_69 = arith.constant 0.000000e+00 : f32
    %90 = vector.broadcast %cst_69 : f32 to vector<8x128xf32>
    %91 = arith.select %34, %89, %90 : vector<8x128xi1>, vector<8x128xf32>
    %c0_70 = arith.constant 0 : index
    %c1_71 = arith.constant 1 : index
    %c0_72 = arith.constant 0 : index
    %92 = vector.load %arg20[%c0_70, %c1_71, %c0_72] : memref<8x8x128xf32, #tpu.memory_space<vmem>>, vector<8x1x128xf32>
    %93 = vector.shape_cast %92 : vector<8x1x128xf32> to vector<8x128xf32>
    %94 = vector.shape_cast %91 : vector<8x128xf32> to vector<8x1x128xf32>
    tpu.vector_store %arg20[%c0_70, %c1_71, %c0_72], %94 {strides = array<i32>} : memref<8x8x128xf32, #tpu.memory_space<vmem>>, vector<8x1x128xf32>,
    %c2 = arith.constant 2 : index
    %c0_73 = arith.constant 0 : index
    %c0_74 = arith.constant 0 : index
    %95 = vector.load %arg10[%c2, %c0_73, %c0_74] : memref<5x128x128xf32, #tpu.memory_space<vmem>>, vector<1x128x128xf32>
    %96 = vector.shape_cast %95 : vector<1x128x128xf32> to vector<128x128xf32>
    %cst_75 = arith.constant dense<0.000000e+00> : vector<8x128xf32>
    %97 = tpu.matmul %31, %96, %cst_75 {dimension_numbers = #tpu.dot_dimension_numbers<[1], [0], [0], [1], [0, 0, 1, 1], [], []>} : vector<8x128xf32>, vector<128x128xf32>, vector<8x128xf32> -> vector<8x128xf32>
    %c2_76 = arith.constant 2 : index
    %c0_77 = arith.constant 0 : index
    %c0_78 = arith.constant 0 : index
    %98 = vector.load %arg11[%c2_76, %c0_77, %c0_78] : memref<5x1x128xf32, #tpu.memory_space<vmem>>, vector<1x1x128xf32>
    %99 = vector.shape_cast %98 : vector<1x1x128xf32> to vector<1x128xf32>
    %100 = vector.broadcast %99 : vector<1x128xf32> to vector<8x128xf32>
    %101 = arith.addf %97, %100 : vector<8x128xf32>
    %102 = arith.negf %101 : vector<8x128xf32>
    %103 = math.exp %102 : vector<8x128xf32>
    %cst_79 = arith.constant 1.000000e+00 : f32
    %104 = vector.broadcast %cst_79 : f32 to vector<8x128xf32>
    %105 = arith.addf %104, %103 : vector<8x128xf32>
    %106 = arith.divf %104, %105 : vector<8x128xf32>
    %c2_80 = arith.constant 2 : index
    %c0_81 = arith.constant 0 : index
    %c0_82 = arith.constant 0 : index
    %107 = vector.load %arg12[%c2_80, %c0_81, %c0_82] : memref<5x128x128xf32, #tpu.memory_space<vmem>>, vector<1x128x128xf32>
    %108 = vector.shape_cast %107 : vector<1x128x128xf32> to vector<128x128xf32>
    %cst_83 = arith.constant dense<0.000000e+00> : vector<8x128xf32>
    %109 = tpu.matmul %106, %108, %cst_83 {dimension_numbers = #tpu.dot_dimension_numbers<[1], [0], [0], [1], [0, 0, 1, 1], [], []>} : vector<8x128xf32>, vector<128x128xf32>, vector<8x128xf32> -> vector<8x128xf32>
    %c2_84 = arith.constant 2 : index
    %c0_85 = arith.constant 0 : index
    %c0_86 = arith.constant 0 : index
    %110 = vector.load %arg13[%c2_84, %c0_85, %c0_86] : memref<5x1x128xf32, #tpu.memory_space<vmem>>, vector<1x1x128xf32>
    %111 = vector.shape_cast %110 : vector<1x1x128xf32> to vector<1x128xf32>
    %112 = vector.broadcast %111 : vector<1x128xf32> to vector<8x128xf32>
    %113 = arith.addf %109, %112 : vector<8x128xf32>
    %114 = arith.negf %113 : vector<8x128xf32>
    %115 = math.exp %114 : vector<8x128xf32>
    %cst_87 = arith.constant 1.000000e+00 : f32
    %116 = vector.broadcast %cst_87 : f32 to vector<8x128xf32>
    %117 = arith.addf %116, %115 : vector<8x128xf32>
    %118 = arith.divf %116, %117 : vector<8x128xf32>
    %cst_88 = arith.constant 0.000000e+00 : f32
    %119 = vector.broadcast %cst_88 : f32 to vector<8x128xf32>
    %120 = arith.select %34, %118, %119 : vector<8x128xi1>, vector<8x128xf32>
    %c0_89 = arith.constant 0 : index
    %c2_90 = arith.constant 2 : index
    %c0_91 = arith.constant 0 : index
    %121 = vector.load %arg20[%c0_89, %c2_90, %c0_91] : memref<8x8x128xf32, #tpu.memory_space<vmem>>, vector<8x1x128xf32>
    %122 = vector.shape_cast %121 : vector<8x1x128xf32> to vector<8x128xf32>
    %123 = vector.shape_cast %120 : vector<8x128xf32> to vector<8x1x128xf32>
    tpu.vector_store %arg20[%c0_89, %c2_90, %c0_91], %123 {strides = array<i32>} : memref<8x8x128xf32, #tpu.memory_space<vmem>>, vector<8x1x128xf32>,
    %c3 = arith.constant 3 : index
    %c0_92 = arith.constant 0 : index
    %c0_93 = arith.constant 0 : index
    %124 = vector.load %arg10[%c3, %c0_92, %c0_93] : memref<5x128x128xf32, #tpu.memory_space<vmem>>, vector<1x128x128xf32>
    %125 = vector.shape_cast %124 : vector<1x128x128xf32> to vector<128x128xf32>
    %cst_94 = arith.constant dense<0.000000e+00> : vector<8x128xf32>
    %126 = tpu.matmul %31, %125, %cst_94 {dimension_numbers = #tpu.dot_dimension_numbers<[1], [0], [0], [1], [0, 0, 1, 1], [], []>} : vector<8x128xf32>, vector<128x128xf32>, vector<8x128xf32> -> vector<8x128xf32>
    %c3_95 = arith.constant 3 : index
    %c0_96 = arith.constant 0 : index
    %c0_97 = arith.constant 0 : index
    %127 = vector.load %arg11[%c3_95, %c0_96, %c0_97] : memref<5x1x128xf32, #tpu.memory_space<vmem>>, vector<1x1x128xf32>
    %128 = vector.shape_cast %127 : vector<1x1x128xf32> to vector<1x128xf32>
    %129 = vector.broadcast %128 : vector<1x128xf32> to vector<8x128xf32>
    %130 = arith.addf %126, %129 : vector<8x128xf32>
    %131 = arith.negf %130 : vector<8x128xf32>
    %132 = math.exp %131 : vector<8x128xf32>
    %cst_98 = arith.constant 1.000000e+00 : f32
    %133 = vector.broadcast %cst_98 : f32 to vector<8x128xf32>
    %134 = arith.addf %133, %132 : vector<8x128xf32>
    %135 = arith.divf %133, %134 : vector<8x128xf32>
    %c3_99 = arith.constant 3 : index
    %c0_100 = arith.constant 0 : index
    %c0_101 = arith.constant 0 : index
    %136 = vector.load %arg12[%c3_99, %c0_100, %c0_101] : memref<5x128x128xf32, #tpu.memory_space<vmem>>, vector<1x128x128xf32>
    %137 = vector.shape_cast %136 : vector<1x128x128xf32> to vector<128x128xf32>
    %cst_102 = arith.constant dense<0.000000e+00> : vector<8x128xf32>
    %138 = tpu.matmul %135, %137, %cst_102 {dimension_numbers = #tpu.dot_dimension_numbers<[1], [0], [0], [1], [0, 0, 1, 1], [], []>} : vector<8x128xf32>, vector<128x128xf32>, vector<8x128xf32> -> vector<8x128xf32>
    %c3_103 = arith.constant 3 : index
    %c0_104 = arith.constant 0 : index
    %c0_105 = arith.constant 0 : index
    %139 = vector.load %arg13[%c3_103, %c0_104, %c0_105] : memref<5x1x128xf32, #tpu.memory_space<vmem>>, vector<1x1x128xf32>
    %140 = vector.shape_cast %139 : vector<1x1x128xf32> to vector<1x128xf32>
    %141 = vector.broadcast %140 : vector<1x128xf32> to vector<8x128xf32>
    %142 = arith.addf %138, %141 : vector<8x128xf32>
    %143 = arith.negf %142 : vector<8x128xf32>
    %144 = math.exp %143 : vector<8x128xf32>
    %cst_106 = arith.constant 1.000000e+00 : f32
    %145 = vector.broadcast %cst_106 : f32 to vector<8x128xf32>
    %146 = arith.addf %145, %144 : vector<8x128xf32>
    %147 = arith.divf %145, %146 : vector<8x128xf32>
    %cst_107 = arith.constant 0.000000e+00 : f32
    %148 = vector.broadcast %cst_107 : f32 to vector<8x128xf32>
    %149 = arith.select %34, %147, %148 : vector<8x128xi1>, vector<8x128xf32>
    %c0_108 = arith.constant 0 : index
    %c3_109 = arith.constant 3 : index
    %c0_110 = arith.constant 0 : index
    %150 = vector.load %arg20[%c0_108, %c3_109, %c0_110] : memref<8x8x128xf32, #tpu.memory_space<vmem>>, vector<8x1x128xf32>
    %151 = vector.shape_cast %150 : vector<8x1x128xf32> to vector<8x128xf32>
    %152 = vector.shape_cast %149 : vector<8x128xf32> to vector<8x1x128xf32>
    tpu.vector_store %arg20[%c0_108, %c3_109, %c0_110], %152 {strides = array<i32>} : memref<8x8x128xf32, #tpu.memory_space<vmem>>, vector<8x1x128xf32>,
    %c4 = arith.constant 4 : index
    %c0_111 = arith.constant 0 : index
    %c0_112 = arith.constant 0 : index
    %153 = vector.load %arg10[%c4, %c0_111, %c0_112] : memref<5x128x128xf32, #tpu.memory_space<vmem>>, vector<1x128x128xf32>
    %154 = vector.shape_cast %153 : vector<1x128x128xf32> to vector<128x128xf32>
    %cst_113 = arith.constant dense<0.000000e+00> : vector<8x128xf32>
    %155 = tpu.matmul %31, %154, %cst_113 {dimension_numbers = #tpu.dot_dimension_numbers<[1], [0], [0], [1], [0, 0, 1, 1], [], []>} : vector<8x128xf32>, vector<128x128xf32>, vector<8x128xf32> -> vector<8x128xf32>
    %c4_114 = arith.constant 4 : index
    %c0_115 = arith.constant 0 : index
    %c0_116 = arith.constant 0 : index
    %156 = vector.load %arg11[%c4_114, %c0_115, %c0_116] : memref<5x1x128xf32, #tpu.memory_space<vmem>>, vector<1x1x128xf32>
    %157 = vector.shape_cast %156 : vector<1x1x128xf32> to vector<1x128xf32>
    %158 = vector.broadcast %157 : vector<1x128xf32> to vector<8x128xf32>
    %159 = arith.addf %155, %158 : vector<8x128xf32>
    %160 = arith.negf %159 : vector<8x128xf32>
    %161 = math.exp %160 : vector<8x128xf32>
    %cst_117 = arith.constant 1.000000e+00 : f32
    %162 = vector.broadcast %cst_117 : f32 to vector<8x128xf32>
    %163 = arith.addf %162, %161 : vector<8x128xf32>
    %164 = arith.divf %162, %163 : vector<8x128xf32>
    %c4_118 = arith.constant 4 : index
    %c0_119 = arith.constant 0 : index
    %c0_120 = arith.constant 0 : index
    %165 = vector.load %arg12[%c4_118, %c0_119, %c0_120] : memref<5x128x128xf32, #tpu.memory_space<vmem>>, vector<1x128x128xf32>
    %166 = vector.shape_cast %165 : vector<1x128x128xf32> to vector<128x128xf32>
    %cst_121 = arith.constant dense<0.000000e+00> : vector<8x128xf32>
    %167 = tpu.matmul %164, %166, %cst_121 {dimension_numbers = #tpu.dot_dimension_numbers<[1], [0], [0], [1], [0, 0, 1, 1], [], []>} : vector<8x128xf32>, vector<128x128xf32>, vector<8x128xf32> -> vector<8x128xf32>
    %c4_122 = arith.constant 4 : index
    %c0_123 = arith.constant 0 : index
    %c0_124 = arith.constant 0 : index
    %168 = vector.load %arg13[%c4_122, %c0_123, %c0_124] : memref<5x1x128xf32, #tpu.memory_space<vmem>>, vector<1x1x128xf32>
    %169 = vector.shape_cast %168 : vector<1x1x128xf32> to vector<1x128xf32>
    %170 = vector.broadcast %169 : vector<1x128xf32> to vector<8x128xf32>
    %171 = arith.addf %167, %170 : vector<8x128xf32>
    %172 = arith.negf %171 : vector<8x128xf32>
    %173 = math.exp %172 : vector<8x128xf32>
    %cst_125 = arith.constant 1.000000e+00 : f32
    %174 = vector.broadcast %cst_125 : f32 to vector<8x128xf32>
    %175 = arith.addf %174, %173 : vector<8x128xf32>
    %176 = arith.divf %174, %175 : vector<8x128xf32>
    %cst_126 = arith.constant 0.000000e+00 : f32
    %177 = vector.broadcast %cst_126 : f32 to vector<8x128xf32>
    %178 = arith.select %34, %176, %177 : vector<8x128xi1>, vector<8x128xf32>
    %c0_127 = arith.constant 0 : index
    %c4_128 = arith.constant 4 : index
    %c0_129 = arith.constant 0 : index
    %179 = vector.load %arg20[%c0_127, %c4_128, %c0_129] : memref<8x8x128xf32, #tpu.memory_space<vmem>>, vector<8x1x128xf32>
    %180 = vector.shape_cast %179 : vector<8x1x128xf32> to vector<8x128xf32>
    %181 = vector.shape_cast %178 : vector<8x128xf32> to vector<8x1x128xf32>
    tpu.vector_store %arg20[%c0_127, %c4_128, %c0_129], %181 {strides = array<i32>} : memref<8x8x128xf32, #tpu.memory_space<vmem>>, vector<8x1x128xf32>,
    %c0_130 = arith.constant 0 : index
    %c0_131 = arith.constant 0 : index
    %182 = vector.load %arg14[%c0_130, %c0_131] : memref<128x128xf32, #tpu.memory_space<vmem>>, vector<128x128xf32>
    %c0_132 = arith.constant 0 : index
    %c0_133 = arith.constant 0 : index
    %183 = vector.load %arg15[%c0_132, %c0_133] : memref<8x1xf32, #tpu.memory_space<vmem>>, vector<8x1xf32>
    %c0_134 = arith.constant 0 : index
    %c0_135 = arith.constant 0 : index
    %c0_136 = arith.constant 0 : index
    %184 = vector.load %arg20[%c0_134, %c0_135, %c0_136] : memref<8x8x128xf32, #tpu.memory_space<vmem>>, vector<1x8x128xf32>
    %185 = vector.shape_cast %184 : vector<1x8x128xf32> to vector<8x128xf32>
    %186 = vector.broadcast %183 : vector<8x1xf32> to vector<8x128xf32>
    %187 = arith.mulf %185, %186 : vector<8x128xf32>
    %cst_137 = arith.constant dense<0.000000e+00> : vector<128x128xf32>
    %188 = tpu.matmul %185, %187, %cst_137 {dimension_numbers = #tpu.dot_dimension_numbers<[0], [0], [1], [1], [0, 1, 1, 1], [], []>} : vector<8x128xf32>, vector<8x128xf32>, vector<128x128xf32> -> vector<128x128xf32>
    %189 = arith.addf %182, %188 : vector<128x128xf32>
    %190 = arith.truncf %189 : vector<128x128xf32> to vector<128x128xbf16>
    %c0_138 = arith.constant 0 : index
    %c0_139 = arith.constant 0 : index
    %c0_140 = arith.constant 0 : index
    %191 = vector.load %arg19[%c0_138, %c0_139, %c0_140] : memref<8x128x128xbf16, #tpu.memory_space<vmem>>, vector<1x128x128xbf16>
    %192 = vector.shape_cast %191 : vector<1x128x128xbf16> to vector<128x128xbf16>
    %193 = vector.shape_cast %190 : vector<128x128xbf16> to vector<1x128x128xbf16>
    tpu.vector_store %arg19[%c0_138, %c0_139, %c0_140], %193 {strides = array<i32>} : memref<8x128x128xbf16, #tpu.memory_space<vmem>>, vector<1x128x128xbf16>,
    %c1_141 = arith.constant 1 : index
    %c0_142 = arith.constant 0 : index
    %c0_143 = arith.constant 0 : index
    %194 = vector.load %arg20[%c1_141, %c0_142, %c0_143] : memref<8x8x128xf32, #tpu.memory_space<vmem>>, vector<1x8x128xf32>
    %195 = vector.shape_cast %194 : vector<1x8x128xf32> to vector<8x128xf32>
    %196 = vector.broadcast %183 : vector<8x1xf32> to vector<8x128xf32>
    %197 = arith.mulf %195, %196 : vector<8x128xf32>
    %cst_144 = arith.constant dense<0.000000e+00> : vector<128x128xf32>
    %198 = tpu.matmul %195, %197, %cst_144 {dimension_numbers = #tpu.dot_dimension_numbers<[0], [0], [1], [1], [0, 1, 1, 1], [], []>} : vector<8x128xf32>, vector<8x128xf32>, vector<128x128xf32> -> vector<128x128xf32>
    %199 = arith.addf %182, %198 : vector<128x128xf32>
    %200 = arith.truncf %199 : vector<128x128xf32> to vector<128x128xbf16>
    %c1_145 = arith.constant 1 : index
    %c0_146 = arith.constant 0 : index
    %c0_147 = arith.constant 0 : index
    %201 = vector.load %arg19[%c1_145, %c0_146, %c0_147] : memref<8x128x128xbf16, #tpu.memory_space<vmem>>, vector<1x128x128xbf16>
    %202 = vector.shape_cast %201 : vector<1x128x128xbf16> to vector<128x128xbf16>
    %203 = vector.shape_cast %200 : vector<128x128xbf16> to vector<1x128x128xbf16>
    tpu.vector_store %arg19[%c1_145, %c0_146, %c0_147], %203 {strides = array<i32>} : memref<8x128x128xbf16, #tpu.memory_space<vmem>>, vector<1x128x128xbf16>,
    %c2_148 = arith.constant 2 : index
    %c0_149 = arith.constant 0 : index
    %c0_150 = arith.constant 0 : index
    %204 = vector.load %arg20[%c2_148, %c0_149, %c0_150] : memref<8x8x128xf32, #tpu.memory_space<vmem>>, vector<1x8x128xf32>
    %205 = vector.shape_cast %204 : vector<1x8x128xf32> to vector<8x128xf32>
    %206 = vector.broadcast %183 : vector<8x1xf32> to vector<8x128xf32>
    %207 = arith.mulf %205, %206 : vector<8x128xf32>
    %cst_151 = arith.constant dense<0.000000e+00> : vector<128x128xf32>
    %208 = tpu.matmul %205, %207, %cst_151 {dimension_numbers = #tpu.dot_dimension_numbers<[0], [0], [1], [1], [0, 1, 1, 1], [], []>} : vector<8x128xf32>, vector<8x128xf32>, vector<128x128xf32> -> vector<128x128xf32>
    %209 = arith.addf %182, %208 : vector<128x128xf32>
    %210 = arith.truncf %209 : vector<128x128xf32> to vector<128x128xbf16>
    %c2_152 = arith.constant 2 : index
    %c0_153 = arith.constant 0 : index
    %c0_154 = arith.constant 0 : index
    %211 = vector.load %arg19[%c2_152, %c0_153, %c0_154] : memref<8x128x128xbf16, #tpu.memory_space<vmem>>, vector<1x128x128xbf16>
    %212 = vector.shape_cast %211 : vector<1x128x128xbf16> to vector<128x128xbf16>
    %213 = vector.shape_cast %210 : vector<128x128xbf16> to vector<1x128x128xbf16>
    tpu.vector_store %arg19[%c2_152, %c0_153, %c0_154], %213 {strides = array<i32>} : memref<8x128x128xbf16, #tpu.memory_space<vmem>>, vector<1x128x128xbf16>,
    %c3_155 = arith.constant 3 : index
    %c0_156 = arith.constant 0 : index
    %c0_157 = arith.constant 0 : index
    %214 = vector.load %arg20[%c3_155, %c0_156, %c0_157] : memref<8x8x128xf32, #tpu.memory_space<vmem>>, vector<1x8x128xf32>
    %215 = vector.shape_cast %214 : vector<1x8x128xf32> to vector<8x128xf32>
    %216 = vector.broadcast %183 : vector<8x1xf32> to vector<8x128xf32>
    %217 = arith.mulf %215, %216 : vector<8x128xf32>
    %cst_158 = arith.constant dense<0.000000e+00> : vector<128x128xf32>
    %218 = tpu.matmul %215, %217, %cst_158 {dimension_numbers = #tpu.dot_dimension_numbers<[0], [0], [1], [1], [0, 1, 1, 1], [], []>} : vector<8x128xf32>, vector<8x128xf32>, vector<128x128xf32> -> vector<128x128xf32>
    %219 = arith.addf %182, %218 : vector<128x128xf32>
    %220 = arith.truncf %219 : vector<128x128xf32> to vector<128x128xbf16>
    %c3_159 = arith.constant 3 : index
    %c0_160 = arith.constant 0 : index
    %c0_161 = arith.constant 0 : index
    %221 = vector.load %arg19[%c3_159, %c0_160, %c0_161] : memref<8x128x128xbf16, #tpu.memory_space<vmem>>, vector<1x128x128xbf16>
    %222 = vector.shape_cast %221 : vector<1x128x128xbf16> to vector<128x128xbf16>
    %223 = vector.shape_cast %220 : vector<128x128xbf16> to vector<1x128x128xbf16>
    tpu.vector_store %arg19[%c3_159, %c0_160, %c0_161], %223 {strides = array<i32>} : memref<8x128x128xbf16, #tpu.memory_space<vmem>>, vector<1x128x128xbf16>,
    %c4_162 = arith.constant 4 : index
    %c0_163 = arith.constant 0 : index
    %c0_164 = arith.constant 0 : index
    %224 = vector.load %arg20[%c4_162, %c0_163, %c0_164] : memref<8x8x128xf32, #tpu.memory_space<vmem>>, vector<1x8x128xf32>
    %225 = vector.shape_cast %224 : vector<1x8x128xf32> to vector<8x128xf32>
    %226 = vector.broadcast %183 : vector<8x1xf32> to vector<8x128xf32>
    %227 = arith.mulf %225, %226 : vector<8x128xf32>
    %cst_165 = arith.constant dense<0.000000e+00> : vector<128x128xf32>
    %228 = tpu.matmul %225, %227, %cst_165 {dimension_numbers = #tpu.dot_dimension_numbers<[0], [0], [1], [1], [0, 1, 1, 1], [], []>} : vector<8x128xf32>, vector<8x128xf32>, vector<128x128xf32> -> vector<128x128xf32>
    %229 = arith.addf %182, %228 : vector<128x128xf32>
    %230 = arith.truncf %229 : vector<128x128xf32> to vector<128x128xbf16>
    %c4_166 = arith.constant 4 : index
    %c0_167 = arith.constant 0 : index
    %c0_168 = arith.constant 0 : index
    %231 = vector.load %arg19[%c4_166, %c0_167, %c0_168] : memref<8x128x128xbf16, #tpu.memory_space<vmem>>, vector<1x128x128xbf16>
    %232 = vector.shape_cast %231 : vector<1x128x128xbf16> to vector<128x128xbf16>
    %233 = vector.shape_cast %230 : vector<128x128xbf16> to vector<1x128x128xbf16>
    tpu.vector_store %arg19[%c4_166, %c0_167, %c0_168], %233 {strides = array<i32>} : memref<8x128x128xbf16, #tpu.memory_space<vmem>>, vector<1x128x128xbf16>,
    %cst_169 = arith.constant 0.000000e+00 : bf16
    %234 = vector.broadcast %cst_169 : bf16 to vector<128x128xbf16>
    %c5 = arith.constant 5 : index
    %c0_170 = arith.constant 0 : index
    %c0_171 = arith.constant 0 : index
    %235 = vector.load %arg19[%c5, %c0_170, %c0_171] : memref<8x128x128xbf16, #tpu.memory_space<vmem>>, vector<1x128x128xbf16>
    %236 = vector.shape_cast %235 : vector<1x128x128xbf16> to vector<128x128xbf16>
    %237 = vector.shape_cast %234 : vector<128x128xbf16> to vector<1x128x128xbf16>
    tpu.vector_store %arg19[%c5, %c0_170, %c0_171], %237 {strides = array<i32>} : memref<8x128x128xbf16, #tpu.memory_space<vmem>>, vector<1x128x128xbf16>,
    %cst_172 = arith.constant 0.000000e+00 : bf16
    %238 = vector.broadcast %cst_172 : bf16 to vector<128x128xbf16>
    %c6 = arith.constant 6 : index
    %c0_173 = arith.constant 0 : index
    %c0_174 = arith.constant 0 : index
    %239 = vector.load %arg19[%c6, %c0_173, %c0_174] : memref<8x128x128xbf16, #tpu.memory_space<vmem>>, vector<1x128x128xbf16>
    %240 = vector.shape_cast %239 : vector<1x128x128xbf16> to vector<128x128xbf16>
    %241 = vector.shape_cast %238 : vector<128x128xbf16> to vector<1x128x128xbf16>
    tpu.vector_store %arg19[%c6, %c0_173, %c0_174], %241 {strides = array<i32>} : memref<8x128x128xbf16, #tpu.memory_space<vmem>>, vector<1x128x128xbf16>,
    %cst_175 = arith.constant 0.000000e+00 : bf16
    %242 = vector.broadcast %cst_175 : bf16 to vector<128x128xbf16>
    %c7 = arith.constant 7 : index
    %c0_176 = arith.constant 0 : index
    %c0_177 = arith.constant 0 : index
    %243 = vector.load %arg19[%c7, %c0_176, %c0_177] : memref<8x128x128xbf16, #tpu.memory_space<vmem>>, vector<1x128x128xbf16>
    %244 = vector.shape_cast %243 : vector<1x128x128xbf16> to vector<128x128xbf16>
    %245 = vector.shape_cast %242 : vector<128x128xbf16> to vector<1x128x128xbf16>
    tpu.vector_store %arg19[%c7, %c0_176, %c0_177], %245 {strides = array<i32>} : memref<8x128x128xbf16, #tpu.memory_space<vmem>>, vector<1x128x128xbf16>,
    return
  }
}

</mosaic_0001>

<bundles_post_ra>
// kernel: tpu_custom_call.1
= control target key start
LH: loop header
LB: loop body
LE: loop exit
PB: predicated region body
PF: predicated region fallthrough
CT: control target
= control target key end

     0   :  { %s12915_s0 = inlined_call_operand.hbm [shape: bf16[8,4736], index: 0, kind: input, shape index: {}]   ;;  %s12916_s1 = inlined_call_operand.hbm [shape: bf16[4736,256], index: 1, kind: input, shape index: {}]   ;;  %s12917_s2 = inlined_call_operand.hbm [shape: f32[1,256], index: 2, kind: input, shape index: {}]   ;;  %s12918_s3 = inlined_call_operand.hbm [shape: f32[256,128], index: 3, kind: input, shape index: {}]   ;;  %s12919_s4 = inlined_call_operand.hbm [shape: f32[1,128], index: 4, kind: input, shape index: {}]   ;;  %s12920_s5 = inlined_call_operand.hbm [shape: f32[256,128], index: 5, kind: input, shape index: {}]   ;;  %s12921_s6 = inlined_call_operand.hbm [shape: f32[1,128], index: 6, kind: input, shape index: {}]   ;;  %s12922_s7 = inlined_call_operand.hbm [shape: f32[128,128], index: 7, kind: input, shape index: {}]   ;;  %s12923_s8 = inlined_call_operand.hbm [shape: f32[1,128], index: 8, kind: input, shape index: {}]   ;;  %s12924_s9 = inlined_call_operand.hbm [shape: f32[8,128], index: 9, kind: input, shape index: {}]   ;;  %s12925_s10 = inlined_call_operand.hbm [shape: f32[5,128,128], index: 10, kind: input, shape index: {}]   ;;  %s12926_s11 = inlined_call_operand.hbm [shape: f32[5,1,128], index: 11, kind: input, shape index: {}]   ;;  %s12927_s12 = inlined_call_operand.hbm [shape: f32[5,128,128], index: 12, kind: input, shape index: {}]   ;;  %s12928_s13 = inlined_call_operand.hbm [shape: f32[5,1,128], index: 13, kind: input, shape index: {}]   ;;  %s12929_s14 = inlined_call_operand.hbm [shape: f32[128,128], index: 14, kind: input, shape index: {}]   ;;  %s12930_s15 = inlined_call_operand.vmem [shape: f32[8,1], index: 15, kind: input, shape index: {}]   ;;  %s12931_s16 = inlined_call_operand.hbm [shape: f32[8,128], index: 16, kind: output, shape index: {0}]   ;;  %s12932_s17 = inlined_call_operand.hbm [shape: f32[8,128], index: 17, kind: output, shape index: {1}]   ;;  %s12933_s18 = inlined_call_operand.hbm [shape: f32[8,128], index: 18, kind: output, shape index: {2}]   ;;  %s12934_s19 = inlined_call_operand.hbm [shape: bf16[8,128,128], index: 19, kind: output, shape index: {3}]  }
   0x1   :  { %12942 = sst [smem:[#allocation44_spill]] %s12915_s0 }
   0x2   :  { %12943 = sst [smem:[#allocation45_spill]] %s12916_s1 }
   0x3   :  { %12944 = sst [smem:[#allocation46_spill]] %s12917_s2 }
   0x4   :  { %12945 = sst [smem:[#allocation47_spill]] %s12918_s3 }
   0x5   :  { %12946 = sst [smem:[#allocation48_spill]] %s12931_s16 }
   0x6   :  { %12947 = sst [smem:[#allocation49_spill]] %s12933_s18 }
   0x7   :  { %12948 = sst [smem:[#allocation50_spill]] %s12934_s19 }
   0x8   :  { %25 = vsyncpa [#allocation4], 0 }
   0x9   :  { %26 = vsyncpa [#allocation7], 0 }
   0xa   :  { %27 = vsyncpa [#allocation10], 0 }
   0xb   :  { %28 = vsyncpa [#allocation13], 0 }
   0xc   :  { %29 = vsyncpa [#allocation16], 0 }
   0xd   :  { %30 = vsyncpa [#allocation19], 0 }
   0xe   :  { %31 = vsyncpa [#allocation22], 0 }
   0xf   :  { %32 = vsyncpa [#allocation25], 0 }
  0x10   :  { %33 = vsyncpa [#allocation5], 0 }
  0x11   :  { %34 = vsyncpa [#allocation29], 0 }
  0x12   :  { %35 = vsyncpa [#allocation32], 0  ;;  %s12024_s0 = smov [#allocation6]   ;;  %s12949_s1 = sld [smem:[#allocation45_spill]] }
  0x13   :  { %s51_s30 = sshll.u32 %s12024_s0, 4  ;;  %s52_s30 = int_to_ptr.vmem [resolvable:$true] %s51_s30 }
  0x18   :  { %s11584_s22 = scalar_lea.hbm %s12949_s1, 75776 }
  0x19   :  { %p11585_p0 = scmp.ne.s32.totalorder %s12949_s1, %s11584_s22  ;;  %p11588_p1 = scmp.lt.u32.totalorder %s11584_s22, %s12949_s1 }
  0x1b   :  { %p11590_p2 = pnand %p11588_p1, %p11585_p0 }
  0x1d   :  { %11593 = shalt.err (!%p11590_p2)
}
  0x1e   :  { %s11594_s3 = scalar_lea.vmem %s52_s30, 75776  ;;  %p11599_p4 = scmp.lt.s32.totalorder %s52_s30, %s52_s30 }
  0x1f   :  { %p11595_p3 = scmp.ne.s32.totalorder %s52_s30, %s11594_s3  ;;  %p11600_p5 = scmp.lt.s32.totalorder %s11594_s3, %s11594_s3 }
  0x21   :  { %p11601_p6 = por %p11600_p5, %p11599_p4 }
  0x23   :  { %p11602_p7 = pnand %p11601_p6, %p11595_p3 }
  0x25   :  { %11605 = shalt.err (!%p11602_p7)
}
  0x26   :  { %s12025_s26 = smov 128   ;;  %s12026_s27 = smov 8  }
  0x27   :  { %57 = dma.hbm_to_vmem [thread:$0]  %s12949_s1, 75776, %s52_s30, [#allocation7], %s12025_s26, %s12025_s26, %s12026_s27  }
  0x28   :  { %s12027_s0 = smov [#allocation9]   ;;  %s12028_s21 = smov [#allocation12]  }
  0x29   :  { %s73_s20 = sshll.u32 %s12027_s0, 4  ;;  %s95_s22 = sshll.u32 %s12028_s21, 4  ;;  %s74_s20 = int_to_ptr.vmem [resolvable:$true] %s73_s20  ;;  %s96_s22 = int_to_ptr.vmem [resolvable:$true] %s95_s22 }
  0x2a   :  { %s12950_s24 = sld [smem:[#allocation47_spill]] }
  0x30   :  { %s11606_s25 = scalar_lea.hbm %s12950_s24, 4096 }
  0x31   :  { %p11607_p8 = scmp.ne.s32.totalorder %s12950_s24, %s11606_s25  ;;  %p11610_p9 = scmp.lt.u32.totalorder %s11606_s25, %s12950_s24 }
  0x33   :  { %p11612_p10 = pnand %p11610_p9, %p11607_p8 }
  0x35   :  { %11615 = shalt.err (!%p11612_p10)
}
  0x36   :  { %s11616_s30 = scalar_lea.vmem %s74_s20, 4096  ;;  %p11621_p12 = scmp.lt.s32.totalorder %s74_s20, %s74_s20 }
  0x37   :  { %p11617_p11 = scmp.ne.s32.totalorder %s74_s20, %s11616_s30  ;;  %p11622_p13 = scmp.lt.s32.totalorder %s11616_s30, %s11616_s30 }
  0x39   :  { %p11623_p0 = por %p11622_p13, %p11621_p12 }
  0x3b   :  { %p11624_p1 = pnand %p11623_p0, %p11617_p11 }
  0x3d   :  { %11627 = shalt.err (!%p11624_p1)
}
  0x3e   :  { %79 = dma.hbm_to_vmem [thread:$0]  %s12950_s24, 4096, %s74_s20, [#allocation10], %s12025_s26, %s12025_s26, %s12026_s27  }
  0x3f   :  { %s11628_s18 = scalar_lea.hbm %s12920_s5, 4096 }
  0x40   :  { %p11629_p2 = scmp.ne.s32.totalorder %s12920_s5, %s11628_s18  ;;  %p11632_p3 = scmp.lt.u32.totalorder %s11628_s18, %s12920_s5 }
  0x42   :  { %p11634_p4 = pnand %p11632_p3, %p11629_p2 }
  0x44   :  { %11637 = shalt.err (!%p11634_p4)
}
  0x45   :  { %s11638_s23 = scalar_lea.vmem %s96_s22, 4096  ;;  %p11643_p6 = scmp.lt.s32.totalorder %s96_s22, %s96_s22 }
  0x46   :  { %p11639_p5 = scmp.ne.s32.totalorder %s96_s22, %s11638_s23  ;;  %p11644_p7 = scmp.lt.s32.totalorder %s11638_s23, %s11638_s23 }
  0x48   :  { %p11645_p8 = por %p11644_p7, %p11643_p6 }
  0x4a   :  { %p11646_p9 = pnand %p11645_p8, %p11639_p5 }
  0x4c   :  { %11649 = shalt.err (!%p11646_p9)
}
  0x4d   :  { %101 = dma.hbm_to_vmem [thread:$0]  %s12920_s5, 4096, %s96_s22, [#allocation13], %s12025_s26, %s12025_s26, %s12026_s27  }
  0x4e   :  { %s12029_s25 = smov [#allocation15]   ;;  %s12030_s30 = smov [#allocation18]  }
  0x4f   :  { %s117_s3 = sshll.u32 %s12029_s25, 4  ;;  %s140_s1 = sshll.u32 %s12030_s30, 4  ;;  %s118_s3 = int_to_ptr.vmem [resolvable:$true] %s117_s3  ;;  %s141_s1 = int_to_ptr.vmem [resolvable:$true] %s140_s1 }
  0x50   :  { %s11650_s16 = scalar_lea.hbm %s12922_s7, 2048 }
  0x51   :  { %p11651_p10 = scmp.ne.s32.totalorder %s12922_s7, %s11650_s16  ;;  %p11654_p11 = scmp.lt.u32.totalorder %s11650_s16, %s12922_s7 }
  0x53   :  { %p11656_p12 = pnand %p11654_p11, %p11651_p10 }
  0x55   :  { %11659 = shalt.err (!%p11656_p12)
}
  0x56   :  { %s11660_s5 = scalar_lea.vmem %s118_s3, 2048  ;;  %p11665_p0 = scmp.lt.s32.totalorder %s118_s3, %s118_s3 }
  0x57   :  { %p11661_p13 = scmp.ne.s32.totalorder %s118_s3, %s11660_s5  ;;  %p11666_p1 = scmp.lt.s32.totalorder %s11660_s5, %s11660_s5 }
  0x59   :  { %p11667_p2 = por %p11666_p1, %p11665_p0 }
  0x5b   :  { %p11668_p3 = pnand %p11667_p2, %p11661_p13 }
  0x5d   :  { %11671 = shalt.err (!%p11668_p3)
}
  0x5e   :  { %123 = dma.hbm_to_vmem [thread:$0]  %s12922_s7, 2048, %s118_s3, [#allocation16], %s12025_s26, %s12025_s26, %s12026_s27  }
  0x5f   :  { %s11672_s24 = scalar_lea.hbm %s12924_s9, 128 }
  0x60   :  { %p11673_p4 = scmp.ne.s32.totalorder %s12924_s9, %s11672_s24  ;;  %p11676_p5 = scmp.lt.u32.totalorder %s11672_s24, %s12924_s9 }
  0x62   :  { %p11678_p6 = pnand %p11676_p5, %p11673_p4 }
  0x64   :  { %11681 = shalt.err (!%p11678_p6)
}
  0x65   :  { %s11682_s16 = scalar_lea.vmem %s141_s1, 128  ;;  %p11687_p8 = scmp.lt.s32.totalorder %s141_s1, %s141_s1 }
  0x66   :  { %p11683_p7 = scmp.ne.s32.totalorder %s141_s1, %s11682_s16  ;;  %p11688_p9 = scmp.lt.s32.totalorder %s11682_s16, %s11682_s16 }
  0x68   :  { %p11689_p10 = por %p11688_p9, %p11687_p8 }
  0x6a   :  { %p11690_p11 = pnand %p11689_p10, %p11683_p7 }
  0x6c   :  { %11693 = shalt.err (!%p11690_p11)
}
  0x6d   :  { %143 = dma.hbm_to_vmem [thread:$0]  %s12924_s9, 128, %s141_s1, [#allocation19]  }
  0x6e   :  { %s12031_s18 = smov [#allocation21]   ;;  %s11694_s5 = scalar_lea.hbm %s12926_s11, 80 }
  0x6f   :  { %s161_s29 = sshll.u32 %s12031_s18, 4  ;;  %p11695_p12 = scmp.ne.s32.totalorder %s12926_s11, %s11694_s5  ;;  %s162_s29 = int_to_ptr.vmem [resolvable:$true] %s161_s29 }
  0x70   :  { %p11698_p13 = scmp.lt.u32.totalorder %s11694_s5, %s12926_s11 }
  0x72   :  { %p11700_p0 = pnand %p11698_p13, %p11695_p12 }
  0x74   :  { %11703 = shalt.err (!%p11700_p0)
}
  0x75   :  { %s11704_s24 = scalar_lea.vmem %s162_s29, 80  ;;  %s11708_s9 = scalar_lea.vmem %s162_s29, 96 }
  0x76   :  { %p11705_p1 = scmp.ne.s32.totalorder %s162_s29, %s11704_s24  ;;  %p11709_p2 = scmp.lt.s32.totalorder %s162_s29, %s162_s29 }
  0x77   :  { %p11710_p3 = scmp.lt.s32.totalorder %s11708_s9, %s11704_s24 }
  0x79   :  { %p11711_p4 = por %p11710_p3, %p11709_p2 }
  0x7b   :  { %p11712_p5 = pnand %p11711_p4, %p11705_p1 }
  0x7d   :  { %11715 = shalt.err (!%p11712_p5)
}
  0x7e   :  { %s12032_s1 = smov 16   ;;  %s12033_s25 = smov 1  }
  0x7f   :  { %167 = dma.hbm_to_vmem [thread:$0]  %s12926_s11, 80, %s162_s29, [#allocation22], %s12032_s1, %s12032_s1, %s12033_s25  }
  0x80   :  { %s12034_s19 = smov [#allocation24]   ;;  %s12035_s7 = smov [#allocation3]  }
  0x81   :  { %s185_s16 = sshll.u32 %s12034_s19, 4  ;;  %s42_s3 = sshll.u32 %s12035_s7, 4  ;;  %s186_s16 = int_to_ptr.vmem [resolvable:$true] %s185_s16  ;;  %s43_s3 = int_to_ptr.vmem [resolvable:$true] %s42_s3 }
  0x82   :  { %s11716_s21 = scalar_lea.hbm %s12928_s13, 80 }
  0x83   :  { %p11717_p6 = scmp.ne.s32.totalorder %s12928_s13, %s11716_s21  ;;  %p11720_p7 = scmp.lt.u32.totalorder %s11716_s21, %s12928_s13 }
  0x85   :  { %p11722_p8 = pnand %p11720_p7, %p11717_p6 }
  0x87   :  { %11725 = shalt.err (!%p11722_p8)
}
  0x88   :  { %s11726_s11 = scalar_lea.vmem %s186_s16, 80  ;;  %s11730_s29 = scalar_lea.vmem %s186_s16, 96 }
  0x89   :  { %p11727_p9 = scmp.ne.s32.totalorder %s186_s16, %s11726_s11  ;;  %p11731_p10 = scmp.lt.s32.totalorder %s186_s16, %s186_s16 }
  0x8a   :  { %p11732_p11 = scmp.lt.s32.totalorder %s11730_s29, %s11726_s11 }
  0x8c   :  { %p11733_p12 = por %p11732_p11, %p11731_p10 }
  0x8e   :  { %p11734_p13 = pnand %p11733_p12, %p11727_p9 }
  0x90   :  { %11737 = shalt.err (!%p11734_p13)
}
  0x91   :  { %191 = dma.hbm_to_vmem [thread:$0]  %s12928_s13, 80, %s186_s16, [#allocation25], %s12032_s1, %s12032_s1, %s12033_s25  }
  0x92   :  { %s12951_s28 = sld [smem:[#allocation44_spill]] }
  0x98   :  { %s11738_s19 = scalar_lea.hbm %s12951_s28, 2368 }
  0x99   :  { %p11739_p0 = scmp.ne.s32.totalorder %s12951_s28, %s11738_s19  ;;  %p11742_p1 = scmp.lt.u32.totalorder %s11738_s19, %s12951_s28 }
  0x9b   :  { %p11744_p2 = pnand %p11742_p1, %p11739_p0 }
  0x9d   :  { %11747 = shalt.err (!%p11744_p2)
}
  0x9e   :  { %s11748_s5 = scalar_lea.vmem %s43_s3, 2368  ;;  %p11753_p4 = scmp.lt.s32.totalorder %s43_s3, %s43_s3 }
  0x9f   :  { %p11749_p3 = scmp.ne.s32.totalorder %s43_s3, %s11748_s5  ;;  %p11754_p5 = scmp.lt.s32.totalorder %s11748_s5, %s11748_s5 }
  0xa1   :  { %p11755_p6 = por %p11754_p5, %p11753_p4 }
  0xa3   :  { %p11756_p7 = pnand %p11755_p6, %p11749_p3 }
  0xa5   :  { %11759 = shalt.err (!%p11756_p7)
}
  0xa6   :  { %45 = dma.hbm_to_vmem [thread:$0]  %s12951_s28, 2368, %s43_s3, [#allocation4]  }
  0xa7   :  { %s12036_s25 = smov [#allocation8]   ;;  %s12037_s22 = smov [#allocation11]  }
  0xa8   :  { %s64_s16 = sshll.u32 %s12036_s25, 4  ;;  %s86_s2 = sshll.u32 %s12037_s22, 4  ;;  %s65_s16 = int_to_ptr.vmem [resolvable:$true] %s64_s16  ;;  %s87_s2 = int_to_ptr.vmem [resolvable:$true] %s86_s2 }
  0xa9   :  { %s12952_s29 = sld [smem:[#allocation46_spill]] }
  0xaf   :  { %s11760_s20 = scalar_lea.hbm %s12952_s29, 32 }
  0xb0   :  { %p11761_p8 = scmp.ne.s32.totalorder %s12952_s29, %s11760_s20  ;;  %p11764_p9 = scmp.lt.u32.totalorder %s11760_s20, %s12952_s29 }
  0xb2   :  { %p11766_p10 = pnand %p11764_p9, %p11761_p8 }
  0xb4   :  { %11769 = shalt.err (!%p11766_p10)
}
  0xb5   :  { %s11770_s3 = scalar_lea.vmem %s65_s16, 32  ;;  %p11775_p12 = scmp.lt.s32.totalorder %s65_s16, %s65_s16 }
  0xb6   :  { %p11771_p11 = scmp.ne.s32.totalorder %s65_s16, %s11770_s3  ;;  %p11776_p13 = scmp.lt.s32.totalorder %s11770_s3, %s11770_s3 }
  0xb8   :  { %p11777_p0 = por %p11776_p13, %p11775_p12 }
  0xba   :  { %p11778_p1 = pnand %p11777_p0, %p11771_p11 }
  0xbc   :  { %11781 = shalt.err (!%p11778_p1)
}
  0xbd   :  { %67 = dma.hbm_to_vmem [thread:$0]  %s12952_s29, 32, %s65_s16, [#allocation7]  }
  0xbe   :  { %s11782_s21 = scalar_lea.hbm %s12919_s4, 16 }
  0xbf   :  { %p11783_p2 = scmp.ne.s32.totalorder %s12919_s4, %s11782_s21  ;;  %p11786_p3 = scmp.lt.u32.totalorder %s11782_s21, %s12919_s4 }
  0xc1   :  { %p11788_p4 = pnand %p11786_p3, %p11783_p2 }
  0xc3   :  { %11791 = shalt.err (!%p11788_p4)
}
  0xc4   :  { %s11792_s22 = scalar_lea.vmem %s87_s2, 16  ;;  %s11796_s23 = scalar_lea.vmem %s87_s2, 32 }
  0xc5   :  { %p11793_p5 = scmp.ne.s32.totalorder %s87_s2, %s11792_s22  ;;  %p11797_p6 = scmp.lt.s32.totalorder %s87_s2, %s87_s2 }
  0xc6   :  { %p11798_p7 = scmp.lt.s32.totalorder %s11796_s23, %s11792_s22 }
  0xc8   :  { %p11799_p8 = por %p11798_p7, %p11797_p6 }
  0xca   :  { %p11800_p9 = pnand %p11799_p8, %p11793_p5 }
  0xcc   :  { %11803 = shalt.err (!%p11800_p9)
}
  0xcd   :  { %89 = dma.hbm_to_vmem [thread:$0]  %s12919_s4, 16, %s87_s2, [#allocation10]  }
  0xce   :  { %s12038_s29 = smov [#allocation14]   ;;  %s12039_s24 = smov [#allocation17]  }
  0xcf   :  { %s108_s20 = sshll.u32 %s12038_s29, 4  ;;  %s130_s9 = sshll.u32 %s12039_s24, 4  ;;  %s109_s20 = int_to_ptr.vmem [resolvable:$true] %s108_s20  ;;  %s131_s9 = int_to_ptr.vmem [resolvable:$true] %s130_s9 }
  0xd0   :  { %s11804_s3 = scalar_lea.hbm %s12921_s6, 16 }
  0xd1   :  { %p11805_p10 = scmp.ne.s32.totalorder %s12921_s6, %s11804_s3  ;;  %p11808_p11 = scmp.lt.u32.totalorder %s11804_s3, %s12921_s6 }
  0xd3   :  { %p11810_p12 = pnand %p11808_p11, %p11805_p10 }
  0xd5   :  { %11813 = shalt.err (!%p11810_p12)
}
  0xd6   :  { %s11814_s4 = scalar_lea.vmem %s109_s20, 16  ;;  %s11818_s2 = scalar_lea.vmem %s109_s20, 32 }
  0xd7   :  { %p11815_p13 = scmp.ne.s32.totalorder %s109_s20, %s11814_s4  ;;  %p11819_p0 = scmp.lt.s32.totalorder %s109_s20, %s109_s20 }
  0xd8   :  { %p11820_p1 = scmp.lt.s32.totalorder %s11818_s2, %s11814_s4 }
  0xda   :  { %p11821_p2 = por %p11820_p1, %p11819_p0 }
  0xdc   :  { %p11822_p3 = pnand %p11821_p2, %p11815_p13 }
  0xde   :  { %11825 = shalt.err (!%p11822_p3)
}
  0xdf   :  { %111 = dma.hbm_to_vmem [thread:$0]  %s12921_s6, 16, %s109_s20, [#allocation13]  }
  0xe0   :  { %s11826_s25 = scalar_lea.hbm %s12923_s8, 16 }
  0xe1   :  { %p11827_p4 = scmp.ne.s32.totalorder %s12923_s8, %s11826_s25  ;;  %p11830_p5 = scmp.lt.u32.totalorder %s11826_s25, %s12923_s8 }
  0xe3   :  { %p11832_p6 = pnand %p11830_p5, %p11827_p4 }
  0xe5   :  { %11835 = shalt.err (!%p11832_p6)
}
  0xe6   :  { %s11836_s29 = scalar_lea.vmem %s131_s9, 16  ;;  %s11840_s24 = scalar_lea.vmem %s131_s9, 32 }
  0xe7   :  { %p11837_p7 = scmp.ne.s32.totalorder %s131_s9, %s11836_s29  ;;  %p11841_p8 = scmp.lt.s32.totalorder %s131_s9, %s131_s9 }
  0xe8   :  { %p11842_p9 = scmp.lt.s32.totalorder %s11840_s24, %s11836_s29 }
  0xea   :  { %p11843_p10 = por %p11842_p9, %p11841_p8 }
  0xec   :  { %p11844_p11 = pnand %p11843_p10, %p11837_p7 }
  0xee   :  { %11847 = shalt.err (!%p11844_p11)
}
  0xef   :  { %133 = dma.hbm_to_vmem [thread:$0]  %s12923_s8, 16, %s131_s9, [#allocation16]  }
  0xf0   :  { %s12040_s30 = smov [#allocation20]   ;;  %s12041_s3 = smov [#allocation23]  }
  0xf1   :  { %s149_s19 = sshll.u32 %s12040_s30, 4  ;;  %s173_s28 = sshll.u32 %s12041_s3, 4  ;;  %s150_s19 = int_to_ptr.vmem [resolvable:$true] %s149_s19  ;;  %s12310_s28 = int_to_ptr.vmem [resolvable:$true] %s173_s28 }
  0xf2   :  { %s11848_s0 = scalar_lea.hbm %s12925_s10, 10240 }
  0xf3   :  { %p11849_p12 = scmp.ne.s32.totalorder %s12925_s10, %s11848_s0  ;;  %p11852_p13 = scmp.lt.u32.totalorder %s11848_s0, %s12925_s10 }
  0xf5   :  { %p11854_p0 = pnand %p11852_p13, %p11849_p12 }
  0xf7   :  { %11857 = shalt.err (!%p11854_p0)
}
  0xf8   :  { %s11858_s8 = scalar_lea.vmem %s150_s19, 10240  ;;  %p11863_p2 = scmp.lt.s32.totalorder %s150_s19, %s150_s19 }
  0xf9   :  { %p11859_p1 = scmp.ne.s32.totalorder %s150_s19, %s11858_s8  ;;  %p11864_p3 = scmp.lt.s32.totalorder %s11858_s8, %s11858_s8 }
  0xfb   :  { %p11865_p4 = por %p11864_p3, %p11863_p2 }
  0xfd   :  { %p11866_p5 = pnand %p11865_p4, %p11859_p1 }
  0xff   :  { %11869 = shalt.err (!%p11866_p5)
}
 0x100   :  { %155 = dma.hbm_to_vmem [thread:$0]  %s12925_s10, 10240, %s150_s19, [#allocation19], %s12025_s26, %s12025_s26, %s12026_s27  }
 0x101   :  { %s11870_s22 = scalar_lea.hbm %s12927_s12, 10240 }
 0x102   :  { %p11871_p6 = scmp.ne.s32.totalorder %s12927_s12, %s11870_s22  ;;  %p11874_p7 = scmp.lt.u32.totalorder %s11870_s22, %s12927_s12 }
 0x104   :  { %p11876_p8 = pnand %p11874_p7, %p11871_p6 }
 0x106   :  { %11879 = shalt.err (!%p11876_p8)
}
 0x107   :  { %s11880_s24 = scalar_lea.vmem %s12310_s28, 10240  ;;  %p11885_p10 = scmp.lt.s32.totalorder %s12310_s28, %s12310_s28 }
 0x108   :  { %p11881_p9 = scmp.ne.s32.totalorder %s12310_s28, %s11880_s24  ;;  %p11886_p11 = scmp.lt.s32.totalorder %s11880_s24, %s11880_s24 }
 0x10a   :  { %p11887_p12 = por %p11886_p11, %p11885_p10 }
 0x10c   :  { %p11888_p13 = pnand %p11887_p12, %p11881_p9 }
 0x10e   :  { %11891 = shalt.err (!%p11888_p13)
}
 0x10f   :  { %179 = dma.hbm_to_vmem [thread:$0]  %s12927_s12, 10240, %s12310_s28, [#allocation22], %s12025_s26, %s12025_s26, %s12026_s27  }
 0x110   :  { %s12042_s20 = smov [#allocation26]   ;;  %s11892_s7 = scalar_lea.hbm %s12929_s14, 2048 }
 0x111   :  { %s197_s30 = sshll.u32 %s12042_s20, 4  ;;  %p11893_p0 = scmp.ne.s32.totalorder %s12929_s14, %s11892_s7  ;;  %s198_s30 = int_to_ptr.vmem [resolvable:$true] %s197_s30 }
 0x112   :  { %p11896_p1 = scmp.lt.u32.totalorder %s11892_s7, %s12929_s14 }
 0x114   :  { %p11898_p2 = pnand %p11896_p1, %p11893_p0 }
 0x116   :  { %11901 = shalt.err (!%p11898_p2)
}
 0x117   :  { %s11902_s21 = scalar_lea.vmem %s198_s30, 2048  ;;  %p11907_p4 = scmp.lt.s32.totalorder %s198_s30, %s198_s30 }
 0x118   :  { %p11903_p3 = scmp.ne.s32.totalorder %s198_s30, %s11902_s21  ;;  %p11908_p5 = scmp.lt.s32.totalorder %s11902_s21, %s11902_s21 }
 0x11a   :  { %p11909_p6 = por %p11908_p5, %p11907_p4 }
 0x11c   :  { %p11910_p7 = pnand %p11909_p6, %p11903_p3 }
 0x11e   :  { %11913 = shalt.err (!%p11910_p7)
}
 0x11f   :  { %203 = dma.hbm_to_vmem [thread:$0]  %s12929_s14, 2048, %s198_s30, [#allocation25], %s12025_s26, %s12025_s26, %s12026_s27  }
 0x120   :  { %12002 = dma.done.wait [#allocation4], 2368  }
 0x121   :  { %12003 = vsyncadd [#allocation4], 4294964928 }
 0x122   :  { %12004 = dma.done.wait [#allocation7], 75808  }
 0x123   :  { %12005 = vsyncadd [#allocation7], 4294891488 }
 0x124   :  { %12006 = dma.done.wait [#allocation10], 4112  }
 0x125   :  { %12007 = vsyncadd [#allocation10], 4294963184 }
 0x126   :  { %12008 = dma.done.wait [#allocation13], 4112  }
 0x127   :  { %12009 = vsyncadd [#allocation13], 4294963184 }
 0x128   :  { %12010 = dma.done.wait [#allocation16], 2064  }
 0x129   :  { %12011 = vsyncadd [#allocation16], 4294965232 }
 0x12a   :  { %12012 = dma.done.wait [#allocation19], 10368  }
 0x12b   :  { %12013 = vsyncadd [#allocation19], 4294956928 }
 0x12c   :  { %12014 = dma.done.wait [#allocation22], 10320  }
 0x12d   :  { %12015 = vsyncadd [#allocation22], 4294956976 }
 0x12e   :  { %12016 = dma.done.wait [#allocation25], 2128  }
 0x12f   :  { %12017 = vsyncadd [#allocation25], 4294965168  ;;  %v10617_v0 = vld [vmem:[#allocation6 + $0x504] ss:$8 sps:$4 sm:$0xff]   ;;  %v10619_v1 = vld [vmem:[#allocation6 + $0x500] ss:$8 sps:$4 sm:$0xff]  }
 0x130   :  { %4170 = vmatprep.subr.bf16.mxu0 %v10617_v0  ;;  %v10620_v2 = vld [vmem:[#allocation6 + $0x514] ss:$8 sps:$4 sm:$0xff]   ;;  %v10622_v3 = vld [vmem:[#allocation6 + $0x510] ss:$8 sps:$4 sm:$0xff]   ;;  %v10623_v4 = vld [vmem:[#allocation6 + $0x524] ss:$8 sps:$4 sm:$0xff]  }
 0x131   :  { %4171 = vmatpush1.bf16.msra.mxu0 %v10619_v1  ;;  %v10625_v5 = vld [vmem:[#allocation6 + $0x520] ss:$8 sps:$4 sm:$0xff]   ;;  %v10626_v6 = vld [vmem:[#allocation6 + $0x534] ss:$8 sps:$4 sm:$0xff]   ;;  %v10628_v7 = vld [vmem:[#allocation6 + $0x530] ss:$8 sps:$4 sm:$0xff]  }
 0x132   :  { %4172 = vmatprep.subr.bf16.mxu0 %v10620_v2  ;;  %v10629_v8 = vld [vmem:[#allocation6 + $0x544] ss:$8 sps:$4 sm:$0xff]   ;;  %v10631_v9 = vld [vmem:[#allocation6 + $0x540] ss:$8 sps:$4 sm:$0xff]   ;;  %v10632_v10 = vld [vmem:[#allocation6 + $0x554] ss:$8 sps:$4 sm:$0xff]  }
 0x133   :  { %v10634_v11 = vld [vmem:[#allocation6 + $0x550] ss:$8 sps:$4 sm:$0xff]   ;;  %v10635_v12 = vld [vmem:[#allocation6 + $0x564] ss:$8 sps:$4 sm:$0xff]   ;;  %v10637_v15 = vld [vmem:[#allocation6 + $0x560] ss:$8 sps:$4 sm:$0xff]  }
 0x134   :  { %v257_v13 = vld [vmem:[#allocation3 + $0x28] sm:$0xff]  ;;  %v10641_v18 = vld [vmem:[#allocation6 + $0x584] ss:$8 sps:$4 sm:$0xff]   ;;  %v10643_v19 = vld [vmem:[#allocation6 + $0x580] ss:$8 sps:$4 sm:$0xff]   ;;  %vm12045_vm0 = vmmov 0  }
 0x135   :  { %4173 = vmatpush1.bf16.msra.mxu0 %v10622_v3  ;;  %v8191_v14 = vcombine.high %v257_v13, %v257_v13  ;;  %v10638_v16 = vld [vmem:[#allocation6 + $0x574] ss:$8 sps:$4 sm:$0xff]   ;;  %v10640_v17 = vld [vmem:[#allocation6 + $0x570] ss:$8 sps:$4 sm:$0xff]   ;;  %v10647_v22 = vld [vmem:[#allocation6 + $0x5a4] ss:$8 sps:$4 sm:$0xff]   ;;  %v8190_v36 = vcombine.low %v257_v13, %v257_v13 }
 0x136   :  { %4174 = vmatprep.subr.bf16.mxu0 %v10623_v4  ;;  %v10644_v20 = vld [vmem:[#allocation6 + $0x594] ss:$8 sps:$4 sm:$0xff]   ;;  %v10646_v21 = vld [vmem:[#allocation6 + $0x590] ss:$8 sps:$4 sm:$0xff]   ;;  %v10649_v23 = vld [vmem:[#allocation6 + $0x5a0] ss:$8 sps:$4 sm:$0xff]  }
 0x137   :  { %4202 = vmatprep.mubr.bf16.mxu0 %v8191_v14  ;;  %v10650_v24 = vld [vmem:[#allocation6 + $0x5b4] ss:$8 sps:$4 sm:$0xff]   ;;  %v10652_v25 = vld [vmem:[#allocation6 + $0x5b0] ss:$8 sps:$4 sm:$0xff]   ;;  %v10653_v26 = vld [vmem:[#allocation6 + $0x5c4] ss:$8 sps:$4 sm:$0xff]  }
 0x138   :  { %v10655_v27 = vld [vmem:[#allocation6 + $0x5c0] ss:$8 sps:$4 sm:$0xff]   ;;  %v10656_v28 = vld [vmem:[#allocation6 + $0x5d4] ss:$8 sps:$4 sm:$0xff]   ;;  %v10658_v29 = vld [vmem:[#allocation6 + $0x5d0] ss:$8 sps:$4 sm:$0xff]  }
 0x139   :  { %4175 = vmatpush1.bf16.msra.mxu0 %v10625_v5  ;;  %v10659_v30 = vld [vmem:[#allocation6 + $0x5e4] ss:$8 sps:$4 sm:$0xff]   ;;  %v10661_v31 = vld [vmem:[#allocation6 + $0x5e0] ss:$8 sps:$4 sm:$0xff]   ;;  %v10662_v32 = vld [vmem:[#allocation6 + $0x5f4] ss:$8 sps:$4 sm:$0xff]  }
 0x13a   :  { %4176 = vmatprep.subr.bf16.mxu0 %v10626_v6  ;;  %v10664_v33 = vld [vmem:[#allocation6 + $0x5f0] ss:$8 sps:$4 sm:$0xff]   ;;  %v10669_v34 = vld [vmem:[#allocation6 + $0x604] ss:$8 sps:$4 sm:$0xff]   ;;  %v12362_v35 = vld [vmem:[#allocation3 + $0x30] sm:$0xff]  ;;  %vm6474_vm2 = vcmask 64512  }
 0x13b   :  { %v10667_v37 = vld [vmem:[#allocation6 + $0x600] ss:$8 sps:$4 sm:$0xff]   ;;  %v8193_v38 = vcombine.high %v12362_v35, %v12362_v35  ;;  %v10672_v39 = vld [vmem:[#allocation6 + $0x614] ss:$8 sps:$4 sm:$0xff]   ;;  %v10670_v40 = vld [vmem:[#allocation6 + $0x610] ss:$8 sps:$4 sm:$0xff]  }
 0x13c   :  { %v10675_v41 = vld [vmem:[#allocation6 + $0x624] ss:$8 sps:$4 sm:$0xff]   ;;  %v10673_v42 = vld [vmem:[#allocation6 + $0x620] ss:$8 sps:$4 sm:$0xff]   ;;  %v10678_v43 = vld [vmem:[#allocation6 + $0x634] ss:$8 sps:$4 sm:$0xff]  }
 0x13d   :  { %4177 = vmatpush1.bf16.msra.mxu0 %v10628_v7  ;;  %v10676_v44 = vld [vmem:[#allocation6 + $0x630] ss:$8 sps:$4 sm:$0xff]   ;;  %v10681_v45 = vld [vmem:[#allocation6 + $0x644] ss:$8 sps:$4 sm:$0xff]   ;;  %v10679_v46 = vld [vmem:[#allocation6 + $0x640] ss:$8 sps:$4 sm:$0xff]   ;;  %v8192_v7 = vcombine.low %v12362_v35, %v12362_v35 }
 0x13e   :  { %4178 = vmatprep.subr.bf16.mxu0 %v10629_v8  ;;  %v10684_v47 = vld [vmem:[#allocation6 + $0x654] ss:$8 sps:$4 sm:$0xff]   ;;  %v10682_v48 = vld [vmem:[#allocation6 + $0x650] ss:$8 sps:$4 sm:$0xff]   ;;  %v10687_v49 = vld [vmem:[#allocation6 + $0x664] ss:$8 sps:$4 sm:$0xff]  }
 0x13f   :  { %v10685_v50 = vld [vmem:[#allocation6 + $0x660] ss:$8 sps:$4 sm:$0xff]   ;;  %v10690_v51 = vld [vmem:[#allocation6 + $0x674] ss:$8 sps:$4 sm:$0xff]   ;;  %v10688_v52 = vld [vmem:[#allocation6 + $0x670] ss:$8 sps:$4 sm:$0xff]  }
 0x140   :  { %v10693_v53 = vld [vmem:[#allocation6 + $0x684] ss:$8 sps:$4 sm:$0xff]   ;;  %v10691_v54 = vld [vmem:[#allocation6 + $0x680] ss:$8 sps:$4 sm:$0xff]   ;;  %v10696_v55 = vld [vmem:[#allocation6 + $0x694] ss:$8 sps:$4 sm:$0xff]  }
 0x141   :  { %4179 = vmatpush1.bf16.msra.mxu0 %v10631_v9  ;;  %v10694_v56 = vld [vmem:[#allocation6 + $0x690] ss:$8 sps:$4 sm:$0xff]   ;;  %v10699_v57 = vld [vmem:[#allocation6 + $0x6a4] ss:$8 sps:$4 sm:$0xff]   ;;  %v10697_v58 = vld [vmem:[#allocation6 + $0x6a0] ss:$8 sps:$4 sm:$0xff]  }
 0x142   :  { %4180 = vmatprep.subr.bf16.mxu0 %v10632_v10  ;;  %v10702_v59 = vld [vmem:[#allocation6 + $0x6b4] ss:$8 sps:$4 sm:$0xff]   ;;  %v10700_v60 = vld [vmem:[#allocation6 + $0x6b0] ss:$8 sps:$4 sm:$0xff]   ;;  %v10705_v61 = vld [vmem:[#allocation6 + $0x6c4] ss:$8 sps:$4 sm:$0xff]  }
 0x143   :  { %v10703_v62 = vld [vmem:[#allocation6 + $0x6c0] ss:$8 sps:$4 sm:$0xff]   ;;  %v10708_v63 = vld [vmem:[#allocation6 + $0x6d4] ss:$8 sps:$4 sm:$0xff]   ;;  %v10706_v0 = vld [vmem:[#allocation6 + $0x6d0] ss:$8 sps:$4 sm:$0xff]  }
 0x144   :  { %v10711_v1 = vld [vmem:[#allocation6 + $0x6e4] ss:$8 sps:$4 sm:$0xff]   ;;  %v10709_v2 = vld [vmem:[#allocation6 + $0x6e0] ss:$8 sps:$4 sm:$0xff]   ;;  %v10714_v3 = vld [vmem:[#allocation6 + $0x6f4] ss:$8 sps:$4 sm:$0xff]  }
 0x145   :  { %4181 = vmatpush1.bf16.msra.mxu0 %v10634_v11  ;;  %v10712_v4 = vld [vmem:[#allocation6 + $0x6f0] ss:$8 sps:$4 sm:$0xff]   ;;  %v10719_v5 = vld [vmem:[#allocation6 + $0x704] ss:$8 sps:$4 sm:$0xff]   ;;  %v10717_v8 = vld [vmem:[#allocation6 + $0x700] ss:$8 sps:$4 sm:$0xff]  }
 0x146   :  { %4182 = vmatprep.subr.bf16.mxu0 %v10635_v12  ;;  %v12366_v6 = vld [vmem:[#allocation3 + $0x38] sm:$0xff]  ;;  %v10722_v9 = vld [vmem:[#allocation6 + $0x714] ss:$8 sps:$4 sm:$0xff]   ;;  %v10720_v11 = vld [vmem:[#allocation6 + $0x710] ss:$8 sps:$4 sm:$0xff]   ;;  %s12049_s5 = smov [#allocation27]  }
 0x147   :  { %v8195_v10 = vcombine.high %v12366_v6, %v12366_v6  ;;  %v10725_v12 = vld [vmem:[#allocation6 + $0x724] ss:$8 sps:$4 sm:$0xff]   ;;  %v10723_v13 = vld [vmem:[#allocation6 + $0x720] ss:$8 sps:$4 sm:$0xff]   ;;  %v10728_v14 = vld [vmem:[#allocation6 + $0x734] ss:$8 sps:$4 sm:$0xff]  }
 0x148   :  { %v10747_v35 = vld [vmem:[#allocation6 + $0x7a0] ss:$8 sps:$4 sm:$0xff]   ;;  %s8121_s8 = sshll.u32 %s12049_s5, 4  ;;  %s8122_s8 = int_to_ptr.vmem [resolvable:$true] %s8121_s8 }
 0x149   :  { %4183 = vmatpush1.bf16.msra.mxu0 %v10637_v15  ;;  %v10726_v15 = vld [vmem:[#allocation6 + $0x730] ss:$8 sps:$4 sm:$0xff]  }
 0x14a   :  { %4184 = vmatprep.subr.bf16.mxu0 %v10638_v16  ;;  %v10731_v16 = vld [vmem:[#allocation6 + $0x744] ss:$8 sps:$4 sm:$0xff]  }
 0x14d   :  { %4185 = vmatpush1.bf16.msra.mxu0 %v10640_v17  ;;  %v10729_v17 = vld [vmem:[#allocation6 + $0x740] ss:$8 sps:$4 sm:$0xff]  }
 0x14e   :  { %4186 = vmatprep.subr.bf16.mxu0 %v10641_v18  ;;  %v10734_v18 = vld [vmem:[#allocation6 + $0x754] ss:$8 sps:$4 sm:$0xff]  }
 0x151   :  { %4187 = vmatpush1.bf16.msra.mxu0 %v10643_v19  ;;  %v10732_v19 = vld [vmem:[#allocation6 + $0x750] ss:$8 sps:$4 sm:$0xff]  }
 0x152   :  { %4188 = vmatprep.subr.bf16.mxu0 %v10644_v20  ;;  %v10737_v20 = vld [vmem:[#allocation6 + $0x764] ss:$8 sps:$4 sm:$0xff]  }
 0x155   :  { %4189 = vmatpush1.bf16.msra.mxu0 %v10646_v21  ;;  %v10735_v21 = vld [vmem:[#allocation6 + $0x760] ss:$8 sps:$4 sm:$0xff]  }
 0x156   :  { %4190 = vmatprep.subr.bf16.mxu0 %v10647_v22  ;;  %v10740_v22 = vld [vmem:[#allocation6 + $0x774] ss:$8 sps:$4 sm:$0xff]  }
 0x159   :  { %4191 = vmatpush1.bf16.msra.mxu0 %v10649_v23  ;;  %v10738_v23 = vld [vmem:[#allocation6 + $0x770] ss:$8 sps:$4 sm:$0xff]  }
 0x15a   :  { %4192 = vmatprep.subr.bf16.mxu0 %v10650_v24  ;;  %v10743_v24 = vld [vmem:[#allocation6 + $0x784] ss:$8 sps:$4 sm:$0xff]  }
 0x15d   :  { %4193 = vmatpush1.bf16.msra.mxu0 %v10652_v25  ;;  %v10838_v25 = vld [vmem:[#allocation6 + $0x4] ss:$8 sps:$4 sm:$0xff]  }
 0x15e   :  { %4194 = vmatprep.subr.bf16.mxu0 %v10653_v26  ;;  %v10843_v26 = vld [vmem:[#allocation6] ss:$8 sps:$4 sm:$0xff]   ;;  %3965 = vmatprep.subr.bf16.mxu1 %v10838_v25  ;;  %v10935_v25 = vld [vmem:[#allocation6 + $0xf0] ss:$8 sps:$4 sm:$0xff]  }
 0x15f   :  { %3966 = vmatpush1.bf16.msra.mxu1 %v10843_v26  ;;  %v10788_v26 = vld [vmem:[#allocation6 + $0x870] ss:$8 sps:$4 sm:$0xff]  }
 0x161   :  { %4195 = vmatpush1.bf16.msra.mxu0 %v10655_v27  ;;  %v10741_v27 = vld [vmem:[#allocation6 + $0x780] ss:$8 sps:$4 sm:$0xff]  }
 0x162   :  { %4196 = vmatprep.subr.bf16.mxu0 %v10656_v28  ;;  %v10746_v28 = vld [vmem:[#allocation6 + $0x794] ss:$8 sps:$4 sm:$0xff]  }
 0x165   :  { %4197 = vmatpush1.bf16.msra.mxu0 %v10658_v29  ;;  %v10844_v29 = vld [vmem:[#allocation6 + $0x14] ss:$8 sps:$4 sm:$0xff]  }
 0x166   :  { %4198 = vmatprep.subr.bf16.mxu0 %v10659_v30  ;;  %v10849_v30 = vld [vmem:[#allocation6 + $0x10] ss:$8 sps:$4 sm:$0xff]   ;;  %3967 = vmatprep.subr.bf16.mxu1 %v10844_v29  ;;  %v10793_v29 = vld [vmem:[#allocation6 + $0x884] ss:$8 sps:$4 sm:$0xff]  }
 0x167   :  { %3968 = vmatpush1.bf16.msra.mxu1 %v10849_v30 }
 0x169   :  { %4199 = vmatpush1.bf16.msra.mxu0 %v10661_v31  ;;  %v10744_v31 = vld [vmem:[#allocation6 + $0x790] ss:$8 sps:$4 sm:$0xff]  }
 0x16a   :  { %4200 = vmatprep.subr.bf16.mxu0 %v10662_v32  ;;  %v10749_v32 = vld [vmem:[#allocation6 + $0x7a4] ss:$8 sps:$4 sm:$0xff]  }
 0x16d   :  { %4201 = vmatpush1.bf16.msra.mxu0 %v10664_v33  ;;  %v10850_v33 = vld [vmem:[#allocation6 + $0x24] ss:$8 sps:$4 sm:$0xff]  }
 0x16e   :  { %4211 = vmatprep.subr.bf16.mxu0 %v10669_v34  ;;  %v10855_v34 = vld [vmem:[#allocation6 + $0x20] ss:$8 sps:$4 sm:$0xff]   ;;  %3969 = vmatprep.subr.bf16.mxu1 %v10850_v33 }
 0x16f   :  { %3970 = vmatpush1.bf16.msra.mxu1 %v10855_v34  ;;  %v10791_v33 = vld [vmem:[#allocation6 + $0x880] ss:$8 sps:$4 sm:$0xff]   ;;  %v10796_v34 = vld [vmem:[#allocation6 + $0x894] ss:$8 sps:$4 sm:$0xff]  }
 0x170   :  { %4203 = vmatmul.mubr.bf16.vlgmr.msra.gmra.mrb[0].mxu0 %v8190_v36  ;;  %v10752_v36 = vld [vmem:[#allocation6 + $0x7b4] ss:$8 sps:$4 sm:$0xff]  }
 0x171   :  { %4212 = vmatpush1.bf16.msra.mxu0 %v10667_v37  ;;  %4243 = vmatprep.mubr.bf16.mxu0 %v8193_v38  ;;  %v10856_v37 = vld [vmem:[#allocation6 + $0x34] ss:$8 sps:$4 sm:$0xff]   ;;  %v10861_v38 = vld [vmem:[#allocation6 + $0x30] ss:$8 sps:$4 sm:$0xff]  }
 0x172   :  { %4213 = vmatprep.subr.bf16.mxu0 %v10672_v39  ;;  %3971 = vmatprep.subr.bf16.mxu1 %v10856_v37  ;;  %v10750_v39 = vld [vmem:[#allocation6 + $0x7b0] ss:$8 sps:$4 sm:$0xff]  }
 0x173   :  { %3972 = vmatpush1.bf16.msra.mxu1 %v10861_v38  ;;  %v10794_v37 = vld [vmem:[#allocation6 + $0x890] ss:$8 sps:$4 sm:$0xff]   ;;  %v10799_v38 = vld [vmem:[#allocation6 + $0x8a4] ss:$8 sps:$4 sm:$0xff]  }
 0x175   :  { %4214 = vmatpush1.bf16.msra.mxu0 %v10670_v40  ;;  %v10755_v40 = vld [vmem:[#allocation6 + $0x7c4] ss:$8 sps:$4 sm:$0xff]  }
 0x176   :  { %4215 = vmatprep.subr.bf16.mxu0 %v10675_v41  ;;  %v10862_v41 = vld [vmem:[#allocation6 + $0x44] ss:$8 sps:$4 sm:$0xff]  }
 0x177   :  { %3973 = vmatprep.subr.bf16.mxu1 %v10862_v41  ;;  %v10797_v41 = vld [vmem:[#allocation6 + $0x8a0] ss:$8 sps:$4 sm:$0xff]  }
 0x179   :  { %4216 = vmatpush1.bf16.msra.mxu0 %v10673_v42  ;;  %v10867_v42 = vld [vmem:[#allocation6 + $0x40] ss:$8 sps:$4 sm:$0xff]  }
 0x17a   :  { %4217 = vmatprep.subr.bf16.mxu0 %v10678_v43  ;;  %3974 = vmatpush1.bf16.msra.mxu1 %v10867_v42  ;;  %v10753_v43 = vld [vmem:[#allocation6 + $0x7c0] ss:$8 sps:$4 sm:$0xff]   ;;  %v10802_v42 = vld [vmem:[#allocation6 + $0x8b4] ss:$8 sps:$4 sm:$0xff]  }
 0x17d   :  { %4218 = vmatpush1.bf16.msra.mxu0 %v10676_v44  ;;  %v10758_v44 = vld [vmem:[#allocation6 + $0x7d4] ss:$8 sps:$4 sm:$0xff]  }
 0x17e   :  { %4219 = vmatprep.subr.bf16.mxu0 %v10681_v45  ;;  %v10868_v45 = vld [vmem:[#allocation6 + $0x54] ss:$8 sps:$4 sm:$0xff]  }
 0x17f   :  { %3975 = vmatprep.subr.bf16.mxu1 %v10868_v45  ;;  %v10800_v45 = vld [vmem:[#allocation6 + $0x8b0] ss:$8 sps:$4 sm:$0xff]  }
 0x181   :  { %4220 = vmatpush1.bf16.msra.mxu0 %v10679_v46  ;;  %v10873_v46 = vld [vmem:[#allocation6 + $0x50] ss:$8 sps:$4 sm:$0xff]  }
 0x182   :  { %4221 = vmatprep.subr.bf16.mxu0 %v10684_v47  ;;  %3976 = vmatpush1.bf16.msra.mxu1 %v10873_v46  ;;  %v10756_v47 = vld [vmem:[#allocation6 + $0x7d0] ss:$8 sps:$4 sm:$0xff]   ;;  %v10805_v46 = vld [vmem:[#allocation6 + $0x8c4] ss:$8 sps:$4 sm:$0xff]  }
 0x185   :  { %4222 = vmatpush1.bf16.msra.mxu0 %v10682_v48  ;;  %v10761_v48 = vld [vmem:[#allocation6 + $0x7e4] ss:$8 sps:$4 sm:$0xff]  }
 0x186   :  { %4223 = vmatprep.subr.bf16.mxu0 %v10687_v49  ;;  %v10874_v49 = vld [vmem:[#allocation6 + $0x64] ss:$8 sps:$4 sm:$0xff]  }
 0x187   :  { %3977 = vmatprep.subr.bf16.mxu1 %v10874_v49  ;;  %v10803_v49 = vld [vmem:[#allocation6 + $0x8c0] ss:$8 sps:$4 sm:$0xff]  }
 0x189   :  { %4224 = vmatpush1.bf16.msra.mxu0 %v10685_v50  ;;  %v10879_v50 = vld [vmem:[#allocation6 + $0x60] ss:$8 sps:$4 sm:$0xff]  }
 0x18a   :  { %4225 = vmatprep.subr.bf16.mxu0 %v10690_v51  ;;  %3978 = vmatpush1.bf16.msra.mxu1 %v10879_v50  ;;  %v10759_v51 = vld [vmem:[#allocation6 + $0x7e0] ss:$8 sps:$4 sm:$0xff]   ;;  %v10808_v50 = vld [vmem:[#allocation6 + $0x8d4] ss:$8 sps:$4 sm:$0xff]  }
 0x18d   :  { %4226 = vmatpush1.bf16.msra.mxu0 %v10688_v52  ;;  %v10764_v52 = vld [vmem:[#allocation6 + $0x7f4] ss:$8 sps:$4 sm:$0xff]  }
 0x18e   :  { %4227 = vmatprep.subr.bf16.mxu0 %v10693_v53  ;;  %v10880_v53 = vld [vmem:[#allocation6 + $0x74] ss:$8 sps:$4 sm:$0xff]  }
 0x18f   :  { %3979 = vmatprep.subr.bf16.mxu1 %v10880_v53  ;;  %v10806_v53 = vld [vmem:[#allocation6 + $0x8d0] ss:$8 sps:$4 sm:$0xff]  }
 0x191   :  { %4228 = vmatpush1.bf16.msra.mxu0 %v10691_v54  ;;  %v10885_v54 = vld [vmem:[#allocation6 + $0x70] ss:$8 sps:$4 sm:$0xff]  }
 0x192   :  { %4229 = vmatprep.subr.bf16.mxu0 %v10696_v55  ;;  %v10762_v55 = vld [vmem:[#allocation6 + $0x7f0] ss:$8 sps:$4 sm:$0xff]   ;;  %3980 = vmatpush1.bf16.msra.mxu1 %v10885_v54  ;;  %v10811_v54 = vld [vmem:[#allocation6 + $0x8e4] ss:$8 sps:$4 sm:$0xff]  }
 0x195   :  { %4230 = vmatpush1.bf16.msra.mxu0 %v10694_v56  ;;  %v10769_v56 = vld [vmem:[#allocation6 + $0x804] ss:$8 sps:$4 sm:$0xff]  }
 0x196   :  { %4231 = vmatprep.subr.bf16.mxu0 %v10699_v57  ;;  %v12372_v57 = vld [vmem:[#allocation3 + $0x40] sm:$0xff] }
 0x199   :  { %4232 = vmatpush1.bf16.msra.mxu0 %v10697_v58  ;;  %v10886_v58 = vld [vmem:[#allocation6 + $0x84] ss:$8 sps:$4 sm:$0xff]  }
 0x19a   :  { %4233 = vmatprep.subr.bf16.mxu0 %v10702_v59  ;;  %v10891_v59 = vld [vmem:[#allocation6 + $0x80] ss:$8 sps:$4 sm:$0xff]   ;;  %3981 = vmatprep.subr.bf16.mxu1 %v10886_v58 }
 0x19b   :  { %3982 = vmatpush1.bf16.msra.mxu1 %v10891_v59  ;;  %v10809_v58 = vld [vmem:[#allocation6 + $0x8e0] ss:$8 sps:$4 sm:$0xff]   ;;  %v10814_v59 = vld [vmem:[#allocation6 + $0x8f4] ss:$8 sps:$4 sm:$0xff]  }
 0x19d   :  { %4234 = vmatpush1.bf16.msra.mxu0 %v10700_v60  ;;  %v8194_v60 = vcombine.low %v12366_v6, %v12366_v6  ;;  %v10773_v6 = vld [vmem:[#allocation6 + $0x820] ss:$8 sps:$4 sm:$0xff]  }
 0x19e   :  { %4235 = vmatprep.subr.bf16.mxu0 %v10705_v61  ;;  %v10767_v61 = vld [vmem:[#allocation6 + $0x800] ss:$8 sps:$4 sm:$0xff]  }
 0x1a1   :  { %4236 = vmatpush1.bf16.msra.mxu0 %v10703_v62  ;;  %v8197_v62 = vcombine.high %v12372_v57, %v12372_v57 }
 0x1a2   :  { %4237 = vmatprep.subr.bf16.mxu0 %v10708_v63  ;;  %v10892_v63 = vld [vmem:[#allocation6 + $0x94] ss:$8 sps:$4 sm:$0xff]  }
 0x1a3   :  { %3983 = vmatprep.subr.bf16.mxu1 %v10892_v63  ;;  %v10819_v63 = vld [vmem:[#allocation6 + $0x904] ss:$8 sps:$4 sm:$0xff]  }
 0x1a5   :  { %4238 = vmatpush1.bf16.msra.mxu0 %v10706_v0  ;;  %v10772_v0 = vld [vmem:[#allocation6 + $0x814] ss:$8 sps:$4 sm:$0xff]  }
 0x1a6   :  { %4239 = vmatprep.subr.bf16.mxu0 %v10711_v1  ;;  %v10899_v1 = vld [vmem:[#allocation6 + $0x90] ss:$8 sps:$4 sm:$0xff]  }
 0x1a7   :  { %3984 = vmatpush1.bf16.msra.mxu1 %v10899_v1  ;;  %v10988_v1 = vld [vmem:[#allocation6 + $0x184] ss:$8 sps:$4 sm:$0xff]  }
 0x1a9   :  { %4240 = vmatpush1.bf16.msra.mxu0 %v10709_v2  ;;  %v10770_v2 = vld [vmem:[#allocation6 + $0x810] ss:$8 sps:$4 sm:$0xff]  }
 0x1aa   :  { %4241 = vmatprep.subr.bf16.mxu0 %v10714_v3  ;;  %v10775_v3 = vld [vmem:[#allocation6 + $0x824] ss:$8 sps:$4 sm:$0xff]  }
 0x1ad   :  { %4242 = vmatpush1.bf16.msra.mxu0 %v10712_v4  ;;  %v10900_v4 = vld [vmem:[#allocation6 + $0xa4] ss:$8 sps:$4 sm:$0xff]  }
 0x1ae   :  { %4252 = vmatprep.subr.bf16.mxu0 %v10719_v5  ;;  %v10905_v5 = vld [vmem:[#allocation6 + $0xa0] ss:$8 sps:$4 sm:$0xff]   ;;  %3985 = vmatprep.subr.bf16.mxu1 %v10900_v4 }
 0x1af   :  { %3986 = vmatpush1.bf16.msra.mxu1 %v10905_v5  ;;  %v10817_v4 = vld [vmem:[#allocation6 + $0x900] ss:$8 sps:$4 sm:$0xff]  }
 0x1b0   :  { %4244 = vmatmul.mubr.bf16.vlgmr.msra.gmra.mrb[0].mxu0 %v8192_v7  ;;  %v10778_v7 = vld [vmem:[#allocation6 + $0x834] ss:$8 sps:$4 sm:$0xff]  }
 0x1b1   :  { %4253 = vmatpush1.bf16.msra.mxu0 %v10717_v8  ;;  %4284 = vmatprep.mubr.bf16.mxu0 %v8195_v10  ;;  %v10906_v8 = vld [vmem:[#allocation6 + $0xb4] ss:$8 sps:$4 sm:$0xff]   ;;  %v10776_v10 = vld [vmem:[#allocation6 + $0x830] ss:$8 sps:$4 sm:$0xff]  }
 0x1b2   :  { %4254 = vmatprep.subr.bf16.mxu0 %v10722_v9  ;;  %v10911_v9 = vld [vmem:[#allocation6 + $0xb0] ss:$8 sps:$4 sm:$0xff]   ;;  %3987 = vmatprep.subr.bf16.mxu1 %v10906_v8 }
 0x1b3   :  { %3988 = vmatpush1.bf16.msra.mxu1 %v10911_v9  ;;  %v10992_v8 = vld [vmem:[#allocation6 + $0x190] ss:$8 sps:$4 sm:$0xff]  }
 0x1b4   :  { %v10820_v9 = vld [vmem:[#allocation6 + $0x910] ss:$8 sps:$4 sm:$0xff]  }
 0x1b5   :  { %4255 = vmatpush1.bf16.msra.mxu0 %v10720_v11  ;;  %v10781_v11 = vld [vmem:[#allocation6 + $0x844] ss:$8 sps:$4 sm:$0xff]  }
 0x1b6   :  { %4256 = vmatprep.subr.bf16.mxu0 %v10725_v12  ;;  %v10912_v12 = vld [vmem:[#allocation6 + $0xc4] ss:$8 sps:$4 sm:$0xff]  }
 0x1b7   :  { %3989 = vmatprep.subr.bf16.mxu1 %v10912_v12  ;;  %v10823_v12 = vld [vmem:[#allocation6 + $0x920] ss:$8 sps:$4 sm:$0xff]  }
 0x1b9   :  { %4257 = vmatpush1.bf16.msra.mxu0 %v10723_v13  ;;  %v10917_v13 = vld [vmem:[#allocation6 + $0xc0] ss:$8 sps:$4 sm:$0xff]  }
 0x1ba   :  { %4258 = vmatprep.subr.bf16.mxu0 %v10728_v14  ;;  %3990 = vmatpush1.bf16.msra.mxu1 %v10917_v13  ;;  %v10779_v14 = vld [vmem:[#allocation6 + $0x840] ss:$8 sps:$4 sm:$0xff]   ;;  %v10828_v13 = vld [vmem:[#allocation6 + $0x934] ss:$8 sps:$4 sm:$0xff]  }
 0x1bd   :  { %4259 = vmatpush1.bf16.msra.mxu0 %v10726_v15  ;;  %v10784_v15 = vld [vmem:[#allocation6 + $0x854] ss:$8 sps:$4 sm:$0xff]  }
 0x1be   :  { %4260 = vmatprep.subr.bf16.mxu0 %v10731_v16  ;;  %v10918_v16 = vld [vmem:[#allocation6 + $0xd4] ss:$8 sps:$4 sm:$0xff]  }
 0x1bf   :  { %3991 = vmatprep.subr.bf16.mxu1 %v10918_v16  ;;  %v10826_v16 = vld [vmem:[#allocation6 + $0x930] ss:$8 sps:$4 sm:$0xff]  }
 0x1c1   :  { %4261 = vmatpush1.bf16.msra.mxu0 %v10729_v17  ;;  %v10923_v17 = vld [vmem:[#allocation6 + $0xd0] ss:$8 sps:$4 sm:$0xff]  }
 0x1c2   :  { %4262 = vmatprep.subr.bf16.mxu0 %v10734_v18  ;;  %3992 = vmatpush1.bf16.msra.mxu1 %v10923_v17  ;;  %v10782_v18 = vld [vmem:[#allocation6 + $0x850] ss:$8 sps:$4 sm:$0xff]   ;;  %v10831_v17 = vld [vmem:[#allocation6 + $0x944] ss:$8 sps:$4 sm:$0xff]  }
 0x1c5   :  { %4263 = vmatpush1.bf16.msra.mxu0 %v10732_v19  ;;  %v10787_v19 = vld [vmem:[#allocation6 + $0x864] ss:$8 sps:$4 sm:$0xff]  }
 0x1c6   :  { %4264 = vmatprep.subr.bf16.mxu0 %v10737_v20  ;;  %v10924_v20 = vld [vmem:[#allocation6 + $0xe4] ss:$8 sps:$4 sm:$0xff]  }
 0x1c7   :  { %3993 = vmatprep.subr.bf16.mxu1 %v10924_v20  ;;  %v10829_v20 = vld [vmem:[#allocation6 + $0x940] ss:$8 sps:$4 sm:$0xff]  }
 0x1c9   :  { %4265 = vmatpush1.bf16.msra.mxu0 %v10735_v21  ;;  %v10929_v21 = vld [vmem:[#allocation6 + $0xe0] ss:$8 sps:$4 sm:$0xff]  }
 0x1ca   :  { %4266 = vmatprep.subr.bf16.mxu0 %v10740_v22  ;;  %3994 = vmatpush1.bf16.msra.mxu1 %v10929_v21  ;;  %v10785_v22 = vld [vmem:[#allocation6 + $0x860] ss:$8 sps:$4 sm:$0xff]   ;;  %v10834_v21 = vld [vmem:[#allocation6 + $0x954] ss:$8 sps:$4 sm:$0xff]  }
 0x1cd   :  { %4267 = vmatpush1.bf16.msra.mxu0 %v10738_v23  ;;  %v10790_v23 = vld [vmem:[#allocation6 + $0x874] ss:$8 sps:$4 sm:$0xff]  }
 0x1ce   :  { %4268 = vmatprep.subr.bf16.mxu0 %v10743_v24  ;;  %v10930_v24 = vld [vmem:[#allocation6 + $0xf4] ss:$8 sps:$4 sm:$0xff]  }
 0x1cf   :  { %3995 = vmatprep.subr.bf16.mxu1 %v10930_v24  ;;  %v10832_v24 = vld [vmem:[#allocation6 + $0x950] ss:$8 sps:$4 sm:$0xff]  }
 0x1d0   :  { %3996 = vmatpush1.bf16.msra.mxu1 %v10935_v25  ;;  %v10837_v25 = vld [vmem:[#allocation6 + $0x964] ss:$8 sps:$4 sm:$0xff]  }
 0x1d1   :  { %4269 = vmatpush1.bf16.msra.mxu0 %v10741_v27  ;;  %v252_v27 = vld [vmem:[#allocation3] sm:$0xff] }
 0x1d2   :  { %4270 = vmatprep.subr.bf16.mxu0 %v10746_v28  ;;  %v10940_v28 = vld [vmem:[#allocation6 + $0x104] ss:$8 sps:$4 sm:$0xff]   ;;  %v8180_v30 = vcombine.low %v252_v27, %v252_v27 }
 0x1d3   :  { %4006 = vmatprep.subr.bf16.mxu1 %v10940_v28  ;;  %v10835_v28 = vld [vmem:[#allocation6 + $0x960] ss:$8 sps:$4 sm:$0xff]  }
 0x1d5   :  { %4271 = vmatpush1.bf16.msra.mxu0 %v10744_v31  ;;  %v8181_v31 = vcombine.high %v252_v27, %v252_v27  ;;  %v11024_v27 = vld [vmem:[#allocation6 + $0x1e0] ss:$8 sps:$4 sm:$0xff]  }
 0x1d6   :  { %4272 = vmatprep.subr.bf16.mxu0 %v10749_v32  ;;  %v10938_v32 = vld [vmem:[#allocation6 + $0x100] ss:$8 sps:$4 sm:$0xff]  }
 0x1d7   :  { %3997 = vmatprep.mubr.bf16.mxu1 %v8181_v31  ;;  %v11030_v31 = vld [vmem:[#allocation6 + $0x1f0] ss:$8 sps:$4 sm:$0xff]  }
 0x1d8   :  { %3998 = vmatmul.mubr.bf16.vlgmr.msra.gmra.mrb[0].mxu1 %v8180_v30  ;;  %v11032_v30 = vld [vmem:[#allocation6 + $0x1f4] ss:$8 sps:$4 sm:$0xff]  }
 0x1d9   :  { %4273 = vmatpush1.bf16.msra.mxu0 %v10747_v35  ;;  %v10946_v35 = vld [vmem:[#allocation6 + $0x114] ss:$8 sps:$4 sm:$0xff]   ;;  %4007 = vmatpush1.bf16.msra.mxu1 %v10938_v32  ;;  %v10840_v32 = vld [vmem:[#allocation6 + $0x970] ss:$8 sps:$4 sm:$0xff]  }
 0x1da   :  { %4274 = vmatprep.subr.bf16.mxu0 %v10752_v36  ;;  %v10944_v36 = vld [vmem:[#allocation6 + $0x110] ss:$8 sps:$4 sm:$0xff]   ;;  %4008 = vmatprep.subr.bf16.mxu1 %v10946_v35  ;;  %v10848_v35 = vld [vmem:[#allocation6 + $0x984] ss:$8 sps:$4 sm:$0xff]  }
 0x1dd   :  { %4275 = vmatpush1.bf16.msra.mxu0 %v10750_v39  ;;  %v10952_v39 = vld [vmem:[#allocation6 + $0x124] ss:$8 sps:$4 sm:$0xff]   ;;  %4009 = vmatpush1.bf16.msra.mxu1 %v10944_v36 }
 0x1de   :  { %4276 = vmatprep.subr.bf16.mxu0 %v10755_v40  ;;  %v10950_v40 = vld [vmem:[#allocation6 + $0x120] ss:$8 sps:$4 sm:$0xff]   ;;  %4010 = vmatprep.subr.bf16.mxu1 %v10952_v39 }
 0x1df   :  { %v10846_v39 = vld [vmem:[#allocation6 + $0x980] ss:$8 sps:$4 sm:$0xff]  }
 0x1e1   :  { %4277 = vmatpush1.bf16.msra.mxu0 %v10753_v43  ;;  %v10958_v43 = vld [vmem:[#allocation6 + $0x134] ss:$8 sps:$4 sm:$0xff]   ;;  %4011 = vmatpush1.bf16.msra.mxu1 %v10950_v40 }
 0x1e2   :  { %4278 = vmatprep.subr.bf16.mxu0 %v10758_v44  ;;  %v10956_v44 = vld [vmem:[#allocation6 + $0x130] ss:$8 sps:$4 sm:$0xff]   ;;  %4012 = vmatprep.subr.bf16.mxu1 %v10958_v43  ;;  %v10854_v40 = vld [vmem:[#allocation6 + $0x994] ss:$8 sps:$4 sm:$0xff]  }
 0x1e3   :  { %v10852_v43 = vld [vmem:[#allocation6 + $0x990] ss:$8 sps:$4 sm:$0xff]  }
 0x1e5   :  { %4279 = vmatpush1.bf16.msra.mxu0 %v10756_v47  ;;  %v10964_v47 = vld [vmem:[#allocation6 + $0x144] ss:$8 sps:$4 sm:$0xff]   ;;  %4013 = vmatpush1.bf16.msra.mxu1 %v10956_v44 }
 0x1e6   :  { %4280 = vmatprep.subr.bf16.mxu0 %v10761_v48  ;;  %v10962_v48 = vld [vmem:[#allocation6 + $0x140] ss:$8 sps:$4 sm:$0xff]   ;;  %4014 = vmatprep.subr.bf16.mxu1 %v10964_v47  ;;  %v10860_v44 = vld [vmem:[#allocation6 + $0x9a4] ss:$8 sps:$4 sm:$0xff]  }
 0x1e7   :  { %v10858_v47 = vld [vmem:[#allocation6 + $0x9a0] ss:$8 sps:$4 sm:$0xff]  }
 0x1e9   :  { %4281 = vmatpush1.bf16.msra.mxu0 %v10759_v51  ;;  %v10970_v51 = vld [vmem:[#allocation6 + $0x154] ss:$8 sps:$4 sm:$0xff]   ;;  %4015 = vmatpush1.bf16.msra.mxu1 %v10962_v48 }
 0x1ea   :  { %4282 = vmatprep.subr.bf16.mxu0 %v10764_v52  ;;  %v10968_v52 = vld [vmem:[#allocation6 + $0x150] ss:$8 sps:$4 sm:$0xff]   ;;  %4016 = vmatprep.subr.bf16.mxu1 %v10970_v51  ;;  %v11058_v48 = vld [vmem:[#allocation6 + $0x234] ss:$8 sps:$4 sm:$0xff]  }
 0x1eb   :  { %v10864_v51 = vld [vmem:[#allocation6 + $0x9b0] ss:$8 sps:$4 sm:$0xff]  }
 0x1ed   :  { %4283 = vmatpush1.bf16.msra.mxu0 %v10762_v55  ;;  %v10976_v55 = vld [vmem:[#allocation6 + $0x164] ss:$8 sps:$4 sm:$0xff]   ;;  %4017 = vmatpush1.bf16.msra.mxu1 %v10968_v52 }
 0x1ee   :  { %4293 = vmatprep.subr.bf16.mxu0 %v10769_v56  ;;  %v10974_v56 = vld [vmem:[#allocation6 + $0x160] ss:$8 sps:$4 sm:$0xff]   ;;  %4018 = vmatprep.subr.bf16.mxu1 %v10976_v55  ;;  %v11064_v52 = vld [vmem:[#allocation6 + $0x244] ss:$8 sps:$4 sm:$0xff]  }
 0x1ef   :  { %v10870_v55 = vld [vmem:[#allocation6 + $0x9c0] ss:$8 sps:$4 sm:$0xff]  }
 0x1f0   :  { %4285 = vmatmul.mubr.bf16.vlgmr.msra.gmra.mrb[0].mxu0 %v8194_v60  ;;  %v10982_v60 = vld [vmem:[#allocation6 + $0x174] ss:$8 sps:$4 sm:$0xff]  }
 0x1f1   :  { %4294 = vmatpush1.bf16.msra.mxu0 %v10767_v61  ;;  %4325 = vmatprep.mubr.bf16.mxu0 %v8197_v62  ;;  %v10980_v61 = vld [vmem:[#allocation6 + $0x170] ss:$8 sps:$4 sm:$0xff]  }
 0x1f2   :  { %4295 = vmatprep.subr.bf16.mxu0 %v10772_v0  ;;  %4019 = vmatpush1.bf16.msra.mxu1 %v10974_v56  ;;  %v10812_v62 = vld [vmem:[#allocation6 + $0x8f0] ss:$8 sps:$4 sm:$0xff]   ;;  %v11070_v56 = vld [vmem:[#allocation6 + $0x254] ss:$8 sps:$4 sm:$0xff]  }
 0x1f3   :  { %4020 = vmatprep.subr.bf16.mxu1 %v10982_v60  ;;  %v12378_v0 = vld [vmem:[#allocation3 + $0x48] sm:$0xff] }
 0x1f4   :  { %v8199_v5 = vcombine.high %v12378_v0, %v12378_v0  ;;  %v10876_v60 = vld [vmem:[#allocation6 + $0x9d0] ss:$8 sps:$4 sm:$0xff]  }
 0x1f5   :  { %4296 = vmatpush1.bf16.msra.mxu0 %v10770_v2  ;;  %v10986_v2 = vld [vmem:[#allocation6 + $0x180] ss:$8 sps:$4 sm:$0xff]  }
 0x1f6   :  { %4297 = vmatprep.subr.bf16.mxu0 %v10775_v3  ;;  %4021 = vmatpush1.bf16.msra.mxu1 %v10980_v61  ;;  %v8196_v3 = vcombine.low %v12372_v57, %v12372_v57  ;;  %v11000_v57 = vld [vmem:[#allocation6 + $0x1a0] ss:$8 sps:$4 sm:$0xff]   ;;  %v11076_v61 = vld [vmem:[#allocation6 + $0x264] ss:$8 sps:$4 sm:$0xff]  }
 0x1f7   :  { %4022 = vmatprep.subr.bf16.mxu1 %v10988_v1  ;;  %v10882_v1 = vld [vmem:[#allocation6 + $0x9e0] ss:$8 sps:$4 sm:$0xff]  }
 0x1f9   :  { %4298 = vmatpush1.bf16.msra.mxu0 %v10773_v6  ;;  %v10994_v6 = vld [vmem:[#allocation6 + $0x194] ss:$8 sps:$4 sm:$0xff]  }
 0x1fa   :  { %4299 = vmatprep.subr.bf16.mxu0 %v10778_v7  ;;  %v10822_v7 = vld [vmem:[#allocation6 + $0x914] ss:$8 sps:$4 sm:$0xff]   ;;  %4023 = vmatpush1.bf16.msra.mxu1 %v10986_v2 }
 0x1fb   :  { %4024 = vmatprep.subr.bf16.mxu1 %v10994_v6  ;;  %v11082_v2 = vld [vmem:[#allocation6 + $0x274] ss:$8 sps:$4 sm:$0xff]   ;;  %v11088_v6 = vld [vmem:[#allocation6 + $0x284] ss:$8 sps:$4 sm:$0xff]  }
 0x1fd   :  { %4300 = vmatpush1.bf16.msra.mxu0 %v10776_v10  ;;  %v10825_v10 = vld [vmem:[#allocation6 + $0x924] ss:$8 sps:$4 sm:$0xff]  }
 0x1fe   :  { %4301 = vmatprep.subr.bf16.mxu0 %v10781_v11  ;;  %v11002_v11 = vld [vmem:[#allocation6 + $0x1a4] ss:$8 sps:$4 sm:$0xff]   ;;  %4025 = vmatpush1.bf16.msra.mxu1 %v10992_v8  ;;  %v12384_v8 = vld [vmem:[#allocation3 + $0x50] sm:$0xff] }
 0x1ff   :  { %4026 = vmatprep.subr.bf16.mxu1 %v11002_v11  ;;  %v10896_v11 = vld [vmem:[#allocation6 + $0xa00] ss:$8 sps:$4 sm:$0xff]  }
 0x201   :  { %4302 = vmatpush1.bf16.msra.mxu0 %v10779_v14  ;;  %v11008_v14 = vld [vmem:[#allocation6 + $0x1b4] ss:$8 sps:$4 sm:$0xff]  }
 0x202   :  { %4303 = vmatprep.subr.bf16.mxu0 %v10784_v15  ;;  %4027 = vmatpush1.bf16.msra.mxu1 %v11000_v57  ;;  %v11006_v15 = vld [vmem:[#allocation6 + $0x1b0] ss:$8 sps:$4 sm:$0xff]   ;;  %v8201_v57 = vcombine.high %v12384_v8, %v12384_v8 }
 0x203   :  { %4028 = vmatprep.subr.bf16.mxu1 %v11008_v14  ;;  %v11092_v14 = vld [vmem:[#allocation6 + $0x290] ss:$8 sps:$4 sm:$0xff]  }
 0x205   :  { %4304 = vmatpush1.bf16.msra.mxu0 %v10782_v18  ;;  %v11014_v18 = vld [vmem:[#allocation6 + $0x1c4] ss:$8 sps:$4 sm:$0xff]  }
 0x206   :  { %4305 = vmatprep.subr.bf16.mxu0 %v10787_v19  ;;  %4029 = vmatpush1.bf16.msra.mxu1 %v11006_v15  ;;  %v11012_v19 = vld [vmem:[#allocation6 + $0x1c0] ss:$8 sps:$4 sm:$0xff]   ;;  %v10902_v15 = vld [vmem:[#allocation6 + $0xa10] ss:$8 sps:$4 sm:$0xff]  }
 0x207   :  { %4030 = vmatprep.subr.bf16.mxu1 %v11014_v18  ;;  %v10908_v18 = vld [vmem:[#allocation6 + $0xa20] ss:$8 sps:$4 sm:$0xff]  }
 0x209   :  { %4306 = vmatpush1.bf16.msra.mxu0 %v10785_v22  ;;  %v11020_v22 = vld [vmem:[#allocation6 + $0x1d4] ss:$8 sps:$4 sm:$0xff]  }
 0x20a   :  { %4307 = vmatprep.subr.bf16.mxu0 %v10790_v23  ;;  %4031 = vmatpush1.bf16.msra.mxu1 %v11012_v19  ;;  %v11018_v23 = vld [vmem:[#allocation6 + $0x1d0] ss:$8 sps:$4 sm:$0xff]   ;;  %v11108_v19 = vld [vmem:[#allocation6 + $0x2b4] ss:$8 sps:$4 sm:$0xff]  }
 0x20b   :  { %4032 = vmatprep.subr.bf16.mxu1 %v11020_v22  ;;  %v10914_v22 = vld [vmem:[#allocation6 + $0xa30] ss:$8 sps:$4 sm:$0xff]  }
 0x20d   :  { %4308 = vmatpush1.bf16.msra.mxu0 %v10788_v26  ;;  %v11026_v26 = vld [vmem:[#allocation6 + $0x1e4] ss:$8 sps:$4 sm:$0xff]  }
 0x20e   :  { %4309 = vmatprep.subr.bf16.mxu0 %v10793_v29  ;;  %4033 = vmatpush1.bf16.msra.mxu1 %v11018_v23  ;;  %v10842_v29 = vld [vmem:[#allocation6 + $0x974] ss:$8 sps:$4 sm:$0xff]   ;;  %v11114_v23 = vld [vmem:[#allocation6 + $0x2c4] ss:$8 sps:$4 sm:$0xff]  }
 0x20f   :  { %4034 = vmatprep.subr.bf16.mxu1 %v11026_v26  ;;  %v10920_v26 = vld [vmem:[#allocation6 + $0xa40] ss:$8 sps:$4 sm:$0xff]  }
 0x211   :  { %4310 = vmatpush1.bf16.msra.mxu0 %v10791_v33  ;;  %v253_v33 = vld [vmem:[#allocation3 + $0x8] sm:$0xff] }
 0x212   :  { %4311 = vmatprep.subr.bf16.mxu0 %v10796_v34  ;;  %4035 = vmatpush1.bf16.msra.mxu1 %v11024_v27  ;;  %v11040_v34 = vld [vmem:[#allocation6 + $0x204] ss:$8 sps:$4 sm:$0xff]   ;;  %v8182_v36 = vcombine.low %v253_v33, %v253_v33  ;;  %v11120_v27 = vld [vmem:[#allocation6 + $0x2d4] ss:$8 sps:$4 sm:$0xff]  }
 0x213   :  { %4036 = vmatprep.subr.bf16.mxu1 %v11032_v30  ;;  %v10926_v30 = vld [vmem:[#allocation6 + $0xa50] ss:$8 sps:$4 sm:$0xff]  }
 0x215   :  { %4312 = vmatpush1.bf16.msra.mxu0 %v10794_v37  ;;  %v8183_v37 = vcombine.high %v253_v33, %v253_v33  ;;  %v11124_v33 = vld [vmem:[#allocation6 + $0x2e0] ss:$8 sps:$4 sm:$0xff]  }
 0x216   :  { %4313 = vmatprep.subr.bf16.mxu0 %v10799_v38  ;;  %4037 = vmatpush1.bf16.msra.mxu1 %v11030_v31  ;;  %v11038_v38 = vld [vmem:[#allocation6 + $0x200] ss:$8 sps:$4 sm:$0xff]   ;;  %v11126_v31 = vld [vmem:[#allocation6 + $0x2e4] ss:$8 sps:$4 sm:$0xff]  }
 0x217   :  { %4047 = vmatprep.subr.bf16.mxu1 %v11040_v34  ;;  %4038 = vmatprep.mubr.bf16.mxu1 %v8183_v37  ;;  %v10932_v34 = vld [vmem:[#allocation6 + $0xa60] ss:$8 sps:$4 sm:$0xff]   ;;  %v11130_v37 = vld [vmem:[#allocation6 + $0x2f0] ss:$8 sps:$4 sm:$0xff]  }
 0x219   :  { %4314 = vmatpush1.bf16.msra.mxu0 %v10797_v41  ;;  %4039 = vmatmul.mubr.bf16.vlgmr.msra.gmra.mrb[0].mxu1 %v8182_v36  ;;  %v11046_v41 = vld [vmem:[#allocation6 + $0x214] ss:$8 sps:$4 sm:$0xff]  }
 0x21a   :  { %4315 = vmatprep.subr.bf16.mxu0 %v10802_v42  ;;  %4048 = vmatpush1.bf16.msra.mxu1 %v11038_v38  ;;  %v11044_v42 = vld [vmem:[#allocation6 + $0x210] ss:$8 sps:$4 sm:$0xff]   ;;  %v10943_v36 = vld [vmem:[#allocation6 + $0xa74] ss:$8 sps:$4 sm:$0xff]  }
 0x21b   :  { %4049 = vmatprep.subr.bf16.mxu1 %v11046_v41  ;;  %v10941_v38 = vld [vmem:[#allocation6 + $0xa70] ss:$8 sps:$4 sm:$0xff]   ;;  %v10949_v41 = vld [vmem:[#allocation6 + $0xa84] ss:$8 sps:$4 sm:$0xff]  }
 0x21d   :  { %4316 = vmatpush1.bf16.msra.mxu0 %v10800_v45  ;;  %v11052_v45 = vld [vmem:[#allocation6 + $0x224] ss:$8 sps:$4 sm:$0xff]  }
 0x21e   :  { %4317 = vmatprep.subr.bf16.mxu0 %v10805_v46  ;;  %4050 = vmatpush1.bf16.msra.mxu1 %v11044_v42  ;;  %v11050_v46 = vld [vmem:[#allocation6 + $0x220] ss:$8 sps:$4 sm:$0xff]  }
 0x21f   :  { %4051 = vmatprep.subr.bf16.mxu1 %v11052_v45  ;;  %v10947_v45 = vld [vmem:[#allocation6 + $0xa80] ss:$8 sps:$4 sm:$0xff]  }
 0x221   :  { %4318 = vmatpush1.bf16.msra.mxu0 %v10803_v49  ;;  %v10866_v49 = vld [vmem:[#allocation6 + $0x9b4] ss:$8 sps:$4 sm:$0xff]  }
 0x222   :  { %4319 = vmatprep.subr.bf16.mxu0 %v10808_v50  ;;  %4052 = vmatpush1.bf16.msra.mxu1 %v11050_v46  ;;  %v11056_v50 = vld [vmem:[#allocation6 + $0x230] ss:$8 sps:$4 sm:$0xff]   ;;  %v11146_v46 = vld [vmem:[#allocation6 + $0x314] ss:$8 sps:$4 sm:$0xff]  }
 0x223   :  { %4053 = vmatprep.subr.bf16.mxu1 %v11058_v48  ;;  %v11144_v48 = vld [vmem:[#allocation6 + $0x310] ss:$8 sps:$4 sm:$0xff]  }
 0x225   :  { %4320 = vmatpush1.bf16.msra.mxu0 %v10806_v53  ;;  %v10872_v53 = vld [vmem:[#allocation6 + $0x9c4] ss:$8 sps:$4 sm:$0xff]  }
 0x226   :  { %4321 = vmatprep.subr.bf16.mxu0 %v10811_v54  ;;  %4054 = vmatpush1.bf16.msra.mxu1 %v11056_v50  ;;  %v11062_v54 = vld [vmem:[#allocation6 + $0x240] ss:$8 sps:$4 sm:$0xff]   ;;  %v11152_v50 = vld [vmem:[#allocation6 + $0x324] ss:$8 sps:$4 sm:$0xff]  }
 0x227   :  { %4055 = vmatprep.subr.bf16.mxu1 %v11064_v52  ;;  %v11150_v52 = vld [vmem:[#allocation6 + $0x320] ss:$8 sps:$4 sm:$0xff]  }
 0x229   :  { %4322 = vmatpush1.bf16.msra.mxu0 %v10809_v58  ;;  %v10878_v58 = vld [vmem:[#allocation6 + $0x9d4] ss:$8 sps:$4 sm:$0xff]  }
 0x22a   :  { %4323 = vmatprep.subr.bf16.mxu0 %v10814_v59  ;;  %4056 = vmatpush1.bf16.msra.mxu1 %v11062_v54  ;;  %v11068_v59 = vld [vmem:[#allocation6 + $0x250] ss:$8 sps:$4 sm:$0xff]   ;;  %v11158_v54 = vld [vmem:[#allocation6 + $0x334] ss:$8 sps:$4 sm:$0xff]  }
 0x22b   :  { %4057 = vmatprep.subr.bf16.mxu1 %v11070_v56  ;;  %v11156_v56 = vld [vmem:[#allocation6 + $0x330] ss:$8 sps:$4 sm:$0xff]  }
 0x22d   :  { %4324 = vmatpush1.bf16.msra.mxu0 %v10812_v62  ;;  %v10884_v62 = vld [vmem:[#allocation6 + $0x9e4] ss:$8 sps:$4 sm:$0xff]  }
 0x22e   :  { %4334 = vmatprep.subr.bf16.mxu0 %v10819_v63  ;;  %4058 = vmatpush1.bf16.msra.mxu1 %v11068_v59  ;;  %v11074_v63 = vld [vmem:[#allocation6 + $0x260] ss:$8 sps:$4 sm:$0xff]   ;;  %v11164_v59 = vld [vmem:[#allocation6 + $0x344] ss:$8 sps:$4 sm:$0xff]  }
 0x22f   :  { %4059 = vmatprep.subr.bf16.mxu1 %v11076_v61  ;;  %v11162_v61 = vld [vmem:[#allocation6 + $0x340] ss:$8 sps:$4 sm:$0xff]  }
 0x230   :  { %4326 = vmatmul.mubr.bf16.vlgmr.msra.gmra.mrb[0].mxu0 %v8196_v3  ;;  %v10890_v3 = vld [vmem:[#allocation6 + $0x9f4] ss:$8 sps:$4 sm:$0xff]  }
 0x231   :  { %4335 = vmatpush1.bf16.msra.mxu0 %v10817_v4  ;;  %4366 = vmatprep.mubr.bf16.mxu0 %v8199_v5  ;;  %v11080_v4 = vld [vmem:[#allocation6 + $0x270] ss:$8 sps:$4 sm:$0xff]  }
 0x232   :  { %4336 = vmatprep.subr.bf16.mxu0 %v10822_v7  ;;  %4060 = vmatpush1.bf16.msra.mxu1 %v11074_v63  ;;  %v10888_v5 = vld [vmem:[#allocation6 + $0x9f0] ss:$8 sps:$4 sm:$0xff]   ;;  %v10898_v7 = vld [vmem:[#allocation6 + $0xa04] ss:$8 sps:$4 sm:$0xff]   ;;  %v11170_v63 = vld [vmem:[#allocation6 + $0x354] ss:$8 sps:$4 sm:$0xff]  }
 0x233   :  { %4061 = vmatprep.subr.bf16.mxu1 %v11082_v2  ;;  %v11168_v2 = vld [vmem:[#allocation6 + $0x350] ss:$8 sps:$4 sm:$0xff]  }
 0x235   :  { %4337 = vmatpush1.bf16.msra.mxu0 %v10820_v9  ;;  %v11086_v9 = vld [vmem:[#allocation6 + $0x280] ss:$8 sps:$4 sm:$0xff]  }
 0x236   :  { %4338 = vmatprep.subr.bf16.mxu0 %v10825_v10  ;;  %4062 = vmatpush1.bf16.msra.mxu1 %v11080_v4  ;;  %v8198_v10 = vcombine.low %v12378_v0, %v12378_v0  ;;  %v11100_v0 = vld [vmem:[#allocation6 + $0x2a0] ss:$8 sps:$4 sm:$0xff]   ;;  %v11176_v4 = vld [vmem:[#allocation6 + $0x364] ss:$8 sps:$4 sm:$0xff]  }
 0x237   :  { %4063 = vmatprep.subr.bf16.mxu1 %v11088_v6  ;;  %v11174_v6 = vld [vmem:[#allocation6 + $0x360] ss:$8 sps:$4 sm:$0xff]  }
 0x239   :  { %4339 = vmatpush1.bf16.msra.mxu0 %v10823_v12  ;;  %v11094_v12 = vld [vmem:[#allocation6 + $0x294] ss:$8 sps:$4 sm:$0xff]  }
 0x23a   :  { %4340 = vmatprep.subr.bf16.mxu0 %v10828_v13  ;;  %v10904_v13 = vld [vmem:[#allocation6 + $0xa14] ss:$8 sps:$4 sm:$0xff]   ;;  %4064 = vmatpush1.bf16.msra.mxu1 %v11086_v9 }
 0x23b   :  { %4065 = vmatprep.subr.bf16.mxu1 %v11094_v12  ;;  %v11182_v9 = vld [vmem:[#allocation6 + $0x374] ss:$8 sps:$4 sm:$0xff]   ;;  %v11188_v12 = vld [vmem:[#allocation6 + $0x384] ss:$8 sps:$4 sm:$0xff]  }
 0x23d   :  { %4341 = vmatpush1.bf16.msra.mxu0 %v10826_v16  ;;  %v11102_v16 = vld [vmem:[#allocation6 + $0x2a4] ss:$8 sps:$4 sm:$0xff]  }
 0x23e   :  { %4342 = vmatprep.subr.bf16.mxu0 %v10831_v17  ;;  %v10910_v17 = vld [vmem:[#allocation6 + $0xa24] ss:$8 sps:$4 sm:$0xff]   ;;  %4066 = vmatpush1.bf16.msra.mxu1 %v11092_v14 }
 0x23f   :  { %4067 = vmatprep.subr.bf16.mxu1 %v11102_v16  ;;  %v12390_v14 = vld [vmem:[#allocation3 + $0x58] sm:$0xff]  ;;  %v8200_v16 = vcombine.low %v12384_v8, %v12384_v8 }
 0x240   :  { %v11200_v8 = vld [vmem:[#allocation6 + $0x3a0] ss:$8 sps:$4 sm:$0xff]  }
 0x241   :  { %4343 = vmatpush1.bf16.msra.mxu0 %v10829_v20  ;;  %v10916_v20 = vld [vmem:[#allocation6 + $0xa34] ss:$8 sps:$4 sm:$0xff]  }
 0x242   :  { %4344 = vmatprep.subr.bf16.mxu0 %v10834_v21  ;;  %4068 = vmatpush1.bf16.msra.mxu1 %v11100_v0  ;;  %v11106_v21 = vld [vmem:[#allocation6 + $0x2b0] ss:$8 sps:$4 sm:$0xff]   ;;  %v8203_v0 = vcombine.high %v12390_v14, %v12390_v14 }
 0x243   :  { %4069 = vmatprep.subr.bf16.mxu1 %v11108_v19  ;;  %v11005_v19 = vld [vmem:[#allocation6 + $0xb14] ss:$8 sps:$4 sm:$0xff]  }
 0x245   :  { %4345 = vmatpush1.bf16.msra.mxu0 %v10832_v24  ;;  %v10922_v24 = vld [vmem:[#allocation6 + $0xa44] ss:$8 sps:$4 sm:$0xff]  }
 0x246   :  { %4346 = vmatprep.subr.bf16.mxu0 %v10837_v25  ;;  %4070 = vmatpush1.bf16.msra.mxu1 %v11106_v21  ;;  %v11112_v25 = vld [vmem:[#allocation6 + $0x2c0] ss:$8 sps:$4 sm:$0xff]   ;;  %v11003_v21 = vld [vmem:[#allocation6 + $0xb10] ss:$8 sps:$4 sm:$0xff]  }
 0x247   :  { %4071 = vmatprep.subr.bf16.mxu1 %v11114_v23  ;;  %v11011_v23 = vld [vmem:[#allocation6 + $0xb24] ss:$8 sps:$4 sm:$0xff]  }
 0x249   :  { %4347 = vmatpush1.bf16.msra.mxu0 %v10835_v28  ;;  %v10928_v28 = vld [vmem:[#allocation6 + $0xa54] ss:$8 sps:$4 sm:$0xff]  }
 0x24a   :  { %4348 = vmatprep.subr.bf16.mxu0 %v10842_v29  ;;  %4072 = vmatpush1.bf16.msra.mxu1 %v11112_v25  ;;  %v11118_v29 = vld [vmem:[#allocation6 + $0x2d0] ss:$8 sps:$4 sm:$0xff]   ;;  %v11208_v25 = vld [vmem:[#allocation6 + $0x3b4] ss:$8 sps:$4 sm:$0xff]  }
 0x24b   :  { %4073 = vmatprep.subr.bf16.mxu1 %v11120_v27  ;;  %v11206_v27 = vld [vmem:[#allocation6 + $0x3b0] ss:$8 sps:$4 sm:$0xff]  }
 0x24d   :  { %4349 = vmatpush1.bf16.msra.mxu0 %v10840_v32  ;;  %v10934_v32 = vld [vmem:[#allocation6 + $0xa64] ss:$8 sps:$4 sm:$0xff]  }
 0x24e   :  { %4350 = vmatprep.subr.bf16.mxu0 %v10848_v35  ;;  %4074 = vmatpush1.bf16.msra.mxu1 %v11118_v29  ;;  %v11132_v35 = vld [vmem:[#allocation6 + $0x2f4] ss:$8 sps:$4 sm:$0xff]   ;;  %v11214_v29 = vld [vmem:[#allocation6 + $0x3c4] ss:$8 sps:$4 sm:$0xff]  }
 0x24f   :  { %4075 = vmatprep.subr.bf16.mxu1 %v11126_v31  ;;  %v11212_v31 = vld [vmem:[#allocation6 + $0x3c0] ss:$8 sps:$4 sm:$0xff]  }
 0x251   :  { %4351 = vmatpush1.bf16.msra.mxu0 %v10846_v39  ;;  %v254_v39 = vld [vmem:[#allocation3 + $0x10] sm:$0xff] }
 0x252   :  { %4352 = vmatprep.subr.bf16.mxu0 %v10854_v40  ;;  %4076 = vmatpush1.bf16.msra.mxu1 %v11124_v33  ;;  %v11140_v40 = vld [vmem:[#allocation6 + $0x304] ss:$8 sps:$4 sm:$0xff]   ;;  %v8184_v42 = vcombine.low %v254_v39, %v254_v39  ;;  %v11220_v33 = vld [vmem:[#allocation6 + $0x3d4] ss:$8 sps:$4 sm:$0xff]  }
 0x253   :  { %4077 = vmatprep.subr.bf16.mxu1 %v11132_v35  ;;  %v11218_v35 = vld [vmem:[#allocation6 + $0x3d0] ss:$8 sps:$4 sm:$0xff]  }
 0x255   :  { %4353 = vmatpush1.bf16.msra.mxu0 %v10852_v43  ;;  %v8185_v43 = vcombine.high %v254_v39, %v254_v39  ;;  %v11224_v39 = vld [vmem:[#allocation6 + $0x3e0] ss:$8 sps:$4 sm:$0xff]  }
 0x256   :  { %4354 = vmatprep.subr.bf16.mxu0 %v10860_v44  ;;  %4078 = vmatpush1.bf16.msra.mxu1 %v11130_v37  ;;  %v11138_v44 = vld [vmem:[#allocation6 + $0x300] ss:$8 sps:$4 sm:$0xff]   ;;  %v11226_v37 = vld [vmem:[#allocation6 + $0x3e4] ss:$8 sps:$4 sm:$0xff]  }
 0x257   :  { %4088 = vmatprep.subr.bf16.mxu1 %v11140_v40  ;;  %4079 = vmatprep.mubr.bf16.mxu1 %v8185_v43  ;;  %v11033_v40 = vld [vmem:[#allocation6 + $0xb60] ss:$8 sps:$4 sm:$0xff]   ;;  %v11230_v43 = vld [vmem:[#allocation6 + $0x3f0] ss:$8 sps:$4 sm:$0xff]  }
 0x259   :  { %4355 = vmatpush1.bf16.msra.mxu0 %v10858_v47  ;;  %4080 = vmatmul.mubr.bf16.vlgmr.msra.gmra.mrb[0].mxu1 %v8184_v42  ;;  %v10955_v47 = vld [vmem:[#allocation6 + $0xa94] ss:$8 sps:$4 sm:$0xff]  }
 0x25a   :  { %4356 = vmatprep.subr.bf16.mxu0 %v10866_v49  ;;  %4089 = vmatpush1.bf16.msra.mxu1 %v11138_v44  ;;  %v10953_v49 = vld [vmem:[#allocation6 + $0xa90] ss:$8 sps:$4 sm:$0xff]   ;;  %v11043_v42 = vld [vmem:[#allocation6 + $0xb74] ss:$8 sps:$4 sm:$0xff]  }
 0x25b   :  { %4090 = vmatprep.subr.bf16.mxu1 %v11146_v46  ;;  %v11041_v44 = vld [vmem:[#allocation6 + $0xb70] ss:$8 sps:$4 sm:$0xff]   ;;  %v11240_v46 = vld [vmem:[#allocation6 + $0x404] ss:$8 sps:$4 sm:$0xff]  }
 0x25d   :  { %4357 = vmatpush1.bf16.msra.mxu0 %v10864_v51  ;;  %v10961_v51 = vld [vmem:[#allocation6 + $0xaa4] ss:$8 sps:$4 sm:$0xff]  }
 0x25e   :  { %4358 = vmatprep.subr.bf16.mxu0 %v10872_v53  ;;  %4091 = vmatpush1.bf16.msra.mxu1 %v11144_v48  ;;  %v10959_v53 = vld [vmem:[#allocation6 + $0xaa0] ss:$8 sps:$4 sm:$0xff]  }
 0x25f   :  { %4092 = vmatprep.subr.bf16.mxu1 %v11152_v50  ;;  %v11238_v50 = vld [vmem:[#allocation6 + $0x400] ss:$8 sps:$4 sm:$0xff]  }
 0x261   :  { %4359 = vmatpush1.bf16.msra.mxu0 %v10870_v55  ;;  %v10967_v55 = vld [vmem:[#allocation6 + $0xab4] ss:$8 sps:$4 sm:$0xff]  }
 0x262   :  { %4360 = vmatprep.subr.bf16.mxu0 %v10878_v58  ;;  %4093 = vmatpush1.bf16.msra.mxu1 %v11150_v52  ;;  %v10965_v58 = vld [vmem:[#allocation6 + $0xab0] ss:$8 sps:$4 sm:$0xff]   ;;  %v11246_v52 = vld [vmem:[#allocation6 + $0x414] ss:$8 sps:$4 sm:$0xff]  }
 0x263   :  { %4094 = vmatprep.subr.bf16.mxu1 %v11158_v54  ;;  %v11244_v54 = vld [vmem:[#allocation6 + $0x410] ss:$8 sps:$4 sm:$0xff]  }
 0x265   :  { %4361 = vmatpush1.bf16.msra.mxu0 %v10876_v60  ;;  %v10973_v60 = vld [vmem:[#allocation6 + $0xac4] ss:$8 sps:$4 sm:$0xff]  }
 0x266   :  { %4362 = vmatprep.subr.bf16.mxu0 %v10884_v62  ;;  %4095 = vmatpush1.bf16.msra.mxu1 %v11156_v56  ;;  %v10971_v62 = vld [vmem:[#allocation6 + $0xac0] ss:$8 sps:$4 sm:$0xff]   ;;  %v11252_v56 = vld [vmem:[#allocation6 + $0x424] ss:$8 sps:$4 sm:$0xff]  }
 0x267   :  { %4096 = vmatprep.subr.bf16.mxu1 %v11164_v59  ;;  %v11250_v59 = vld [vmem:[#allocation6 + $0x420] ss:$8 sps:$4 sm:$0xff]  }
 0x269   :  { %4363 = vmatpush1.bf16.msra.mxu0 %v10882_v1  ;;  %v10979_v1 = vld [vmem:[#allocation6 + $0xad4] ss:$8 sps:$4 sm:$0xff]  }
 0x26a   :  { %4364 = vmatprep.subr.bf16.mxu0 %v10890_v3  ;;  %4097 = vmatpush1.bf16.msra.mxu1 %v11162_v61  ;;  %v10977_v3 = vld [vmem:[#allocation6 + $0xad0] ss:$8 sps:$4 sm:$0xff]   ;;  %v11258_v61 = vld [vmem:[#allocation6 + $0x434] ss:$8 sps:$4 sm:$0xff]  }
 0x26b   :  { %4098 = vmatprep.subr.bf16.mxu1 %v11170_v63  ;;  %v11256_v63 = vld [vmem:[#allocation6 + $0x430] ss:$8 sps:$4 sm:$0xff]  }
 0x26d   :  { %4365 = vmatpush1.bf16.msra.mxu0 %v10888_v5  ;;  %v10985_v5 = vld [vmem:[#allocation6 + $0xae4] ss:$8 sps:$4 sm:$0xff]  }
 0x26e   :  { %4375 = vmatprep.subr.bf16.mxu0 %v10898_v7  ;;  %4099 = vmatpush1.bf16.msra.mxu1 %v11168_v2  ;;  %v10983_v7 = vld [vmem:[#allocation6 + $0xae0] ss:$8 sps:$4 sm:$0xff]   ;;  %v11264_v2 = vld [vmem:[#allocation6 + $0x444] ss:$8 sps:$4 sm:$0xff]  }
 0x26f   :  { %4100 = vmatprep.subr.bf16.mxu1 %v11176_v4  ;;  %v11262_v4 = vld [vmem:[#allocation6 + $0x440] ss:$8 sps:$4 sm:$0xff]  }
 0x270   :  { %4367 = vmatmul.mubr.bf16.vlgmr.msra.gmra.mrb[0].mxu0 %v8198_v10  ;;  %v10991_v10 = vld [vmem:[#allocation6 + $0xaf4] ss:$8 sps:$4 sm:$0xff]  }
 0x271   :  { %4376 = vmatpush1.bf16.msra.mxu0 %v10896_v11  ;;  %4407 = vmatprep.mubr.bf16.mxu0 %v8201_v57  ;;  %v11180_v11 = vld [vmem:[#allocation6 + $0x370] ss:$8 sps:$4 sm:$0xff]  }
 0x272   :  { %4377 = vmatprep.subr.bf16.mxu0 %v10904_v13  ;;  %4101 = vmatpush1.bf16.msra.mxu1 %v11174_v6  ;;  %v10989_v57 = vld [vmem:[#allocation6 + $0xaf0] ss:$8 sps:$4 sm:$0xff]   ;;  %v10999_v13 = vld [vmem:[#allocation6 + $0xb04] ss:$8 sps:$4 sm:$0xff]   ;;  %v11270_v6 = vld [vmem:[#allocation6 + $0x454] ss:$8 sps:$4 sm:$0xff]  }
 0x273   :  { %4102 = vmatprep.subr.bf16.mxu1 %v11182_v9  ;;  %v11268_v9 = vld [vmem:[#allocation6 + $0x450] ss:$8 sps:$4 sm:$0xff]  }
 0x275   :  { %4378 = vmatpush1.bf16.msra.mxu0 %v10902_v15  ;;  %v11186_v15 = vld [vmem:[#allocation6 + $0x380] ss:$8 sps:$4 sm:$0xff]  }
 0x276   :  { %4379 = vmatprep.subr.bf16.mxu0 %v10910_v17  ;;  %4103 = vmatpush1.bf16.msra.mxu1 %v11180_v11  ;;  %v10997_v17 = vld [vmem:[#allocation6 + $0xb00] ss:$8 sps:$4 sm:$0xff]   ;;  %v11276_v11 = vld [vmem:[#allocation6 + $0x464] ss:$8 sps:$4 sm:$0xff]  }
 0x277   :  { %4104 = vmatprep.subr.bf16.mxu1 %v11188_v12  ;;  %v11274_v12 = vld [vmem:[#allocation6 + $0x460] ss:$8 sps:$4 sm:$0xff]  }
 0x279   :  { %4380 = vmatpush1.bf16.msra.mxu0 %v10908_v18  ;;  %v11194_v18 = vld [vmem:[#allocation6 + $0x394] ss:$8 sps:$4 sm:$0xff]  }
 0x27a   :  { %4381 = vmatprep.subr.bf16.mxu0 %v10916_v20  ;;  %4105 = vmatpush1.bf16.msra.mxu1 %v11186_v15  ;;  %v11192_v20 = vld [vmem:[#allocation6 + $0x390] ss:$8 sps:$4 sm:$0xff]   ;;  %v11282_v15 = vld [vmem:[#allocation6 + $0x474] ss:$8 sps:$4 sm:$0xff]  }
 0x27b   :  { %4106 = vmatprep.subr.bf16.mxu1 %v11194_v18  ;;  %v11288_v18 = vld [vmem:[#allocation6 + $0x484] ss:$8 sps:$4 sm:$0xff]  }
 0x27d   :  { %4382 = vmatpush1.bf16.msra.mxu0 %v10914_v22  ;;  %v11202_v22 = vld [vmem:[#allocation6 + $0x3a4] ss:$8 sps:$4 sm:$0xff]  }
 0x27e   :  { %4383 = vmatprep.subr.bf16.mxu0 %v10922_v24  ;;  %4107 = vmatpush1.bf16.msra.mxu1 %v11192_v20  ;;  %v11009_v24 = vld [vmem:[#allocation6 + $0xb20] ss:$8 sps:$4 sm:$0xff]   ;;  %v12396_v20 = vld [vmem:[#allocation3 + $0x60] sm:$0xff] }
 0x27f   :  { %4108 = vmatprep.subr.bf16.mxu1 %v11202_v22  ;;  %v8202_v22 = vcombine.low %v12390_v14, %v12390_v14  ;;  %v11300_v14 = vld [vmem:[#allocation6 + $0x4a0] ss:$8 sps:$4 sm:$0xff]  }
 0x281   :  { %4384 = vmatpush1.bf16.msra.mxu0 %v10920_v26  ;;  %v11017_v26 = vld [vmem:[#allocation6 + $0xb34] ss:$8 sps:$4 sm:$0xff]  }
 0x282   :  { %4385 = vmatprep.subr.bf16.mxu0 %v10928_v28  ;;  %4109 = vmatpush1.bf16.msra.mxu1 %v11200_v8  ;;  %v11015_v28 = vld [vmem:[#allocation6 + $0xb30] ss:$8 sps:$4 sm:$0xff]   ;;  %v8205_v8 = vcombine.high %v12396_v20, %v12396_v20 }
 0x283   :  { %4110 = vmatprep.subr.bf16.mxu1 %v11208_v25  ;;  %v11105_v25 = vld [vmem:[#allocation6 + $0xc14] ss:$8 sps:$4 sm:$0xff]  }
 0x285   :  { %4386 = vmatpush1.bf16.msra.mxu0 %v10926_v30  ;;  %v11023_v30 = vld [vmem:[#allocation6 + $0xb44] ss:$8 sps:$4 sm:$0xff]  }
 0x286   :  { %4387 = vmatprep.subr.bf16.mxu0 %v10934_v32  ;;  %4111 = vmatpush1.bf16.msra.mxu1 %v11206_v27  ;;  %v11021_v32 = vld [vmem:[#allocation6 + $0xb40] ss:$8 sps:$4 sm:$0xff]   ;;  %v11103_v27 = vld [vmem:[#allocation6 + $0xc10] ss:$8 sps:$4 sm:$0xff]  }
 0x287   :  { %4112 = vmatprep.subr.bf16.mxu1 %v11214_v29  ;;  %v11111_v29 = vld [vmem:[#allocation6 + $0xc24] ss:$8 sps:$4 sm:$0xff]  }
 0x289   :  { %4388 = vmatpush1.bf16.msra.mxu0 %v10932_v34  ;;  %v11029_v34 = vld [vmem:[#allocation6 + $0xb54] ss:$8 sps:$4 sm:$0xff]  }
 0x28a   :  { %4389 = vmatprep.subr.bf16.mxu0 %v10943_v36  ;;  %4113 = vmatpush1.bf16.msra.mxu1 %v11212_v31  ;;  %v11027_v36 = vld [vmem:[#allocation6 + $0xb50] ss:$8 sps:$4 sm:$0xff]   ;;  %v11308_v31 = vld [vmem:[#allocation6 + $0x4b4] ss:$8 sps:$4 sm:$0xff]  }
 0x28b   :  { %4114 = vmatprep.subr.bf16.mxu1 %v11220_v33  ;;  %v11306_v33 = vld [vmem:[#allocation6 + $0x4b0] ss:$8 sps:$4 sm:$0xff]  }
 0x28d   :  { %4390 = vmatpush1.bf16.msra.mxu0 %v10941_v38  ;;  %v11035_v38 = vld [vmem:[#allocation6 + $0xb64] ss:$8 sps:$4 sm:$0xff]  }
 0x28e   :  { %4391 = vmatprep.subr.bf16.mxu0 %v10949_v41  ;;  %4115 = vmatpush1.bf16.msra.mxu1 %v11218_v35  ;;  %v11232_v41 = vld [vmem:[#allocation6 + $0x3f4] ss:$8 sps:$4 sm:$0xff]   ;;  %v11314_v35 = vld [vmem:[#allocation6 + $0x4c4] ss:$8 sps:$4 sm:$0xff]  }
 0x28f   :  { %4116 = vmatprep.subr.bf16.mxu1 %v11226_v37  ;;  %v11312_v37 = vld [vmem:[#allocation6 + $0x4c0] ss:$8 sps:$4 sm:$0xff]  }
 0x291   :  { %4392 = vmatpush1.bf16.msra.mxu0 %v10947_v45  ;;  %v255_v45 = vld [vmem:[#allocation3 + $0x18] sm:$0xff] }
 0x292   :  { %4393 = vmatprep.subr.bf16.mxu0 %v10955_v47  ;;  %4117 = vmatpush1.bf16.msra.mxu1 %v11224_v39  ;;  %v11049_v47 = vld [vmem:[#allocation6 + $0xb84] ss:$8 sps:$4 sm:$0xff]   ;;  %v8186_v48 = vcombine.low %v255_v45, %v255_v45  ;;  %v11320_v39 = vld [vmem:[#allocation6 + $0x4d4] ss:$8 sps:$4 sm:$0xff]  }
 0x293   :  { %4118 = vmatprep.subr.bf16.mxu1 %v11232_v41  ;;  %v11318_v41 = vld [vmem:[#allocation6 + $0x4d0] ss:$8 sps:$4 sm:$0xff]  }
 0x295   :  { %4394 = vmatpush1.bf16.msra.mxu0 %v10953_v49  ;;  %v8187_v49 = vcombine.high %v255_v45, %v255_v45  ;;  %v11324_v45 = vld [vmem:[#allocation6 + $0x4e0] ss:$8 sps:$4 sm:$0xff]  }
 0x296   :  { %4395 = vmatprep.subr.bf16.mxu0 %v10961_v51  ;;  %4119 = vmatpush1.bf16.msra.mxu1 %v11230_v43  ;;  %v11047_v51 = vld [vmem:[#allocation6 + $0xb80] ss:$8 sps:$4 sm:$0xff]   ;;  %v11326_v43 = vld [vmem:[#allocation6 + $0x4e4] ss:$8 sps:$4 sm:$0xff]  }
 0x297   :  { %4129 = vmatprep.subr.bf16.mxu1 %v11240_v46  ;;  %4120 = vmatprep.mubr.bf16.mxu1 %v8187_v49  ;;  %v11133_v46 = vld [vmem:[#allocation6 + $0xc60] ss:$8 sps:$4 sm:$0xff]   ;;  %v11330_v49 = vld [vmem:[#allocation6 + $0x4f0] ss:$8 sps:$4 sm:$0xff]  }
 0x299   :  { %4396 = vmatpush1.bf16.msra.mxu0 %v10959_v53  ;;  %4121 = vmatmul.mubr.bf16.vlgmr.msra.gmra.mrb[0].mxu1 %v8186_v48  ;;  %v11055_v53 = vld [vmem:[#allocation6 + $0xb94] ss:$8 sps:$4 sm:$0xff]  }
 0x29a   :  { %4397 = vmatprep.subr.bf16.mxu0 %v10967_v55  ;;  %4130 = vmatpush1.bf16.msra.mxu1 %v11238_v50  ;;  %v11053_v55 = vld [vmem:[#allocation6 + $0xb90] ss:$8 sps:$4 sm:$0xff]   ;;  %v11143_v48 = vld [vmem:[#allocation6 + $0xc74] ss:$8 sps:$4 sm:$0xff]  }
 0x29b   :  { %4131 = vmatprep.subr.bf16.mxu1 %v11246_v52  ;;  %v256_v50 = vld [vmem:[#allocation3 + $0x20] sm:$0xff] }
 0x29c   :  { %v8188_v52 = vcombine.low %v256_v50, %v256_v50 }
 0x29d   :  { %4398 = vmatpush1.bf16.msra.mxu0 %v10965_v58  ;;  %v11061_v58 = vld [vmem:[#allocation6 + $0xba4] ss:$8 sps:$4 sm:$0xff]  }
 0x29e   :  { %4399 = vmatprep.subr.bf16.mxu0 %v10973_v60  ;;  %4132 = vmatpush1.bf16.msra.mxu1 %v11244_v54  ;;  %v11059_v60 = vld [vmem:[#allocation6 + $0xba0] ss:$8 sps:$4 sm:$0xff]   ;;  %v11149_v54 = vld [vmem:[#allocation6 + $0xc84] ss:$8 sps:$4 sm:$0xff]  }
 0x29f   :  { %4133 = vmatprep.subr.bf16.mxu1 %v11252_v56  ;;  %v11155_v56 = vld [vmem:[#allocation6 + $0xc94] ss:$8 sps:$4 sm:$0xff]  }
 0x2a1   :  { %4400 = vmatpush1.bf16.msra.mxu0 %v10971_v62  ;;  %v11067_v62 = vld [vmem:[#allocation6 + $0xbb4] ss:$8 sps:$4 sm:$0xff]  }
 0x2a2   :  { %4401 = vmatprep.subr.bf16.mxu0 %v10979_v1  ;;  %4134 = vmatpush1.bf16.msra.mxu1 %v11250_v59  ;;  %v11065_v1 = vld [vmem:[#allocation6 + $0xbb0] ss:$8 sps:$4 sm:$0xff]   ;;  %v11161_v59 = vld [vmem:[#allocation6 + $0xca4] ss:$8 sps:$4 sm:$0xff]  }
 0x2a3   :  { %4135 = vmatprep.subr.bf16.mxu1 %v11258_v61  ;;  %v11167_v61 = vld [vmem:[#allocation6 + $0xcb4] ss:$8 sps:$4 sm:$0xff]  }
 0x2a5   :  { %4402 = vmatpush1.bf16.msra.mxu0 %v10977_v3  ;;  %v11073_v3 = vld [vmem:[#allocation6 + $0xbc4] ss:$8 sps:$4 sm:$0xff]  }
 0x2a6   :  { %4403 = vmatprep.subr.bf16.mxu0 %v10985_v5  ;;  %4136 = vmatpush1.bf16.msra.mxu1 %v11256_v63  ;;  %v11071_v5 = vld [vmem:[#allocation6 + $0xbc0] ss:$8 sps:$4 sm:$0xff]   ;;  %v11173_v63 = vld [vmem:[#allocation6 + $0xcc4] ss:$8 sps:$4 sm:$0xff]  }
 0x2a7   :  { %4137 = vmatprep.subr.bf16.mxu1 %v11264_v2  ;;  %v11179_v2 = vld [vmem:[#allocation6 + $0xcd4] ss:$8 sps:$4 sm:$0xff]  }
 0x2a9   :  { %4404 = vmatpush1.bf16.msra.mxu0 %v10983_v7  ;;  %v11079_v7 = vld [vmem:[#allocation6 + $0xbd4] ss:$8 sps:$4 sm:$0xff]  }
 0x2aa   :  { %4405 = vmatprep.subr.bf16.mxu0 %v10991_v10  ;;  %4138 = vmatpush1.bf16.msra.mxu1 %v11262_v4  ;;  %v11077_v10 = vld [vmem:[#allocation6 + $0xbd0] ss:$8 sps:$4 sm:$0xff]   ;;  %v11185_v4 = vld [vmem:[#allocation6 + $0xce4] ss:$8 sps:$4 sm:$0xff]  }
 0x2ab   :  { %4139 = vmatprep.subr.bf16.mxu1 %v11270_v6  ;;  %v11191_v6 = vld [vmem:[#allocation6 + $0xcf4] ss:$8 sps:$4 sm:$0xff]  }
 0x2ad   :  { %4406 = vmatpush1.bf16.msra.mxu0 %v10989_v57  ;;  %v11085_v57 = vld [vmem:[#allocation6 + $0xbe4] ss:$8 sps:$4 sm:$0xff]  }
 0x2ae   :  { %4416 = vmatprep.subr.bf16.mxu0 %v10999_v13  ;;  %4140 = vmatpush1.bf16.msra.mxu1 %v11268_v9  ;;  %v11083_v13 = vld [vmem:[#allocation6 + $0xbe0] ss:$8 sps:$4 sm:$0xff]   ;;  %v11199_v9 = vld [vmem:[#allocation6 + $0xd04] ss:$8 sps:$4 sm:$0xff]  }
 0x2af   :  { %4141 = vmatprep.subr.bf16.mxu1 %v11276_v11  ;;  %v8204_v11 = vcombine.low %v12396_v20, %v12396_v20  ;;  %v11221_v20 = vld [vmem:[#allocation6 + $0xd40] ss:$8 sps:$4 sm:$0xff]  }
 0x2b0   :  { %4408 = vmatmul.mubr.bf16.vlgmr.msra.gmra.mrb[0].mxu0 %v8200_v16  ;;  %v11091_v16 = vld [vmem:[#allocation6 + $0xbf4] ss:$8 sps:$4 sm:$0xff]  }
 0x2b1   :  { %4417 = vmatpush1.bf16.msra.mxu0 %v10997_v17  ;;  %4448 = vmatprep.mubr.bf16.mxu0 %v8203_v0  ;;  %v11280_v17 = vld [vmem:[#allocation6 + $0x470] ss:$8 sps:$4 sm:$0xff]  }
 0x2b2   :  { %4418 = vmatprep.subr.bf16.mxu0 %v11005_v19  ;;  %4142 = vmatpush1.bf16.msra.mxu1 %v11274_v12  ;;  %v11089_v0 = vld [vmem:[#allocation6 + $0xbf0] ss:$8 sps:$4 sm:$0xff]   ;;  %v11099_v19 = vld [vmem:[#allocation6 + $0xc04] ss:$8 sps:$4 sm:$0xff]  }
 0x2b3   :  { %4143 = vmatprep.subr.bf16.mxu1 %v11282_v15  ;;  %v11203_v15 = vld [vmem:[#allocation6 + $0xd10] ss:$8 sps:$4 sm:$0xff]  }
 0x2b5   :  { %4419 = vmatpush1.bf16.msra.mxu0 %v11003_v21  ;;  %v11286_v21 = vld [vmem:[#allocation6 + $0x480] ss:$8 sps:$4 sm:$0xff]  }
 0x2b6   :  { %4420 = vmatprep.subr.bf16.mxu0 %v11011_v23  ;;  %4144 = vmatpush1.bf16.msra.mxu1 %v11280_v17  ;;  %v11097_v23 = vld [vmem:[#allocation6 + $0xc00] ss:$8 sps:$4 sm:$0xff]  }
 0x2b7   :  { %4145 = vmatprep.subr.bf16.mxu1 %v11288_v18  ;;  %v11209_v17 = vld [vmem:[#allocation6 + $0xd20] ss:$8 sps:$4 sm:$0xff]   ;;  %v11215_v18 = vld [vmem:[#allocation6 + $0xd30] ss:$8 sps:$4 sm:$0xff]  }
 0x2b9   :  { %4421 = vmatpush1.bf16.msra.mxu0 %v11009_v24  ;;  %v11294_v24 = vld [vmem:[#allocation6 + $0x494] ss:$8 sps:$4 sm:$0xff]  }
 0x2ba   :  { %4422 = vmatprep.subr.bf16.mxu0 %v11017_v26  ;;  %4146 = vmatpush1.bf16.msra.mxu1 %v11286_v21  ;;  %v11292_v26 = vld [vmem:[#allocation6 + $0x490] ss:$8 sps:$4 sm:$0xff]   ;;  %v11229_v21 = vld [vmem:[#allocation6 + $0xd54] ss:$8 sps:$4 sm:$0xff]  }
 0x2bb   :  { %4147 = vmatprep.subr.bf16.mxu1 %v11294_v24  ;;  %v11243_v24 = vld [vmem:[#allocation6 + $0xd74] ss:$8 sps:$4 sm:$0xff]  }
 0x2bd   :  { %4423 = vmatpush1.bf16.msra.mxu0 %v11015_v28  ;;  %v11302_v28 = vld [vmem:[#allocation6 + $0x4a4] ss:$8 sps:$4 sm:$0xff]  }
 0x2be   :  { %4424 = vmatprep.subr.bf16.mxu0 %v11023_v30  ;;  %4148 = vmatpush1.bf16.msra.mxu1 %v11292_v26  ;;  %v11109_v30 = vld [vmem:[#allocation6 + $0xc20] ss:$8 sps:$4 sm:$0xff]   ;;  %v11249_v26 = vld [vmem:[#allocation6 + $0xd84] ss:$8 sps:$4 sm:$0xff]  }
 0x2bf   :  { %4149 = vmatprep.subr.bf16.mxu1 %v11302_v28  ;;  %v11255_v28 = vld [vmem:[#allocation6 + $0xd94] ss:$8 sps:$4 sm:$0xff]  }
 0x2c1   :  { %4425 = vmatpush1.bf16.msra.mxu0 %v11021_v32  ;;  %v11117_v32 = vld [vmem:[#allocation6 + $0xc34] ss:$8 sps:$4 sm:$0xff]  }
 0x2c2   :  { %4426 = vmatprep.subr.bf16.mxu0 %v11029_v34  ;;  %4150 = vmatpush1.bf16.msra.mxu1 %v11300_v14  ;;  %v11115_v34 = vld [vmem:[#allocation6 + $0xc30] ss:$8 sps:$4 sm:$0xff]   ;;  %v11261_v14 = vld [vmem:[#allocation6 + $0xda4] ss:$8 sps:$4 sm:$0xff]  }
 0x2c3   :  { %4151 = vmatprep.subr.bf16.mxu1 %v11308_v31  ;;  %v11267_v31 = vld [vmem:[#allocation6 + $0xdb4] ss:$8 sps:$4 sm:$0xff]  }
 0x2c5   :  { %4427 = vmatpush1.bf16.msra.mxu0 %v11027_v36  ;;  %v11123_v36 = vld [vmem:[#allocation6 + $0xc44] ss:$8 sps:$4 sm:$0xff]  }
 0x2c6   :  { %4428 = vmatprep.subr.bf16.mxu0 %v11035_v38  ;;  %4152 = vmatpush1.bf16.msra.mxu1 %v11306_v33  ;;  %v11121_v38 = vld [vmem:[#allocation6 + $0xc40] ss:$8 sps:$4 sm:$0xff]   ;;  %v11273_v33 = vld [vmem:[#allocation6 + $0xdc4] ss:$8 sps:$4 sm:$0xff]  }
 0x2c7   :  { %4153 = vmatprep.subr.bf16.mxu1 %v11314_v35  ;;  %v11279_v35 = vld [vmem:[#allocation6 + $0xdd4] ss:$8 sps:$4 sm:$0xff]  }
 0x2c9   :  { %4429 = vmatpush1.bf16.msra.mxu0 %v11033_v40  ;;  %v11129_v40 = vld [vmem:[#allocation6 + $0xc54] ss:$8 sps:$4 sm:$0xff]  }
 0x2ca   :  { %4430 = vmatprep.subr.bf16.mxu0 %v11043_v42  ;;  %4154 = vmatpush1.bf16.msra.mxu1 %v11312_v37  ;;  %v11127_v42 = vld [vmem:[#allocation6 + $0xc50] ss:$8 sps:$4 sm:$0xff]   ;;  %v11285_v37 = vld [vmem:[#allocation6 + $0xde4] ss:$8 sps:$4 sm:$0xff]  }
 0x2cb   :  { %4155 = vmatprep.subr.bf16.mxu1 %v11320_v39  ;;  %v11291_v39 = vld [vmem:[#allocation6 + $0xdf4] ss:$8 sps:$4 sm:$0xff]  }
 0x2cd   :  { %4431 = vmatpush1.bf16.msra.mxu0 %v11041_v44  ;;  %v11135_v44 = vld [vmem:[#allocation6 + $0xc64] ss:$8 sps:$4 sm:$0xff]  }
 0x2ce   :  { %4432 = vmatprep.subr.bf16.mxu0 %v11049_v47  ;;  %4156 = vmatpush1.bf16.msra.mxu1 %v11318_v41  ;;  %v11332_v47 = vld [vmem:[#allocation6 + $0x4f4] ss:$8 sps:$4 sm:$0xff]   ;;  %v11299_v41 = vld [vmem:[#allocation6 + $0xe04] ss:$8 sps:$4 sm:$0xff]  }
 0x2cf   :  { %4157 = vmatprep.subr.bf16.mxu1 %v11326_v43 }
 0x2d1   :  { %4433 = vmatpush1.bf16.msra.mxu0 %v11047_v51  ;;  %v11141_v51 = vld [vmem:[#allocation6 + $0xc70] ss:$8 sps:$4 sm:$0xff]  }
 0x2d2   :  { %4434 = vmatprep.subr.bf16.mxu0 %v11055_v53  ;;  %4158 = vmatpush1.bf16.msra.mxu1 %v11324_v45  ;;  %v8189_v53 = vcombine.high %v256_v50, %v256_v50  ;;  %v11317_v50 = vld [vmem:[#allocation6 + $0xe34] ss:$8 sps:$4 sm:$0xff]  }
 0x2d3   :  { %4159 = vmatprep.subr.bf16.mxu1 %v11332_v47  ;;  %v11303_v47 = vld [vmem:[#allocation6 + $0xe10] ss:$8 sps:$4 sm:$0xff]  }
 0x2d4   :  { %4161 = vmatprep.mubr.bf16.mxu1 %v8189_v53  ;;  %v11321_v53 = vld [vmem:[#allocation6 + $0xe40] ss:$8 sps:$4 sm:$0xff]  }
 0x2d5   :  { %4435 = vmatpush1.bf16.msra.mxu0 %v11053_v55  ;;  %v11147_v55 = vld [vmem:[#allocation6 + $0xc80] ss:$8 sps:$4 sm:$0xff]  }
 0x2d6   :  { %4436 = vmatprep.subr.bf16.mxu0 %v11061_v58  ;;  %4160 = vmatpush1.bf16.msra.mxu1 %v11330_v49  ;;  %v11153_v58 = vld [vmem:[#allocation6 + $0xc90] ss:$8 sps:$4 sm:$0xff]   ;;  %v11309_v49 = vld [vmem:[#allocation6 + $0xe20] ss:$8 sps:$4 sm:$0xff]  }
 0x2d9   :  { %4437 = vmatpush1.bf16.msra.mxu0 %v11059_v60  ;;  %4162 = vmatmul.mubr.bf16.vlgmr.msra.gmra.mrb[0].mxu1 %v8188_v52  ;;  %v11159_v60 = vld [vmem:[#allocation6 + $0xca0] ss:$8 sps:$4 sm:$0xff]   ;;  %v11323_v52 = vld [vmem:[#allocation6 + $0xe44] ss:$8 sps:$4 sm:$0xff]  }
 0x2da   :  { %4438 = vmatprep.subr.bf16.mxu0 %v11067_v62  ;;  %v11165_v62 = vld [vmem:[#allocation6 + $0xcb0] ss:$8 sps:$4 sm:$0xff]  }
 0x2dd   :  { %4439 = vmatpush1.bf16.msra.mxu0 %v11065_v1  ;;  %v11171_v1 = vld [vmem:[#allocation6 + $0xcc0] ss:$8 sps:$4 sm:$0xff]  }
 0x2de   :  { %4440 = vmatprep.subr.bf16.mxu0 %v11073_v3  ;;  %v11177_v3 = vld [vmem:[#allocation6 + $0xcd0] ss:$8 sps:$4 sm:$0xff]  }
 0x2e1   :  { %4441 = vmatpush1.bf16.msra.mxu0 %v11071_v5  ;;  %v11183_v5 = vld [vmem:[#allocation6 + $0xce0] ss:$8 sps:$4 sm:$0xff]  }
 0x2e2   :  { %4442 = vmatprep.subr.bf16.mxu0 %v11079_v7  ;;  %v11189_v7 = vld [vmem:[#allocation6 + $0xcf0] ss:$8 sps:$4 sm:$0xff]  }
 0x2e5   :  { %4443 = vmatpush1.bf16.msra.mxu0 %v11077_v10  ;;  %v12402_v10 = vld [vmem:[#allocation3 + $0x68] sm:$0xff] }
 0x2e6   :  { %4444 = vmatprep.subr.bf16.mxu0 %v11085_v57  ;;  %v11197_v57 = vld [vmem:[#allocation6 + $0xd00] ss:$8 sps:$4 sm:$0xff]   ;;  %v8207_v12 = vcombine.high %v12402_v10, %v12402_v10  ;;  %v8206_v43 = vcombine.low %v12402_v10, %v12402_v10  ;;  %v11356_v10 = vld [vmem:[#allocation6 + $0xed0] ss:$8 sps:$4 sm:$0xff]  }
 0x2e9   :  { %4445 = vmatpush1.bf16.msra.mxu0 %v11083_v13  ;;  %v11205_v13 = vld [vmem:[#allocation6 + $0xd14] ss:$8 sps:$4 sm:$0xff]  }
 0x2ea   :  { %4446 = vmatprep.subr.bf16.mxu0 %v11091_v16  ;;  %v11211_v16 = vld [vmem:[#allocation6 + $0xd24] ss:$8 sps:$4 sm:$0xff]  }
 0x2ed   :  { %4447 = vmatpush1.bf16.msra.mxu0 %v11089_v0  ;;  %v11217_v0 = vld [vmem:[#allocation6 + $0xd34] ss:$8 sps:$4 sm:$0xff]  }
 0x2ee   :  { %4457 = vmatprep.subr.bf16.mxu0 %v11099_v19  ;;  %v11223_v19 = vld [vmem:[#allocation6 + $0xd44] ss:$8 sps:$4 sm:$0xff]  }
 0x2f0   :  { %4449 = vmatmul.mubr.bf16.vlgmr.msra.gmra.mrb[0].mxu0 %v8202_v22  ;;  %v11227_v22 = vld [vmem:[#allocation6 + $0xd50] ss:$8 sps:$4 sm:$0xff]  }
 0x2f1   :  { %4458 = vmatpush1.bf16.msra.mxu0 %v11097_v23  ;;  %4489 = vmatprep.mubr.bf16.mxu0 %v8205_v8  ;;  %v11235_v23 = vld [vmem:[#allocation6 + $0xd64] ss:$8 sps:$4 sm:$0xff]   ;;  %v11233_v8 = vld [vmem:[#allocation6 + $0xd60] ss:$8 sps:$4 sm:$0xff]  }
 0x2f2   :  { %4459 = vmatprep.subr.bf16.mxu0 %v11105_v25  ;;  %v11241_v25 = vld [vmem:[#allocation6 + $0xd70] ss:$8 sps:$4 sm:$0xff]  }
 0x2f5   :  { %4460 = vmatpush1.bf16.msra.mxu0 %v11103_v27  ;;  %v11247_v27 = vld [vmem:[#allocation6 + $0xd80] ss:$8 sps:$4 sm:$0xff]  }
 0x2f6   :  { %4461 = vmatprep.subr.bf16.mxu0 %v11111_v29  ;;  %v11253_v29 = vld [vmem:[#allocation6 + $0xd90] ss:$8 sps:$4 sm:$0xff]  }
 0x2f9   :  { %4462 = vmatpush1.bf16.msra.mxu0 %v11109_v30  ;;  %v11259_v30 = vld [vmem:[#allocation6 + $0xda0] ss:$8 sps:$4 sm:$0xff]  }
 0x2fa   :  { %4463 = vmatprep.subr.bf16.mxu0 %v11117_v32  ;;  %v11265_v32 = vld [vmem:[#allocation6 + $0xdb0] ss:$8 sps:$4 sm:$0xff]  }
 0x2fd   :  { %4464 = vmatpush1.bf16.msra.mxu0 %v11115_v34  ;;  %v11271_v34 = vld [vmem:[#allocation6 + $0xdc0] ss:$8 sps:$4 sm:$0xff]  }
 0x2fe   :  { %4465 = vmatprep.subr.bf16.mxu0 %v11123_v36  ;;  %v11277_v36 = vld [vmem:[#allocation6 + $0xdd0] ss:$8 sps:$4 sm:$0xff]  }
 0x301   :  { %4466 = vmatpush1.bf16.msra.mxu0 %v11121_v38  ;;  %v11283_v38 = vld [vmem:[#allocation6 + $0xde0] ss:$8 sps:$4 sm:$0xff]  }
 0x302   :  { %4467 = vmatprep.subr.bf16.mxu0 %v11129_v40  ;;  %v11289_v40 = vld [vmem:[#allocation6 + $0xdf0] ss:$8 sps:$4 sm:$0xff]  }
 0x305   :  { %4468 = vmatpush1.bf16.msra.mxu0 %v11127_v42  ;;  %v12408_v42 = vld [vmem:[#allocation3 + $0x70] sm:$0xff] }
 0x306   :  { %4469 = vmatprep.subr.bf16.mxu0 %v11135_v44  ;;  %v11297_v44 = vld [vmem:[#allocation6 + $0xe00] ss:$8 sps:$4 sm:$0xff]   ;;  %v8209_v45 = vcombine.high %v12408_v42, %v12408_v42 }
 0x309   :  { %4470 = vmatpush1.bf16.msra.mxu0 %v11133_v46  ;;  %v11305_v46 = vld [vmem:[#allocation6 + $0xe14] ss:$8 sps:$4 sm:$0xff]  }
 0x30a   :  { %4471 = vmatprep.subr.bf16.mxu0 %v11143_v48  ;;  %v11311_v48 = vld [vmem:[#allocation6 + $0xe24] ss:$8 sps:$4 sm:$0xff]  }
 0x30d   :  { %4472 = vmatpush1.bf16.msra.mxu0 %v11141_v51  ;;  %v11315_v51 = vld [vmem:[#allocation6 + $0xe30] ss:$8 sps:$4 sm:$0xff]  }
 0x30e   :  { %4473 = vmatprep.subr.bf16.mxu0 %v11149_v54  ;;  %v11329_v54 = vld [vmem:[#allocation6 + $0xe54] ss:$8 sps:$4 sm:$0xff]  }
 0x311   :  { %4474 = vmatpush1.bf16.msra.mxu0 %v11147_v55  ;;  %v11327_v55 = vld [vmem:[#allocation6 + $0xe50] ss:$8 sps:$4 sm:$0xff]  }
 0x312   :  { %4475 = vmatprep.subr.bf16.mxu0 %v11155_v56  ;;  %v11335_v56 = vld [vmem:[#allocation6 + $0xe64] ss:$8 sps:$4 sm:$0xff]  }
 0x315   :  { %4476 = vmatpush1.bf16.msra.mxu0 %v11153_v58  ;;  %v11333_v58 = vld [vmem:[#allocation6 + $0xe60] ss:$8 sps:$4 sm:$0xff]  }
 0x316   :  { %4477 = vmatprep.subr.bf16.mxu0 %v11161_v59  ;;  %v11340_v59 = vld [vmem:[#allocation6 + $0xe74] ss:$8 sps:$4 sm:$0xff]  }
 0x319   :  { %4478 = vmatpush1.bf16.msra.mxu0 %v11159_v60  ;;  %v11338_v60 = vld [vmem:[#allocation6 + $0xe70] ss:$8 sps:$4 sm:$0xff]  }
 0x31a   :  { %4479 = vmatprep.subr.bf16.mxu0 %v11167_v61  ;;  %v11343_v61 = vld [vmem:[#allocation6 + $0xe84] ss:$8 sps:$4 sm:$0xff]  }
 0x31d   :  { %4480 = vmatpush1.bf16.msra.mxu0 %v11165_v62  ;;  %v11341_v62 = vld [vmem:[#allocation6 + $0xe80] ss:$8 sps:$4 sm:$0xff]  }
 0x31e   :  { %4481 = vmatprep.subr.bf16.mxu0 %v11173_v63  ;;  %v11346_v63 = vld [vmem:[#allocation6 + $0xe94] ss:$8 sps:$4 sm:$0xff]  }
 0x321   :  { %4482 = vmatpush1.bf16.msra.mxu0 %v11171_v1  ;;  %v11344_v1 = vld [vmem:[#allocation6 + $0xe90] ss:$8 sps:$4 sm:$0xff]  }
 0x322   :  { %4483 = vmatprep.subr.bf16.mxu0 %v11179_v2  ;;  %v11349_v2 = vld [vmem:[#allocation6 + $0xea4] ss:$8 sps:$4 sm:$0xff]  }
 0x325   :  { %4484 = vmatpush1.bf16.msra.mxu0 %v11177_v3  ;;  %v11347_v3 = vld [vmem:[#allocation6 + $0xea0] ss:$8 sps:$4 sm:$0xff]  }
 0x326   :  { %4485 = vmatprep.subr.bf16.mxu0 %v11185_v4  ;;  %v11352_v4 = vld [vmem:[#allocation6 + $0xeb4] ss:$8 sps:$4 sm:$0xff]  }
 0x329   :  { %4486 = vmatpush1.bf16.msra.mxu0 %v11183_v5  ;;  %v11350_v5 = vld [vmem:[#allocation6 + $0xeb0] ss:$8 sps:$4 sm:$0xff]  }
 0x32a   :  { %4487 = vmatprep.subr.bf16.mxu0 %v11191_v6  ;;  %v11355_v6 = vld [vmem:[#allocation6 + $0xec4] ss:$8 sps:$4 sm:$0xff]  }
 0x32d   :  { %4488 = vmatpush1.bf16.msra.mxu0 %v11189_v7  ;;  %v11353_v7 = vld [vmem:[#allocation6 + $0xec0] ss:$8 sps:$4 sm:$0xff]  }
 0x32e   :  { %4498 = vmatprep.subr.bf16.mxu0 %v11199_v9  ;;  %v11358_v9 = vld [vmem:[#allocation6 + $0xed4] ss:$8 sps:$4 sm:$0xff]  }
 0x330   :  { %4490 = vmatmul.mubr.bf16.vlgmr.msra.gmra.mrb[0].mxu0 %v8204_v11  ;;  %v11361_v11 = vld [vmem:[#allocation6 + $0xee4] ss:$8 sps:$4 sm:$0xff]  }
 0x331   :  { %4499 = vmatpush1.bf16.msra.mxu0 %v11197_v57  ;;  %4530 = vmatprep.mubr.bf16.mxu0 %v8207_v12  ;;  %v11359_v57 = vld [vmem:[#allocation6 + $0xee0] ss:$8 sps:$4 sm:$0xff]   ;;  %v11364_v12 = vld [vmem:[#allocation6 + $0xef4] ss:$8 sps:$4 sm:$0xff]  }
 0x332   :  { %4500 = vmatprep.subr.bf16.mxu0 %v11205_v13  ;;  %v11362_v13 = vld [vmem:[#allocation6 + $0xef0] ss:$8 sps:$4 sm:$0xff]  }
 0x335   :  { %4501 = vmatpush1.bf16.msra.mxu0 %v11203_v15  ;;  %v11369_v15 = vld [vmem:[#allocation6 + $0xf04] ss:$8 sps:$4 sm:$0xff]  }
 0x336   :  { %4502 = vmatprep.subr.bf16.mxu0 %v11211_v16  ;;  %v12414_v16 = vld [vmem:[#allocation3 + $0x78] sm:$0xff] }
 0x339   :  { %4503 = vmatpush1.bf16.msra.mxu0 %v11209_v17  ;;  %v8208_v17 = vcombine.low %v12408_v42, %v12408_v42 }
 0x33a   :  { %4504 = vmatprep.subr.bf16.mxu0 %v11217_v0  ;;  %v11367_v0 = vld [vmem:[#allocation6 + $0xf00] ss:$8 sps:$4 sm:$0xff]  }
 0x33d   :  { %4505 = vmatpush1.bf16.msra.mxu0 %v11215_v18  ;;  %v8211_v18 = vcombine.high %v12414_v16, %v12414_v16 }
 0x33e   :  { %4506 = vmatprep.subr.bf16.mxu0 %v11223_v19  ;;  %v11372_v19 = vld [vmem:[#allocation6 + $0xf14] ss:$8 sps:$4 sm:$0xff]  }
 0x341   :  { %4507 = vmatpush1.bf16.msra.mxu0 %v11221_v20  ;;  %v11370_v20 = vld [vmem:[#allocation6 + $0xf10] ss:$8 sps:$4 sm:$0xff]  }
 0x342   :  { %4508 = vmatprep.subr.bf16.mxu0 %v11229_v21  ;;  %v11375_v21 = vld [vmem:[#allocation6 + $0xf24] ss:$8 sps:$4 sm:$0xff]  }
 0x345   :  { %4509 = vmatpush1.bf16.msra.mxu0 %v11227_v22  ;;  %v11373_v22 = vld [vmem:[#allocation6 + $0xf20] ss:$8 sps:$4 sm:$0xff]  }
 0x346   :  { %4510 = vmatprep.subr.bf16.mxu0 %v11235_v23  ;;  %v11378_v23 = vld [vmem:[#allocation6 + $0xf34] ss:$8 sps:$4 sm:$0xff]  }
 0x349   :  { %4511 = vmatpush1.bf16.msra.mxu0 %v11233_v8  ;;  %v11376_v8 = vld [vmem:[#allocation6 + $0xf30] ss:$8 sps:$4 sm:$0xff]  }
 0x34a   :  { %4512 = vmatprep.subr.bf16.mxu0 %v11243_v24  ;;  %v11381_v24 = vld [vmem:[#allocation6 + $0xf44] ss:$8 sps:$4 sm:$0xff]  }
 0x34d   :  { %4513 = vmatpush1.bf16.msra.mxu0 %v11241_v25  ;;  %v11379_v25 = vld [vmem:[#allocation6 + $0xf40] ss:$8 sps:$4 sm:$0xff]  }
 0x34e   :  { %4514 = vmatprep.subr.bf16.mxu0 %v11249_v26  ;;  %v11384_v26 = vld [vmem:[#allocation6 + $0xf54] ss:$8 sps:$4 sm:$0xff]  }
 0x351   :  { %4515 = vmatpush1.bf16.msra.mxu0 %v11247_v27  ;;  %v11382_v27 = vld [vmem:[#allocation6 + $0xf50] ss:$8 sps:$4 sm:$0xff]  }
 0x352   :  { %4516 = vmatprep.subr.bf16.mxu0 %v11255_v28  ;;  %v11387_v28 = vld [vmem:[#allocation6 + $0xf64] ss:$8 sps:$4 sm:$0xff]  }
 0x355   :  { %4517 = vmatpush1.bf16.msra.mxu0 %v11253_v29  ;;  %v11385_v29 = vld [vmem:[#allocation6 + $0xf60] ss:$8 sps:$4 sm:$0xff]  }
 0x356   :  { %4518 = vmatprep.subr.bf16.mxu0 %v11261_v14  ;;  %v11390_v14 = vld [vmem:[#allocation6 + $0xf74] ss:$8 sps:$4 sm:$0xff]  }
 0x359   :  { %4519 = vmatpush1.bf16.msra.mxu0 %v11259_v30  ;;  %v11388_v30 = vld [vmem:[#allocation6 + $0xf70] ss:$8 sps:$4 sm:$0xff]  }
 0x35a   :  { %4520 = vmatprep.subr.bf16.mxu0 %v11267_v31  ;;  %v11393_v31 = vld [vmem:[#allocation6 + $0xf84] ss:$8 sps:$4 sm:$0xff]  }
 0x35d   :  { %4521 = vmatpush1.bf16.msra.mxu0 %v11265_v32  ;;  %v11391_v32 = vld [vmem:[#allocation6 + $0xf80] ss:$8 sps:$4 sm:$0xff]  }
 0x35e   :  { %4522 = vmatprep.subr.bf16.mxu0 %v11273_v33  ;;  %v11396_v33 = vld [vmem:[#allocation6 + $0xf94] ss:$8 sps:$4 sm:$0xff]  }
 0x361   :  { %4523 = vmatpush1.bf16.msra.mxu0 %v11271_v34  ;;  %v11394_v34 = vld [vmem:[#allocation6 + $0xf90] ss:$8 sps:$4 sm:$0xff]  }
 0x362   :  { %4524 = vmatprep.subr.bf16.mxu0 %v11279_v35  ;;  %v11399_v35 = vld [vmem:[#allocation6 + $0xfa4] ss:$8 sps:$4 sm:$0xff]  }
 0x365   :  { %4525 = vmatpush1.bf16.msra.mxu0 %v11277_v36  ;;  %v11397_v36 = vld [vmem:[#allocation6 + $0xfa0] ss:$8 sps:$4 sm:$0xff]  }
 0x366   :  { %4526 = vmatprep.subr.bf16.mxu0 %v11285_v37  ;;  %v11402_v37 = vld [vmem:[#allocation6 + $0xfb4] ss:$8 sps:$4 sm:$0xff]  }
 0x369   :  { %4527 = vmatpush1.bf16.msra.mxu0 %v11283_v38  ;;  %v11400_v38 = vld [vmem:[#allocation6 + $0xfb0] ss:$8 sps:$4 sm:$0xff]  }
 0x36a   :  { %4528 = vmatprep.subr.bf16.mxu0 %v11291_v39  ;;  %v11405_v39 = vld [vmem:[#allocation6 + $0xfc4] ss:$8 sps:$4 sm:$0xff]  }
 0x36d   :  { %4529 = vmatpush1.bf16.msra.mxu0 %v11289_v40  ;;  %v11403_v40 = vld [vmem:[#allocation6 + $0xfc0] ss:$8 sps:$4 sm:$0xff]  }
 0x36e   :  { %4539 = vmatprep.subr.bf16.mxu0 %v11299_v41  ;;  %v11408_v41 = vld [vmem:[#allocation6 + $0xfd4] ss:$8 sps:$4 sm:$0xff]  }
 0x370   :  { %4531 = vmatmul.mubr.bf16.vlgmr.msra.gmra.mrb[0].mxu0 %v8206_v43  ;;  %v11406_v43 = vld [vmem:[#allocation6 + $0xfd0] ss:$8 sps:$4 sm:$0xff]  }
 0x371   :  { %4540 = vmatpush1.bf16.msra.mxu0 %v11297_v44  ;;  %4571 = vmatprep.mubr.bf16.mxu0 %v8209_v45  ;;  %v11411_v45 = vld [vmem:[#allocation6 + $0xfe4] ss:$8 sps:$4 sm:$0xff]  }
 0x372   :  { %4541 = vmatprep.subr.bf16.mxu0 %v11305_v46 }
 0x375   :  { %4542 = vmatpush1.bf16.msra.mxu0 %v11303_v47 }
 0x376   :  { %4543 = vmatprep.subr.bf16.mxu0 %v11311_v48  ;;  %v11409_v48 = vld [vmem:[#allocation6 + $0xfe0] ss:$8 sps:$4 sm:$0xff]  }
 0x379   :  { %4544 = vmatpush1.bf16.msra.mxu0 %v11309_v49  ;;  %v11414_v49 = vld [vmem:[#allocation6 + $0xff4] ss:$8 sps:$4 sm:$0xff]  }
 0x37a   :  { %4545 = vmatprep.subr.bf16.mxu0 %v11317_v50  ;;  %v11412_v50 = vld [vmem:[#allocation6 + $0xff0] ss:$8 sps:$4 sm:$0xff]  }
 0x37d   :  { %4546 = vmatpush1.bf16.msra.mxu0 %v11315_v51  ;;  %v11419_v51 = vld [vmem:[#allocation6 + $0x1004] ss:$8 sps:$4 sm:$0xff]  }
 0x37e   :  { %4547 = vmatprep.subr.bf16.mxu0 %v11323_v52  ;;  %v12424_v52 = vld [vmem:[#allocation3 + $0x80] sm:$0xff] }
 0x381   :  { %4548 = vmatpush1.bf16.msra.mxu0 %v11321_v53  ;;  %v8210_v53 = vcombine.low %v12414_v16, %v12414_v16  ;;  %v4763_v16 = vld [vmem:[#allocation9 + $0x88] sm:$0xff] }
 0x382   :  { %4549 = vmatprep.subr.bf16.mxu0 %v11329_v54  ;;  %v11417_v54 = vld [vmem:[#allocation6 + $0x1000] ss:$8 sps:$4 sm:$0xff]  }
 0x385   :  { %4550 = vmatpush1.bf16.msra.mxu0 %v11327_v55  ;;  %v8213_v55 = vcombine.high %v12424_v52, %v12424_v52 }
 0x386   :  { %4551 = vmatprep.subr.bf16.mxu0 %v11335_v56  ;;  %v11422_v56 = vld [vmem:[#allocation6 + $0x1014] ss:$8 sps:$4 sm:$0xff]  }
 0x389   :  { %4552 = vmatpush1.bf16.msra.mxu0 %v11333_v58  ;;  %v11420_v58 = vld [vmem:[#allocation6 + $0x1010] ss:$8 sps:$4 sm:$0xff]  }
 0x38a   :  { %4553 = vmatprep.subr.bf16.mxu0 %v11340_v59  ;;  %v11425_v59 = vld [vmem:[#allocation6 + $0x1024] ss:$8 sps:$4 sm:$0xff]  }
 0x38d   :  { %4554 = vmatpush1.bf16.msra.mxu0 %v11338_v60  ;;  %v11423_v60 = vld [vmem:[#allocation6 + $0x1020] ss:$8 sps:$4 sm:$0xff]  }
 0x38e   :  { %4555 = vmatprep.subr.bf16.mxu0 %v11343_v61  ;;  %v11428_v61 = vld [vmem:[#allocation6 + $0x1034] ss:$8 sps:$4 sm:$0xff]  }
 0x391   :  { %4556 = vmatpush1.bf16.msra.mxu0 %v11341_v62  ;;  %v11426_v62 = vld [vmem:[#allocation6 + $0x1030] ss:$8 sps:$4 sm:$0xff]  }
 0x392   :  { %4557 = vmatprep.subr.bf16.mxu0 %v11346_v63  ;;  %v11431_v63 = vld [vmem:[#allocation6 + $0x1044] ss:$8 sps:$4 sm:$0xff]  }
 0x395   :  { %4558 = vmatpush1.bf16.msra.mxu0 %v11344_v1  ;;  %v11429_v1 = vld [vmem:[#allocation6 + $0x1040] ss:$8 sps:$4 sm:$0xff]  }
 0x396   :  { %4559 = vmatprep.subr.bf16.mxu0 %v11349_v2  ;;  %v11434_v2 = vld [vmem:[#allocation6 + $0x1054] ss:$8 sps:$4 sm:$0xff]  }
 0x399   :  { %4560 = vmatpush1.bf16.msra.mxu0 %v11347_v3  ;;  %v11432_v3 = vld [vmem:[#allocation6 + $0x1050] ss:$8 sps:$4 sm:$0xff]  }
 0x39a   :  { %4561 = vmatprep.subr.bf16.mxu0 %v11352_v4  ;;  %v11437_v4 = vld [vmem:[#allocation6 + $0x1064] ss:$8 sps:$4 sm:$0xff]  }
 0x39d   :  { %4562 = vmatpush1.bf16.msra.mxu0 %v11350_v5  ;;  %v11435_v5 = vld [vmem:[#allocation6 + $0x1060] ss:$8 sps:$4 sm:$0xff]  }
 0x39e   :  { %4563 = vmatprep.subr.bf16.mxu0 %v11355_v6  ;;  %v11440_v6 = vld [vmem:[#allocation6 + $0x1074] ss:$8 sps:$4 sm:$0xff]  }
 0x3a1   :  { %4564 = vmatpush1.bf16.msra.mxu0 %v11353_v7  ;;  %v11438_v7 = vld [vmem:[#allocation6 + $0x1070] ss:$8 sps:$4 sm:$0xff]  }
 0x3a2   :  { %4565 = vmatprep.subr.bf16.mxu0 %v11358_v9  ;;  %v11443_v9 = vld [vmem:[#allocation6 + $0x1084] ss:$8 sps:$4 sm:$0xff]  }
 0x3a5   :  { %4566 = vmatpush1.bf16.msra.mxu0 %v11356_v10  ;;  %v11441_v10 = vld [vmem:[#allocation6 + $0x1080] ss:$8 sps:$4 sm:$0xff]  }
 0x3a6   :  { %4567 = vmatprep.subr.bf16.mxu0 %v11361_v11  ;;  %v11446_v11 = vld [vmem:[#allocation6 + $0x1094] ss:$8 sps:$4 sm:$0xff]  }
 0x3a9   :  { %4568 = vmatpush1.bf16.msra.mxu0 %v11359_v57  ;;  %v12043_v57 = vmov 0  }
 0x3aa   :  { %4569 = vmatprep.subr.bf16.mxu0 %v11364_v12  ;;  %8065 = vst [vmem:[#allocation31 + $0x140] sm:$0xf] %v12043_v57  ;;  %8066 = vst [vmem:[#allocation31 + $0x144] sm:$0xf] %v12043_v57  ;;  %10616 = vset.pattern.permute.xlu0 %v12043_v57  ;;  %v11444_v12 = vld [vmem:[#allocation6 + $0x1090] ss:$8 sps:$4 sm:$0xff]  }
 0x3ab   :  { %8067 = vst [vmem:[#allocation31 + $0x148] sm:$0xf] %v12043_v57  ;;  %8068 = vst [vmem:[#allocation31 + $0x14c] sm:$0xf] %v12043_v57 }
 0x3ac   :  { %v12420_v42 = vpop.f32.mrb[0].mxu1  ;;  %8069 = vst [vmem:[#allocation31 + $0x150] sm:$0xf] %v12043_v57  ;;  %8070 = vst [vmem:[#allocation31 + $0x154] sm:$0xf] %v12043_v57 }
 0x3ad   :  { %4570 = vmatpush1.bf16.msra.mxu0 %v11362_v13  ;;  %v12422_v44 = vpop.f32.mrb[1].mxu1  ;;  %8071 = vst [vmem:[#allocation31 + $0x158] sm:$0xf] %v12043_v57  ;;  %8072 = vst [vmem:[#allocation31 + $0x15c] sm:$0xf] %v12043_v57 }
 0x3ae   :  { %4580 = vmatprep.subr.bf16.mxu0 %v11369_v15  ;;  %v4167_v46 = vpop.f32.mrb[2].mxu1  ;;  %8073 = vst [vmem:[#allocation31 + $0x160] sm:$0xf] %v12043_v57  ;;  %8074 = vst [vmem:[#allocation31 + $0x164] sm:$0xf] %v12043_v57  ;;  %v4762_v15 = vld [vmem:[#allocation9 + $0x80] sm:$0xff] }
 0x3af   :  { %v4168_v47 = vpop.f32.mrb[3].mxu1  ;;  %8075 = vst [vmem:[#allocation31 + $0x168] sm:$0xf] %v12043_v57  ;;  %8076 = vst [vmem:[#allocation31 + $0x16c] sm:$0xf] %v12043_v57  ;;  %v4754_v46 = vld [vmem:[#allocation9 + $0x40] sm:$0xff] }
 0x3b0   :  { %4572 = vmatmul.mubr.bf16.vlgmr.msra.gmra.mrb[0].mxu0 %v8208_v17  ;;  %8077 = vst [vmem:[#allocation31 + $0x170] sm:$0xf] %v12043_v57  ;;  %8078 = vst [vmem:[#allocation31 + $0x174] sm:$0xf] %v12043_v57  ;;  %v11449_v13 = vld [vmem:[#allocation6 + $0x10a4] ss:$8 sps:$4 sm:$0xff]  }
 0x3b1   :  { %4581 = vmatpush1.bf16.msra.mxu0 %v11367_v0  ;;  %4612 = vmatprep.mubr.bf16.mxu0 %v8211_v18  ;;  %8079 = vst [vmem:[#allocation31 + $0x178] sm:$0xf] %v12043_v57  ;;  %8080 = vst [vmem:[#allocation31 + $0x17c] sm:$0xf] %v12043_v57  ;;  %v4746_v17 = vld [vmem:[#allocation9] sm:$0xff]  ;;  %v10184_v0 = vpack.c.bf16 %v4763_v16, %v4762_v15  ;;  %v4747_v18 = vld [vmem:[#allocation9 + $0x8] sm:$0xff] }
 0x3b2   :  { %4582 = vmatprep.subr.bf16.mxu0 %v11372_v19  ;;  %8082 = vst [vmem:[#allocation31 + $0x180] sm:$0xf] %v12043_v57  ;;  %8083 = vst [vmem:[#allocation31 + $0x184] sm:$0xf] %v12043_v57  ;;  %v4764_v19 = vld [vmem:[#allocation9 + $0x90] sm:$0xff]  ;;  %v4755_v47 = vld [vmem:[#allocation9 + $0x48] sm:$0xff] }
 0x3b3   :  { %8084 = vst [vmem:[#allocation31 + $0x188] sm:$0xf] %v12043_v57  ;;  %8085 = vst [vmem:[#allocation31 + $0x18c] sm:$0xf] %v12043_v57  ;;  %10185 = vmatprep.subr.bf16.mxu1 %v10184_v0  ;;  %v11475_v15 = vld [vmem:[#allocation6 + $0x1124] ss:$8 sps:$4 sm:$0xff]  }
 0x3b4   :  { %8086 = vst [vmem:[#allocation31 + $0x190] sm:$0xf] %v12043_v57  ;;  %8087 = vst [vmem:[#allocation31 + $0x194] sm:$0xf] %v12043_v57  ;;  %v11473_v16 = vld [vmem:[#allocation6 + $0x1120] ss:$8 sps:$4 sm:$0xff]  }
 0x3b5   :  { %4583 = vmatpush1.bf16.msra.mxu0 %v11370_v20  ;;  %8088 = vst [vmem:[#allocation31 + $0x198] sm:$0xf] %v12043_v57  ;;  %8089 = vst [vmem:[#allocation31 + $0x19c] sm:$0xf] %v12043_v57  ;;  %v4765_v20 = vld [vmem:[#allocation9 + $0x98] sm:$0xff] }
 0x3b6   :  { %4584 = vmatprep.subr.bf16.mxu0 %v11375_v21  ;;  %8090 = vst [vmem:[#allocation31 + $0x1a0] sm:$0xf] %v12043_v57  ;;  %8091 = vst [vmem:[#allocation31 + $0x1a4] sm:$0xf] %v12043_v57  ;;  %v10186_v21 = vpack.c.bf16 %v4747_v18, %v4746_v17  ;;  %v11478_v17 = vld [vmem:[#allocation6 + $0x1134] ss:$8 sps:$4 sm:$0xff]  }
 0x3b7   :  { %8092 = vst [vmem:[#allocation31 + $0x1a8] sm:$0xf] %v12043_v57  ;;  %8093 = vst [vmem:[#allocation31 + $0x1ac] sm:$0xf] %v12043_v57  ;;  %v11481_v0 = vld [vmem:[#allocation6 + $0x1144] ss:$8 sps:$4 sm:$0xff]  }
 0x3b8   :  { %8094 = vst [vmem:[#allocation31 + $0x1b0] sm:$0xf] %v12043_v57  ;;  %8095 = vst [vmem:[#allocation31 + $0x1b4] sm:$0xf] %v12043_v57  ;;  %10187 = vmatpush3.bf16.msra.mxu1 %v10186_v21  ;;  %v11479_v18 = vld [vmem:[#allocation6 + $0x1140] ss:$8 sps:$4 sm:$0xff]  }
 0x3b9   :  { %4585 = vmatpush1.bf16.msra.mxu0 %v11373_v22  ;;  %8096 = vst [vmem:[#allocation31 + $0x1b8] sm:$0xf] %v12043_v57  ;;  %8097 = vst [vmem:[#allocation31 + $0x1bc] sm:$0xf] %v12043_v57  ;;  %v10188_v22 = vpack.c.bf16 %v4765_v20, %v4764_v19  ;;  %v11484_v19 = vld [vmem:[#allocation6 + $0x1154] ss:$8 sps:$4 sm:$0xff]  }
 0x3ba   :  { %4586 = vmatprep.subr.bf16.mxu0 %v11378_v23  ;;  %8099 = vst [vmem:[#allocation31 + $0x1c0] sm:$0xf] %v12043_v57  ;;  %8100 = vst [vmem:[#allocation31 + $0x1c4] sm:$0xf] %v12043_v57  ;;  %v4748_v23 = vld [vmem:[#allocation9 + $0x10] sm:$0xff] }
 0x3bb   :  { %8101 = vst [vmem:[#allocation31 + $0x1c8] sm:$0xf] %v12043_v57  ;;  %8102 = vst [vmem:[#allocation31 + $0x1cc] sm:$0xf] %v12043_v57  ;;  %10189 = vmatprep.subr.bf16.mxu1 %v10188_v22  ;;  %v11482_v20 = vld [vmem:[#allocation6 + $0x1150] ss:$8 sps:$4 sm:$0xff]  }
 0x3bc   :  { %8103 = vst [vmem:[#allocation31 + $0x1d0] sm:$0xf] %v12043_v57  ;;  %8104 = vst [vmem:[#allocation31 + $0x1d4] sm:$0xf] %v12043_v57  ;;  %v11487_v21 = vld [vmem:[#allocation6 + $0x1164] ss:$8 sps:$4 sm:$0xff]  }
 0x3bd   :  { %4587 = vmatpush1.bf16.msra.mxu0 %v11376_v8  ;;  %8105 = vst [vmem:[#allocation31 + $0x1d8] sm:$0xf] %v12043_v57  ;;  %8106 = vst [vmem:[#allocation31 + $0x1dc] sm:$0xf] %v12043_v57  ;;  %v4749_v8 = vld [vmem:[#allocation9 + $0x18] sm:$0xff] }
 0x3be   :  { %4588 = vmatprep.subr.bf16.mxu0 %v11381_v24  ;;  %8107 = vst [vmem:[#allocation31 + $0x1e0] sm:$0xf] %v12043_v57  ;;  %8108 = vst [vmem:[#allocation31 + $0x1e4] sm:$0xf] %v12043_v57  ;;  %v4766_v24 = vld [vmem:[#allocation9 + $0xa0] sm:$0xff] }
 0x3bf   :  { %8109 = vst [vmem:[#allocation31 + $0x1e8] sm:$0xf] %v12043_v57  ;;  %8110 = vst [vmem:[#allocation31 + $0x1ec] sm:$0xf] %v12043_v57  ;;  %v11485_v22 = vld [vmem:[#allocation6 + $0x1160] ss:$8 sps:$4 sm:$0xff]  }
 0x3c0   :  { %8111 = vst [vmem:[#allocation31 + $0x1f0] sm:$0xf] %v12043_v57  ;;  %8112 = vst [vmem:[#allocation31 + $0x1f4] sm:$0xf] %v12043_v57 }
 0x3c1   :  { %4589 = vmatpush1.bf16.msra.mxu0 %v11379_v25  ;;  %8113 = vst [vmem:[#allocation31 + $0x1f8] sm:$0xf] %v12043_v57  ;;  %8114 = vst [vmem:[#allocation31 + $0x1fc] sm:$0xf] %v12043_v57  ;;  %v4767_v25 = vld [vmem:[#allocation9 + $0xa8] sm:$0xff] }
 0x3c2   :  { %4590 = vmatprep.subr.bf16.mxu0 %v11384_v26  ;;  %v10190_v26 = vpack.c.bf16 %v4749_v8, %v4748_v23  ;;  %v11490_v23 = vld [vmem:[#allocation6 + $0x1174] ss:$8 sps:$4 sm:$0xff]   ;;  %v11488_v8 = vld [vmem:[#allocation6 + $0x1170] ss:$8 sps:$4 sm:$0xff]  }
 0x3c4   :  { %10191 = vmatpush3.bf16.msra.mxu1 %v10190_v26  ;;  %v11496_v26 = vld [vmem:[#allocation6 + $0x1194] ss:$8 sps:$4 sm:$0xff]  }
 0x3c5   :  { %4591 = vmatpush1.bf16.msra.mxu0 %v11382_v27  ;;  %v11447_v27 = vld [vmem:[#allocation6 + $0x10a0] ss:$8 sps:$4 sm:$0xff]  }
 0x3c6   :  { %4592 = vmatprep.subr.bf16.mxu0 %v11387_v28  ;;  %v10192_v28 = vpack.c.bf16 %v4767_v25, %v4766_v24  ;;  %v11493_v24 = vld [vmem:[#allocation6 + $0x1184] ss:$8 sps:$4 sm:$0xff]   ;;  %v11491_v25 = vld [vmem:[#allocation6 + $0x1180] ss:$8 sps:$4 sm:$0xff]  }
 0x3c8   :  { %10193 = vmatprep.subr.bf16.mxu1 %v10192_v28  ;;  %v11499_v28 = vld [vmem:[#allocation6 + $0x11a4] ss:$8 sps:$4 sm:$0xff]  }
 0x3c9   :  { %4593 = vmatpush1.bf16.msra.mxu0 %v11385_v29  ;;  %v4750_v29 = vld [vmem:[#allocation9 + $0x20] sm:$0xff] }
 0x3ca   :  { %4594 = vmatprep.subr.bf16.mxu0 %v11390_v14  ;;  %v4751_v14 = vld [vmem:[#allocation9 + $0x28] sm:$0xff] }
 0x3cd   :  { %4595 = vmatpush1.bf16.msra.mxu0 %v11388_v30  ;;  %v11452_v30 = vld [vmem:[#allocation6 + $0x10b4] ss:$8 sps:$4 sm:$0xff]  }
 0x3ce   :  { %4596 = vmatprep.subr.bf16.mxu0 %v11393_v31  ;;  %v4768_v31 = vld [vmem:[#allocation9 + $0xb0] sm:$0xff] }
 0x3d1   :  { %4597 = vmatpush1.bf16.msra.mxu0 %v11391_v32  ;;  %v4769_v32 = vld [vmem:[#allocation9 + $0xb8] sm:$0xff] }
 0x3d2   :  { %4598 = vmatprep.subr.bf16.mxu0 %v11396_v33  ;;  %v10194_v33 = vpack.c.bf16 %v4751_v14, %v4750_v29  ;;  %v11497_v29 = vld [vmem:[#allocation6 + $0x11a0] ss:$8 sps:$4 sm:$0xff]   ;;  %v11502_v14 = vld [vmem:[#allocation6 + $0x11b4] ss:$8 sps:$4 sm:$0xff]  }
 0x3d4   :  { %10195 = vmatpush3.bf16.msra.mxu1 %v10194_v33  ;;  %v11508_v33 = vld [vmem:[#allocation6 + $0x11d4] ss:$8 sps:$4 sm:$0xff]  }
 0x3d5   :  { %4599 = vmatpush1.bf16.msra.mxu0 %v11394_v34  ;;  %v11450_v34 = vld [vmem:[#allocation6 + $0x10b0] ss:$8 sps:$4 sm:$0xff]  }
 0x3d6   :  { %4600 = vmatprep.subr.bf16.mxu0 %v11399_v35  ;;  %v10196_v35 = vpack.c.bf16 %v4769_v32, %v4768_v31  ;;  %v11505_v31 = vld [vmem:[#allocation6 + $0x11c4] ss:$8 sps:$4 sm:$0xff]   ;;  %v11503_v32 = vld [vmem:[#allocation6 + $0x11c0] ss:$8 sps:$4 sm:$0xff]  }
 0x3d8   :  { %10197 = vmatprep.subr.bf16.mxu1 %v10196_v35  ;;  %v11511_v35 = vld [vmem:[#allocation6 + $0x11e4] ss:$8 sps:$4 sm:$0xff]  }
 0x3d9   :  { %4601 = vmatpush1.bf16.msra.mxu0 %v11397_v36  ;;  %v4752_v36 = vld [vmem:[#allocation9 + $0x30] sm:$0xff] }
 0x3da   :  { %4602 = vmatprep.subr.bf16.mxu0 %v11402_v37  ;;  %v4753_v37 = vld [vmem:[#allocation9 + $0x38] sm:$0xff] }
 0x3dd   :  { %4603 = vmatpush1.bf16.msra.mxu0 %v11400_v38  ;;  %v11455_v38 = vld [vmem:[#allocation6 + $0x10c4] ss:$8 sps:$4 sm:$0xff]  }
 0x3de   :  { %4604 = vmatprep.subr.bf16.mxu0 %v11405_v39  ;;  %v4770_v39 = vld [vmem:[#allocation9 + $0xc0] sm:$0xff] }
 0x3e1   :  { %4605 = vmatpush1.bf16.msra.mxu0 %v11403_v40  ;;  %v4771_v40 = vld [vmem:[#allocation9 + $0xc8] sm:$0xff] }
 0x3e2   :  { %4606 = vmatprep.subr.bf16.mxu0 %v11408_v41  ;;  %v10198_v41 = vpack.c.bf16 %v4753_v37, %v4752_v36  ;;  %v11509_v36 = vld [vmem:[#allocation6 + $0x11e0] ss:$8 sps:$4 sm:$0xff]   ;;  %v11514_v37 = vld [vmem:[#allocation6 + $0x11f4] ss:$8 sps:$4 sm:$0xff]  }
 0x3e4   :  { %10199 = vmatpush3.bf16.msra.mxu1 %v10198_v41  ;;  %v11517_v41 = vld [vmem:[#allocation6 + $0x1200] ss:$8 sps:$4 sm:$0xff]  }
 0x3e5   :  { %4607 = vmatpush1.bf16.msra.mxu0 %v11406_v43  ;;  %v11453_v43 = vld [vmem:[#allocation6 + $0x10c0] ss:$8 sps:$4 sm:$0xff]  }
 0x3e6   :  { %4608 = vmatprep.subr.bf16.mxu0 %v11411_v45  ;;  %v10200_v45 = vpack.c.bf16 %v4771_v40, %v4770_v39  ;;  %v11519_v39 = vld [vmem:[#allocation6 + $0x1204] ss:$8 sps:$4 sm:$0xff]  }
 0x3e8   :  { %10201 = vmatprep.subr.bf16.mxu1 %v10200_v45  ;;  %v11520_v45 = vld [vmem:[#allocation6 + $0x1210] ss:$8 sps:$4 sm:$0xff]  }
 0x3e9   :  { %4609 = vmatpush1.bf16.msra.mxu0 %v11409_v48  ;;  %v11458_v48 = vld [vmem:[#allocation6 + $0x10d4] ss:$8 sps:$4 sm:$0xff]  }
 0x3ea   :  { %4610 = vmatprep.subr.bf16.mxu0 %v11414_v49  ;;  %v4772_v49 = vld [vmem:[#allocation9 + $0xd0] sm:$0xff] }
 0x3ed   :  { %4611 = vmatpush1.bf16.msra.mxu0 %v11412_v50  ;;  %v4773_v50 = vld [vmem:[#allocation9 + $0xd8] sm:$0xff] }
 0x3ee   :  { %4621 = vmatprep.subr.bf16.mxu0 %v11419_v51  ;;  %v10202_v51 = vpack.c.bf16 %v4755_v47, %v4754_v46  ;;  %v11525_v46 = vld [vmem:[#allocation6 + $0x1224] ss:$8 sps:$4 sm:$0xff]   ;;  %v11523_v47 = vld [vmem:[#allocation6 + $0x1220] ss:$8 sps:$4 sm:$0xff]  }
 0x3f0   :  { %4613 = vmatmul.mubr.bf16.vlgmr.msra.gmra.mrb[0].mxu0 %v8210_v53  ;;  %v11456_v53 = vld [vmem:[#allocation6 + $0x10d0] ss:$8 sps:$4 sm:$0xff]   ;;  %10203 = vmatpush3.bf16.msra.mxu1 %v10202_v51  ;;  %v11529_v51 = vld [vmem:[#allocation6 + $0x1240] ss:$8 sps:$4 sm:$0xff]  }
 0x3f1   :  { %4622 = vmatpush1.bf16.msra.mxu0 %v11417_v54  ;;  %4653 = vmatprep.mubr.bf16.mxu0 %v8213_v55  ;;  %v10204_v54 = vpack.c.bf16 %v4773_v50, %v4772_v49  ;;  %v4756_v55 = vld [vmem:[#allocation9 + $0x50] sm:$0xff]  ;;  %v11531_v50 = vld [vmem:[#allocation6 + $0x1244] ss:$8 sps:$4 sm:$0xff]  }
 0x3f2   :  { %4623 = vmatprep.subr.bf16.mxu0 %v11422_v56  ;;  %v4757_v56 = vld [vmem:[#allocation9 + $0x58] sm:$0xff] }
 0x3f3   :  { %10205 = vmatprep.subr.bf16.mxu1 %v10204_v54  ;;  %v11526_v49 = vld [vmem:[#allocation6 + $0x1230] ss:$8 sps:$4 sm:$0xff]  }
 0x3f4   :  { %v11532_v54 = vld [vmem:[#allocation6 + $0x1250] ss:$8 sps:$4 sm:$0xff]  }
 0x3f5   :  { %4624 = vmatpush1.bf16.msra.mxu0 %v11420_v58  ;;  %v11461_v58 = vld [vmem:[#allocation6 + $0x10e4] ss:$8 sps:$4 sm:$0xff]  }
 0x3f6   :  { %4625 = vmatprep.subr.bf16.mxu0 %v11425_v59  ;;  %v4774_v59 = vld [vmem:[#allocation9 + $0xe0] sm:$0xff] }
 0x3f9   :  { %4626 = vmatpush1.bf16.msra.mxu0 %v11423_v60  ;;  %v4775_v60 = vld [vmem:[#allocation9 + $0xe8] sm:$0xff] }
 0x3fa   :  { %4627 = vmatprep.subr.bf16.mxu0 %v11428_v61  ;;  %v10206_v61 = vpack.c.bf16 %v4757_v56, %v4756_v55  ;;  %v11537_v55 = vld [vmem:[#allocation6 + $0x1264] ss:$8 sps:$4 sm:$0xff]   ;;  %v11540_v56 = vld [vmem:[#allocation6 + $0x1274] ss:$8 sps:$4 sm:$0xff]  }
 0x3fc   :  { %10207 = vmatpush3.bf16.msra.mxu1 %v10206_v61  ;;  %v4777_v61 = vld [vmem:[#allocation9 + $0xf8] sm:$0xff] }
 0x3fd   :  { %4628 = vmatpush1.bf16.msra.mxu0 %v11426_v62  ;;  %v11459_v62 = vld [vmem:[#allocation6 + $0x10e0] ss:$8 sps:$4 sm:$0xff]  }
 0x3fe   :  { %4629 = vmatprep.subr.bf16.mxu0 %v11431_v63  ;;  %v10208_v63 = vpack.c.bf16 %v4775_v60, %v4774_v59  ;;  %v11541_v59 = vld [vmem:[#allocation3 + $0x90] ss:$0 sps:$4 sm:$0xff]   ;;  %v4776_v60 = vld [vmem:[#allocation9 + $0xf0] sm:$0xff] }
 0x400   :  { %10209 = vmatprep.subr.bf16.mxu1 %v10208_v63  ;;  %v4760_v63 = vld [vmem:[#allocation9 + $0x70] sm:$0xff] }
 0x401   :  { %4630 = vmatpush1.bf16.msra.mxu0 %v11429_v1  ;;  %v4758_v1 = vld [vmem:[#allocation9 + $0x60] sm:$0xff] }
 0x402   :  { %4631 = vmatprep.subr.bf16.mxu0 %v11434_v2  ;;  %v4759_v2 = vld [vmem:[#allocation9 + $0x68] sm:$0xff] }
 0x405   :  { %4632 = vmatpush1.bf16.msra.mxu0 %v11432_v3  ;;  %v11464_v3 = vld [vmem:[#allocation6 + $0x10f4] ss:$8 sps:$4 sm:$0xff]  }
 0x406   :  { %4633 = vmatprep.subr.bf16.mxu0 %v11437_v4  ;;  %v10210_v4 = vpack.c.bf16 %v4759_v2, %v4758_v1  ;;  %v4761_v1 = vld [vmem:[#allocation9 + $0x78] sm:$0xff] }
 0x407   :  { %v10214_v2 = vpack.c.bf16 %v4761_v1, %v4760_v63  ;;  %v4869_v1 = vld [vmem:[#allocation12 + $0x70] sm:$0xff] }
 0x408   :  { %10211 = vmatpush3.bf16.msra.mxu1 %v10210_v4  ;;  %v4872_v4 = vld [vmem:[#allocation12 + $0x88] sm:$0xff] }
 0x409   :  { %4634 = vmatpush1.bf16.msra.mxu0 %v11435_v5  ;;  %v11462_v5 = vld [vmem:[#allocation6 + $0x10f0] ss:$8 sps:$4 sm:$0xff]  }
 0x40a   :  { %4635 = vmatprep.subr.bf16.mxu0 %v11440_v6  ;;  %v11469_v6 = vld [vmem:[#allocation6 + $0x1104] ss:$8 sps:$4 sm:$0xff]  }
 0x40d   :  { %4636 = vmatpush1.bf16.msra.mxu0 %v11438_v7  ;;  %v12479_v7 = vld [vmem:[#allocation3 + $0x88] sm:$0xff] }
 0x40e   :  { %4637 = vmatprep.subr.bf16.mxu0 %v11443_v9  ;;  %v8212_v9 = vcombine.low %v12424_v52, %v12424_v52  ;;  %v11476_v52 = vld [vmem:[#allocation6 + $0x1130] ss:$8 sps:$4 sm:$0xff]   ;;  %v8214_v40 = vcombine.low %v12479_v7, %v12479_v7 }
 0x411   :  { %4638 = vmatpush1.bf16.msra.mxu0 %v11441_v10  ;;  %v11467_v10 = vld [vmem:[#allocation6 + $0x1100] ss:$8 sps:$4 sm:$0xff]  }
 0x412   :  { %4639 = vmatprep.subr.bf16.mxu0 %v11446_v11  ;;  %v8215_v11 = vcombine.high %v12479_v7, %v12479_v7 }
 0x415   :  { %4640 = vmatpush1.bf16.msra.mxu0 %v11444_v12  ;;  %v11472_v12 = vld [vmem:[#allocation6 + $0x1114] ss:$8 sps:$4 sm:$0xff]  }
 0x416   :  { %4641 = vmatprep.subr.bf16.mxu0 %v11449_v13  ;;  %v11470_v13 = vld [vmem:[#allocation6 + $0x1110] ss:$8 sps:$4 sm:$0xff]  }
 0x419   :  { %4642 = vmatpush1.bf16.msra.mxu0 %v11447_v27  ;;  %v11494_v27 = vld [vmem:[#allocation6 + $0x1190] ss:$8 sps:$4 sm:$0xff]  }
 0x41a   :  { %4643 = vmatprep.subr.bf16.mxu0 %v11452_v30  ;;  %v11500_v30 = vld [vmem:[#allocation6 + $0x11b0] ss:$8 sps:$4 sm:$0xff]  }
 0x41d   :  { %4644 = vmatpush1.bf16.msra.mxu0 %v11450_v34  ;;  %v11506_v34 = vld [vmem:[#allocation6 + $0x11d0] ss:$8 sps:$4 sm:$0xff]  }
 0x41e   :  { %4645 = vmatprep.subr.bf16.mxu0 %v11455_v38  ;;  %v11512_v38 = vld [vmem:[#allocation6 + $0x11f0] ss:$8 sps:$4 sm:$0xff]  }
 0x421   :  { %4646 = vmatpush1.bf16.msra.mxu0 %v11453_v43  ;;  %v11522_v43 = vld [vmem:[#allocation6 + $0x1214] ss:$8 sps:$4 sm:$0xff]  }
 0x422   :  { %4647 = vmatprep.subr.bf16.mxu0 %v11458_v48  ;;  %v11528_v48 = vld [vmem:[#allocation6 + $0x1234] ss:$8 sps:$4 sm:$0xff]  }
 0x425   :  { %4648 = vmatpush1.bf16.msra.mxu0 %v11456_v53  ;;  %v11534_v53 = vld [vmem:[#allocation6 + $0x1254] ss:$8 sps:$4 sm:$0xff]  }
 0x426   :  { %4649 = vmatprep.subr.bf16.mxu0 %v11461_v58  ;;  %v11538_v58 = vld [vmem:[#allocation6 + $0x1270] ss:$8 sps:$4 sm:$0xff]  }
 0x429   :  { %4650 = vmatpush1.bf16.msra.mxu0 %v11459_v62  ;;  %v10212_v62 = vpack.c.bf16 %v4777_v61, %v4776_v60  ;;  %v4885_v60 = vld [vmem:[#allocation12 + $0xf0] sm:$0xff]  ;;  %v4886_v61 = vld [vmem:[#allocation12 + $0xf8] sm:$0xff] }
 0x42a   :  { %4651 = vmatprep.subr.bf16.mxu0 %v11464_v3  ;;  %v4871_v3 = vld [vmem:[#allocation12 + $0x80] sm:$0xff]  ;;  %v10244_v63 = vpack.c.bf16 %v4886_v61, %v4885_v60 }
 0x42b   :  { %10213 = vmatprep.subr.bf16.mxu1 %v10212_v62  ;;  %v8810_v61 = vld [vmem:[#allocation14] ss:$0 sm:$0xff] }
 0x42c   :  { %10215 = vmatpush3.bf16.msra.mxu1 %v10214_v2  ;;  %v4870_v2 = vld [vmem:[#allocation12 + $0x78] sm:$0xff] }
 0x42d   :  { %4652 = vmatpush1.bf16.msra.mxu0 %v11462_v5  ;;  %v10216_v5 = vpack.c.bf16 %v4872_v4, %v4871_v3  ;;  %v10246_v3 = vpack.c.bf16 %v4870_v2, %v4869_v1  ;;  %v4964_v4 = vld [vmem:[#allocation15] sm:$0xff] }
 0x42e   :  { %4662 = vmatprep.subr.bf16.mxu0 %v11469_v6  ;;  %v865_v6 = vlaneseq }
 0x42f   :  { %10217 = vmatprep.subr.bf16.mxu1 %v10216_v5  ;;  %v4965_v5 = vld [vmem:[#allocation15 + $0x8] sm:$0xff] }
 0x430   :  { %4654 = vmatmul.mubr.bf16.vlgmr.msra.gmra.mrb[0].mxu0 %v8212_v9  ;;  %v12489_v7 = vshrl.u32 %v865_v6, 7 }
 0x431   :  { %4663 = vmatpush1.bf16.msra.mxu0 %v11467_v10  ;;  %4694 = vmatprep.mubr.bf16.mxu0 %v8215_v11  ;;  %v863_v10 = vld [vmem:[#allocation8] sm:$0x3] }
 0x432   :  { %4664 = vmatprep.subr.bf16.mxu0 %v11472_v12  ;;  %v867_v9 = vsub.s32 0, %v12489_v7  ;;  %v871_v11 = vsub.s32 1, %v12489_v7 }
 0x434   :  { %v868_v12 = vrot.slane %v863_v10, %v867_v9  ;;  %v10249_v9 = vpack.c.bf16 %v4965_v5, %v4964_v4  ;;  %v5060_v4 = vld [vmem:[#allocation18] sm:$0xff] }
 0x435   :  { %4665 = vmatpush1.bf16.msra.mxu0 %v11470_v13  ;;  %v872_v13 = vrot.slane %v863_v10, %v871_v11  ;;  %v12044_v10 = vmov 0.0|0.0   ;;  %v4966_v11 = vld [vmem:[#allocation15 + $0x10] sm:$0xff] }
 0x436   :  { %4666 = vmatprep.subr.bf16.mxu0 %v11475_v15  ;;  %v10514_v15 = vadd.f32 %v12420_v42, %v868_v12  ;;  %v4858_v42 = vld [vmem:[#allocation12 + $0x18] sm:$0xff] }
 0x437   :  { %v4967_v12 = vld [vmem:[#allocation15 + $0x18] sm:$0xff] }
 0x439   :  { %4667 = vmatpush1.bf16.msra.mxu0 %v11473_v16  ;;  %v10516_v16 = vadd.f32 %v12422_v44, %v872_v13  ;;  %v4875_v44 = vld [vmem:[#allocation12 + $0xa0] sm:$0xff]  ;;  %v10252_v13 = vpack.c.bf16 %v4967_v12, %v4966_v11  ;;  %v5176_v12 = vld [vmem:[#allocation23] sm:$0xff] }
 0x43a   :  { %4668 = vmatprep.subr.bf16.mxu0 %v11478_v17 }
 0x43d   :  { %4669 = vmatpush1.bf16.msra.mxu0 %v11476_v52 }
 0x43e   :  { %4670 = vmatprep.subr.bf16.mxu0 %v11481_v0 }
 0x441   :  { %4671 = vmatpush1.bf16.msra.mxu0 %v11479_v18  ;;  %v4855_v18 = vld [vmem:[#allocation12] sm:$0xff] }
 0x442   :  { %4672 = vmatprep.subr.bf16.mxu0 %v11484_v19  ;;  %v4856_v19 = vld [vmem:[#allocation12 + $0x8] sm:$0xff] }
 0x445   :  { %4673 = vmatpush1.bf16.msra.mxu0 %v11482_v20 }
 0x446   :  { %4674 = vmatprep.subr.bf16.mxu0 %v11487_v21 }
 0x449   :  { %4675 = vmatpush1.bf16.msra.mxu0 %v11485_v22  ;;  %v4873_v22 = vld [vmem:[#allocation12 + $0x90] sm:$0xff] }
 0x44a   :  { %4676 = vmatprep.subr.bf16.mxu0 %v11490_v23  ;;  %v4874_v23 = vld [vmem:[#allocation12 + $0x98] sm:$0xff] }
 0x44d   :  { %4677 = vmatpush1.bf16.msra.mxu0 %v11488_v8 }
 0x44e   :  { %4678 = vmatprep.subr.bf16.mxu0 %v11493_v24 }
 0x451   :  { %4679 = vmatpush1.bf16.msra.mxu0 %v11491_v25  ;;  %v10218_v25 = vpack.c.bf16 %v4856_v19, %v4855_v18  ;;  %v4971_v18 = vld [vmem:[#allocation15 + $0x38] sm:$0xff] }
 0x452   :  { %4680 = vmatprep.subr.bf16.mxu0 %v11496_v26 }
 0x455   :  { %4681 = vmatpush1.bf16.msra.mxu0 %v11494_v27  ;;  %v10220_v27 = vpack.c.bf16 %v4874_v23, %v4873_v22  ;;  %v4974_v22 = vld [vmem:[#allocation15 + $0x50] sm:$0xff]  ;;  %v4975_v23 = vld [vmem:[#allocation15 + $0x58] sm:$0xff] }
 0x456   :  { %4682 = vmatprep.subr.bf16.mxu0 %v11499_v28  ;;  %v4857_v28 = vld [vmem:[#allocation12 + $0x10] sm:$0xff] }
 0x459   :  { %4683 = vmatpush1.bf16.msra.mxu0 %v11497_v29  ;;  %v4876_v29 = vld [vmem:[#allocation12 + $0xa8] sm:$0xff] }
 0x45a   :  { %4684 = vmatprep.subr.bf16.mxu0 %v11502_v14  ;;  %v10222_v14 = vpack.c.bf16 %v4858_v42, %v4857_v28  ;;  %v4979_v28 = vld [vmem:[#allocation15 + $0x78] sm:$0xff] }
 0x45d   :  { %4685 = vmatpush1.bf16.msra.mxu0 %v11500_v30  ;;  %v10224_v30 = vpack.c.bf16 %v4876_v29, %v4875_v44  ;;  %v12046_v44 = vmov 0.0  }
 0x45e   :  { %4686 = vmatprep.subr.bf16.mxu0 %v11505_v31  ;;  %v4859_v31 = vld [vmem:[#allocation12 + $0x20] sm:$0xff]  ;;  %5069 = vst [vmem:[#allocation2] sm:$0xff] %v12046_v44  ;;  %5070 = vst [vmem:[#allocation2 + $0x8] sm:$0xff] %v12046_v44 }
 0x45f   :  { %5071 = vst [vmem:[#allocation2 + $0x10] sm:$0xff] %v12046_v44  ;;  %5072 = vst [vmem:[#allocation2 + $0x18] sm:$0xff] %v12046_v44 }
 0x460   :  { %5073 = vst [vmem:[#allocation2 + $0x20] sm:$0xff] %v12046_v44 }
 0x461   :  { %4687 = vmatpush1.bf16.msra.mxu0 %v11503_v32  ;;  %v4860_v32 = vld [vmem:[#allocation12 + $0x28] sm:$0xff] }
 0x462   :  { %4688 = vmatprep.subr.bf16.mxu0 %v11508_v33  ;;  %v4877_v33 = vld [vmem:[#allocation12 + $0xb0] sm:$0xff] }
 0x465   :  { %4689 = vmatpush1.bf16.msra.mxu0 %v11506_v34  ;;  %v4878_v34 = vld [vmem:[#allocation12 + $0xb8] sm:$0xff] }
 0x466   :  { %4690 = vmatprep.subr.bf16.mxu0 %v11511_v35  ;;  %v10226_v35 = vpack.c.bf16 %v4860_v32, %v4859_v31  ;;  %v8809_v31 = vld [vmem:[#allocation11] ss:$0 sm:$0xff] }
 0x469   :  { %4691 = vmatpush1.bf16.msra.mxu0 %v11509_v36  ;;  %v10228_v36 = vpack.c.bf16 %v4878_v34, %v4877_v33 }
 0x46a   :  { %4692 = vmatprep.subr.bf16.mxu0 %v11514_v37  ;;  %v4861_v37 = vld [vmem:[#allocation12 + $0x30] sm:$0xff] }
 0x46d   :  { %4693 = vmatpush1.bf16.msra.mxu0 %v11512_v38  ;;  %v4862_v38 = vld [vmem:[#allocation12 + $0x38] sm:$0xff] }
 0x46e   :  { %4703 = vmatprep.subr.bf16.mxu0 %v11519_v39  ;;  %v4879_v39 = vld [vmem:[#allocation12 + $0xc0] sm:$0xff] }
 0x470   :  { %4695 = vmatmul.mubr.bf16.vlgmr.msra.gmra.mrb[0].mxu0 %v8214_v40  ;;  %v4880_v40 = vld [vmem:[#allocation12 + $0xc8] sm:$0xff] }
 0x471   :  { %4704 = vmatpush1.bf16.msra.mxu0 %v11517_v41  ;;  %4735 = vmatprep.mubr.bf16.mxu0 %v12043_v57  ;;  %v11535_v57 = vld [vmem:[#allocation6 + $0x1260] ss:$8 sps:$4 sm:$0xff]   ;;  %v10230_v41 = vpack.c.bf16 %v4862_v38, %v4861_v37 }
 0x472   :  { %4705 = vmatprep.subr.bf16.mxu0 %v11522_v43  ;;  %v10232_v43 = vpack.c.bf16 %v4880_v40, %v4879_v39  ;;  %v5080_v37 = vld [vmem:[#allocation20 + $0x18] sm:$0xff]  ;;  %v5081_v39 = vld [vmem:[#allocation20 + $0x20] sm:$0xff]  ;;  %v5082_v40 = vld [vmem:[#allocation20 + $0x28] sm:$0xff] }
 0x475   :  { %4706 = vmatpush1.bf16.msra.mxu0 %v11520_v45  ;;  %v4863_v45 = vld [vmem:[#allocation12 + $0x40] sm:$0xff] }
 0x476   :  { %4707 = vmatprep.subr.bf16.mxu0 %v11525_v46  ;;  %v4864_v46 = vld [vmem:[#allocation12 + $0x48] sm:$0xff] }
 0x479   :  { %4708 = vmatpush1.bf16.msra.mxu0 %v11523_v47  ;;  %v4881_v47 = vld [vmem:[#allocation12 + $0xd0] sm:$0xff] }
 0x47a   :  { %4709 = vmatprep.subr.bf16.mxu0 %v11528_v48  ;;  %v4882_v48 = vld [vmem:[#allocation12 + $0xd8] sm:$0xff] }
 0x47d   :  { %4710 = vmatpush1.bf16.msra.mxu0 %v11526_v49  ;;  %v10234_v49 = vpack.c.bf16 %v4864_v46, %v4863_v45  ;;  %v5084_v45 = vld [vmem:[#allocation20 + $0x38] sm:$0xff] }
 0x47e   :  { %4711 = vmatprep.subr.bf16.mxu0 %v11531_v50  ;;  %v10236_v50 = vpack.c.bf16 %v4882_v48, %v4881_v47  ;;  %v5085_v47 = vld [vmem:[#allocation20 + $0x40] sm:$0xff]  ;;  %v5086_v48 = vld [vmem:[#allocation20 + $0x48] sm:$0xff] }
 0x481   :  { %4712 = vmatpush1.bf16.msra.mxu0 %v11529_v51  ;;  %v4865_v51 = vld [vmem:[#allocation12 + $0x50] sm:$0xff] }
 0x482   :  { %4713 = vmatprep.subr.bf16.mxu0 %v11534_v53  ;;  %v4866_v53 = vld [vmem:[#allocation12 + $0x58] sm:$0xff] }
 0x485   :  { %4714 = vmatpush1.bf16.msra.mxu0 %v11532_v54  ;;  %v4883_v54 = vld [vmem:[#allocation12 + $0xe0] sm:$0xff] }
 0x486   :  { %4715 = vmatprep.subr.bf16.mxu0 %v11537_v55  ;;  %v4884_v55 = vld [vmem:[#allocation12 + $0xe8] sm:$0xff] }
 0x489   :  { %4716 = vmatpush1.bf16.msra.mxu0 %v11535_v57  ;;  %v10238_v57 = vpack.c.bf16 %v4866_v53, %v4865_v51  ;;  %v5088_v51 = vld [vmem:[#allocation20 + $0x58] sm:$0xff] }
 0x48a   :  { %4717 = vmatprep.subr.bf16.mxu0 %v11540_v56  ;;  %v10240_v56 = vpack.c.bf16 %v4884_v55, %v4883_v54  ;;  %v5089_v54 = vld [vmem:[#allocation20 + $0x60] sm:$0xff]  ;;  %v5090_v55 = vld [vmem:[#allocation20 + $0x68] sm:$0xff] }
 0x48d   :  { %4718 = vmatpush1.bf16.msra.mxu0 %v11538_v58  ;;  %v4867_v58 = vld [vmem:[#allocation12 + $0x60] sm:$0xff] }
 0x490   :  { %4736 = vmatmul.mubr.bf16.vlgmr.msra.gmra.mrb[0].mxu0 %v11541_v59  ;;  %v4868_v59 = vld [vmem:[#allocation12 + $0x68] sm:$0xff] }
 0x491   :  { %v10242_v62 = vpack.c.bf16 %v4868_v59, %v4867_v58  ;;  %v5092_v58 = vld [vmem:[#allocation20 + $0x78] sm:$0xff] }
 0x563   :  { %v4737_v17 = vpop.f32.mrb[0].mxu0 }
 0x564   :  { %v12495_v52 = vadd.f32 %v10514_v15, %v4737_v17  ;;  %v4739_v0 = vpop.f32.mrb[1].mxu0  ;;  %v4968_v15 = vld [vmem:[#allocation15 + $0x20] sm:$0xff] }
 0x565   :  { %v10517_v20 = vadd.f32 %v10516_v16, %v4739_v0  ;;  %v4741_v21 = vpop.f32.mrb[2].mxu0  ;;  %v4969_v16 = vld [vmem:[#allocation15 + $0x28] sm:$0xff]  ;;  %v4970_v0 = vld [vmem:[#allocation15 + $0x30] sm:$0xff] }
 0x566   :  { %v4742_v8 = vpop.f32.mrb[3].mxu0  ;;  %v4744_v26 = vmax.f32 %v12495_v52, 0.0  ;;  %v10255_v17 = vpack.c.bf16 %v4969_v16, %v4968_v15  ;;  %v10258_v19 = vpack.c.bf16 %v4971_v18, %v4970_v0  ;;  %v4973_v21 = vld [vmem:[#allocation15 + $0x48] sm:$0xff]  ;;  %v5178_v16 = vld [vmem:[#allocation23 + $0x10] sm:$0xff]  ;;  %v5180_v18 = vld [vmem:[#allocation23 + $0x20] sm:$0xff] }
 0x567   :  { %v4745_v24 = vmax.f32 %v10517_v20, 0.0  ;;  %v4972_v20 = vld [vmem:[#allocation15 + $0x40] sm:$0xff]  ;;  %v10264_v8 = vpack.c.bf16 %v4975_v23, %v4974_v22  ;;  %v5184_v23 = vld [vmem:[#allocation23 + $0x40] sm:$0xff] }
 0x568   :  { %v10261_v52 = vpack.c.bf16 %v4973_v21, %v4972_v20  ;;  %v5182_v21 = vld [vmem:[#allocation23 + $0x30] sm:$0xff] }
 0x569   :  { %4849 = vmatprep.mubr.f32.mxu1 %v4745_v24 }
 0x56a   :  { %4850 = vmatmul.mubr.f32.vlgmr.msra.gmra.mrb[4].mxu1 %v4744_v26 }
 0x56b   :  { %10219 = vmatpush3.bf16.msra.mxu1 %v10218_v25  ;;  %4958 = vmatprep.mubr.f32.mxu1 %v4745_v24  ;;  %v4976_v24 = vld [vmem:[#allocation15 + $0x60] sm:$0xff]  ;;  %v4977_v25 = vld [vmem:[#allocation15 + $0x68] sm:$0xff] }
 0x56c   :  { %10221 = vmatprep.subr.bf16.mxu1 %v10220_v27  ;;  %v4978_v27 = vld [vmem:[#allocation15 + $0x70] sm:$0xff] }
 0x56d   :  { %v10270_v42 = vpack.c.bf16 %v4979_v28, %v4978_v27  ;;  %v5188_v28 = vld [vmem:[#allocation23 + $0x60] sm:$0xff] }
 0x56f   :  { %10223 = vmatpush3.bf16.msra.mxu1 %v10222_v14  ;;  %v5077_v14 = vld [vmem:[#allocation20] sm:$0xff] }
 0x570   :  { %10225 = vmatprep.subr.bf16.mxu1 %v10224_v30  ;;  %v5078_v30 = vld [vmem:[#allocation20 + $0x8] sm:$0xff] }
 0x571   :  { %v10273_v34 = vpack.c.bf16 %v5078_v30, %v5077_v14  ;;  %v5191_v30 = vld [vmem:[#allocation23 + $0x78] sm:$0xff] }
 0x573   :  { %10227 = vmatpush3.bf16.msra.mxu1 %v10226_v35 }
 0x574   :  { %10229 = vmatprep.subr.bf16.mxu1 %v10228_v36  ;;  %v5079_v36 = vld [vmem:[#allocation20 + $0x10] sm:$0xff] }
 0x575   :  { %v10276_v38 = vpack.c.bf16 %v5080_v37, %v5079_v36  ;;  %v8812_v36 = vld [vmem:[#allocation21] ss:$0 sm:$0xff] }
 0x577   :  { %10231 = vmatpush3.bf16.msra.mxu1 %v10230_v41  ;;  %v10279_v41 = vpack.c.bf16 %v5082_v40, %v5081_v39 }
 0x578   :  { %10233 = vmatprep.subr.bf16.mxu1 %v10232_v43  ;;  %v5083_v43 = vld [vmem:[#allocation20 + $0x30] sm:$0xff] }
 0x579   :  { %v10282_v46 = vpack.c.bf16 %v5084_v45, %v5083_v43  ;;  %v5343_v45 = vld [vmem:[#allocation20 + $0x80] sm:$0xff] }
 0x57b   :  { %10235 = vmatpush3.bf16.msra.mxu1 %v10234_v49  ;;  %v10285_v49 = vpack.c.bf16 %v5086_v48, %v5085_v47  ;;  %v5345_v48 = vld [vmem:[#allocation20 + $0x90] sm:$0xff] }
 0x57c   :  { %10237 = vmatprep.subr.bf16.mxu1 %v10236_v50  ;;  %v5087_v50 = vld [vmem:[#allocation20 + $0x50] sm:$0xff] }
 0x57d   :  { %v10288_v53 = vpack.c.bf16 %v5088_v51, %v5087_v50 }
 0x57f   :  { %10239 = vmatpush3.bf16.msra.mxu1 %v10238_v57  ;;  %v10291_v57 = vpack.c.bf16 %v5090_v55, %v5089_v54  ;;  %v5348_v54 = vld [vmem:[#allocation20 + $0xa8] sm:$0xff] }
 0x580   :  { %10241 = vmatprep.subr.bf16.mxu1 %v10240_v56  ;;  %v5091_v56 = vld [vmem:[#allocation20 + $0x70] sm:$0xff] }
 0x581   :  { %v10294_v59 = vpack.c.bf16 %v5092_v58, %v5091_v56  ;;  %v5350_v56 = vld [vmem:[#allocation20 + $0xb8] sm:$0xff] }
 0x583   :  { %10243 = vmatpush3.bf16.msra.mxu1 %v10242_v62 }
 0x584   :  { %10245 = vmatprep.subr.bf16.mxu1 %v10244_v63 }
 0x587   :  { %10247 = vmatpush3.bf16.msra.mxu1 %v10246_v3 }
 0x588   :  { %10248 = vmatprep.subr.bf16.mxu1 %v12044_v10 }
 0x58a   :  { %4959 = vmatmul.mubr.f32.vlgmr.msra.gmra.mrb[6].mxu1 %v4744_v26  ;;  %v10267_v26 = vpack.c.bf16 %v4977_v25, %v4976_v24  ;;  %v5186_v25 = vld [vmem:[#allocation23 + $0x50] sm:$0xff] }
 0x58b   :  { %10250 = vmatpush3.bf16.msra.mxu1 %v10249_v9  ;;  %9701 = vmatprep.mubr.msk.f32.mxu1 %vm12045_vm0, %v12046_v44 }
 0x58c   :  { %10251 = vmatprep.subr.bf16.mxu1 %v12044_v10 }
 0x58f   :  { %10253 = vmatpush3.bf16.msra.mxu1 %v10252_v13  ;;  %v5177_v13 = vld [vmem:[#allocation23 + $0x8] sm:$0xff] }
 0x590   :  { %10254 = vmatprep.subr.bf16.mxu1 %v12044_v10  ;;  %v10297_v15 = vpack.c.bf16 %v5177_v13, %v5176_v12  ;;  %v5444_v13 = vld [vmem:[#allocation23 + $0x80] sm:$0xff] }
 0x593   :  { %10256 = vmatpush3.bf16.msra.mxu1 %v10255_v17  ;;  %v5179_v17 = vld [vmem:[#allocation23 + $0x18] sm:$0xff] }
 0x594   :  { %10257 = vmatprep.subr.bf16.mxu1 %v12044_v10  ;;  %v10300_v0 = vpack.c.bf16 %v5179_v17, %v5178_v16  ;;  %v5446_v17 = vld [vmem:[#allocation23 + $0x90] sm:$0xff] }
 0x597   :  { %10259 = vmatpush3.bf16.msra.mxu1 %v10258_v19  ;;  %v5181_v19 = vld [vmem:[#allocation23 + $0x28] sm:$0xff] }
 0x598   :  { %10260 = vmatprep.subr.bf16.mxu1 %v12044_v10  ;;  %v10303_v20 = vpack.c.bf16 %v5181_v19, %v5180_v18  ;;  %v5448_v19 = vld [vmem:[#allocation23 + $0xa0] sm:$0xff] }
 0x59b   :  { %10262 = vmatpush3.bf16.msra.mxu1 %v10261_v52  ;;  %v5183_v52 = vld [vmem:[#allocation23 + $0x38] sm:$0xff] }
 0x59c   :  { %10263 = vmatprep.subr.bf16.mxu1 %v12044_v10  ;;  %v10306_v22 = vpack.c.bf16 %v5183_v52, %v5182_v21  ;;  %v5450_v52 = vld [vmem:[#allocation23 + $0xb0] sm:$0xff] }
 0x59f   :  { %10265 = vmatpush3.bf16.msra.mxu1 %v10264_v8  ;;  %v5185_v8 = vld [vmem:[#allocation23 + $0x48] sm:$0xff] }
 0x5a0   :  { %10266 = vmatprep.subr.bf16.mxu1 %v12044_v10  ;;  %v10309_v24 = vpack.c.bf16 %v5185_v8, %v5184_v23  ;;  %v5452_v8 = vld [vmem:[#allocation23 + $0xc0] sm:$0xff] }
 0x5a3   :  { %10268 = vmatpush3.bf16.msra.mxu1 %v10267_v26  ;;  %v5187_v26 = vld [vmem:[#allocation23 + $0x58] sm:$0xff] }
 0x5a4   :  { %10269 = vmatprep.subr.bf16.mxu1 %v12044_v10  ;;  %v10312_v27 = vpack.c.bf16 %v5187_v26, %v5186_v25  ;;  %v5454_v26 = vld [vmem:[#allocation23 + $0xd0] sm:$0xff] }
 0x5a7   :  { %10271 = vmatpush3.bf16.msra.mxu1 %v10270_v42  ;;  %v5189_v42 = vld [vmem:[#allocation23 + $0x68] sm:$0xff] }
 0x5a8   :  { %10272 = vmatprep.subr.bf16.mxu1 %v12044_v10  ;;  %v10315_v14 = vpack.c.bf16 %v5189_v42, %v5188_v28  ;;  %v5456_v42 = vld [vmem:[#allocation23 + $0xe0] sm:$0xff] }
 0x63d   :  { %v9359_v29 = vpop.f32.mrb[4].mxu1 }
 0x63e   :  { %v9360_v32 = vpop.f32.mrb[5].mxu1 }
 0x63f   :  { %v9361_v33 = vadd.f32 %v9360_v32, %v9359_v29  ;;  %v5190_v29 = vld [vmem:[#allocation23 + $0x70] sm:$0xff] }
 0x640   :  { %v8811_v32 = vld [vmem:[#allocation17] ss:$0 sm:$0xff] }
 0x641   :  { %v4852_v35 = vadd.f32 %v9361_v33, %v8809_v31  ;;  %v10318_v31 = vpack.c.bf16 %v5191_v30, %v5190_v29  ;;  %v5457_v29 = vld [vmem:[#allocation23 + $0xe8] sm:$0xff] }
 0x642   :  { %v10363_v30 = vpack.c.bf16 %v5457_v29, %v5456_v42  ;;  %v5714_v42 = vld [vmem:[#allocation23 + $0x108] sm:$0xff] }
 0x643   :  { %5057 = vst [vmem:[#allocation27] sm:$0xff] %v4852_v35  ;;  %9702 = vmatmul.mubr.f32.vlgmr.msra.gmra.mrb[8].mxu1 %v4852_v35 }
 0x644   :  { %10274 = vmatpush3.bf16.msra.mxu1 %v10273_v34  ;;  %9736 = vmatprep.mubr.msk.f32.mxu1 %vm12045_vm0, %v12046_v44 }
 0x645   :  { %10275 = vmatprep.subr.bf16.mxu1 %v12044_v10 }
 0x648   :  { %10277 = vmatpush3.bf16.msra.mxu1 %v10276_v38 }
 0x649   :  { %10278 = vmatprep.subr.bf16.mxu1 %v12044_v10 }
 0x64c   :  { %10280 = vmatpush3.bf16.msra.mxu1 %v10279_v41 }
 0x64d   :  { %10281 = vmatprep.subr.bf16.mxu1 %v12044_v10 }
 0x650   :  { %10283 = vmatpush3.bf16.msra.mxu1 %v10282_v46  ;;  %v5344_v46 = vld [vmem:[#allocation20 + $0x88] sm:$0xff] }
 0x651   :  { %10284 = vmatprep.subr.bf16.mxu1 %v12044_v10  ;;  %v10321_v47 = vpack.c.bf16 %v5344_v46, %v5343_v45 }
 0x654   :  { %10286 = vmatpush3.bf16.msra.mxu1 %v10285_v49  ;;  %v5346_v49 = vld [vmem:[#allocation20 + $0x98] sm:$0xff] }
 0x655   :  { %10287 = vmatprep.subr.bf16.mxu1 %v12044_v10  ;;  %v10324_v51 = vpack.c.bf16 %v5346_v49, %v5345_v48 }
 0x658   :  { %10289 = vmatpush3.bf16.msra.mxu1 %v10288_v53  ;;  %v5347_v53 = vld [vmem:[#allocation20 + $0xa0] sm:$0xff] }
 0x659   :  { %10290 = vmatprep.subr.bf16.mxu1 %v12044_v10  ;;  %v10327_v55 = vpack.c.bf16 %v5348_v54, %v5347_v53 }
 0x65c   :  { %10292 = vmatpush3.bf16.msra.mxu1 %v10291_v57  ;;  %v5349_v57 = vld [vmem:[#allocation20 + $0xb0] sm:$0xff] }
 0x65d   :  { %v9394_v60 = vpop.f32.mrb[6].mxu1  ;;  %10293 = vmatprep.subr.bf16.mxu1 %v12044_v10  ;;  %v10330_v58 = vpack.c.bf16 %v5350_v56, %v5349_v57 }
 0x65e   :  { %v9395_v62 = vpop.f32.mrb[7].mxu1 }
 0x65f   :  { %v9396_v63 = vadd.f32 %v9395_v62, %v9394_v60  ;;  %v5352_v60 = vld [vmem:[#allocation20 + $0xc8] sm:$0xff]  ;;  %v5353_v62 = vld [vmem:[#allocation20 + $0xd0] sm:$0xff] }
 0x660   :  { %10295 = vmatpush3.bf16.msra.mxu1 %v10294_v59  ;;  %v5351_v59 = vld [vmem:[#allocation20 + $0xc0] sm:$0xff] }
 0x661   :  { %v4961_v1 = vadd.f32 %v9396_v63, %v8810_v61  ;;  %10296 = vmatprep.subr.bf16.mxu1 %v12044_v10  ;;  %v10333_v61 = vpack.c.bf16 %v5352_v60, %v5351_v59  ;;  %v5354_v63 = vld [vmem:[#allocation20 + $0xd8] sm:$0xff] }
 0x663   :  { %v5061_v2 = vmul.f32 0.5, %v4961_v1  ;;  %5058 = vst [vmem:[#allocation28] sm:$0xff] %v4961_v1  ;;  %v10336_v1 = vpack.c.bf16 %v5354_v63, %v5353_v62  ;;  %v5612_v63 = vld [vmem:[#allocation20 + $0x100] sm:$0xff] }
 0x665   :  { %v5062_v3 = vmul.f32 1.442695, %v5061_v2  ;;  %v5355_v2 = vld [vmem:[#allocation20 + $0xe0] sm:$0xff] }
 0x667   :  { %11542 = vpow2.f32 %v5062_v3  ;;  %v5356_v3 = vld [vmem:[#allocation20 + $0xe8] sm:$0xff] }
 0x671   :  { %v11543_v5 = vpop.eup %11542 }
 0x672   :  { %v5064_v9 = vmul.f32 %v11543_v5, %v5060_v4  ;;  %v10339_v4 = vpack.c.bf16 %v5356_v3, %v5355_v2  ;;  %v5357_v5 = vld [vmem:[#allocation20 + $0xf0] sm:$0xff] }
 0x673   :  { %v5614_v3 = vld [vmem:[#allocation20 + $0x110] sm:$0xff] }
 0x674   :  { %v12528_v11 = vadd.f32 %v5064_v9, %v4852_v35  ;;  %v5358_v9 = vld [vmem:[#allocation20 + $0xf8] sm:$0xff] }
 0x675   :  { %v10342_v12 = vpack.c.bf16 %v5358_v9, %v5357_v5 }
 0x676   :  { %9737 = vmatmul.mubr.f32.vlgmr.msra.gmra.mrb[10].mxu1 %v12528_v11 }
 0x677   :  { %9771 = vmatprep.mubr.msk.f32.mxu1 %vm12045_vm0, %v12046_v44  ;;  %10298 = vmatpush3.bf16.msra.mxu1 %v10297_v15  ;;  %v5445_v15 = vld [vmem:[#allocation23 + $0x88] sm:$0xff] }
 0x678   :  { %10299 = vmatprep.subr.bf16.mxu1 %v12044_v10  ;;  %v10345_v16 = vpack.c.bf16 %v5445_v15, %v5444_v13  ;;  %v5617_v13 = vld [vmem:[#allocation20 + $0x128] sm:$0xff] }
 0x67b   :  { %10301 = vmatpush3.bf16.msra.mxu1 %v10300_v0  ;;  %v5447_v0 = vld [vmem:[#allocation23 + $0x98] sm:$0xff] }
 0x67c   :  { %10302 = vmatprep.subr.bf16.mxu1 %v12044_v10  ;;  %v10348_v18 = vpack.c.bf16 %v5447_v0, %v5446_v17  ;;  %v5619_v17 = vld [vmem:[#allocation20 + $0x138] sm:$0xff] }
 0x67f   :  { %10304 = vmatpush3.bf16.msra.mxu1 %v10303_v20  ;;  %v5449_v20 = vld [vmem:[#allocation23 + $0xa8] sm:$0xff] }
 0x680   :  { %10305 = vmatprep.subr.bf16.mxu1 %v12044_v10  ;;  %v10351_v21 = vpack.c.bf16 %v5449_v20, %v5448_v19  ;;  %v5621_v19 = vld [vmem:[#allocation20 + $0x148] sm:$0xff] }
 0x683   :  { %10307 = vmatpush3.bf16.msra.mxu1 %v10306_v22  ;;  %v5451_v22 = vld [vmem:[#allocation23 + $0xb8] sm:$0xff] }
 0x684   :  { %10308 = vmatprep.subr.bf16.mxu1 %v12044_v10  ;;  %v10354_v23 = vpack.c.bf16 %v5451_v22, %v5450_v52  ;;  %v5623_v52 = vld [vmem:[#allocation20 + $0x158] sm:$0xff] }
 0x687   :  { %10310 = vmatpush3.bf16.msra.mxu1 %v10309_v24  ;;  %v5453_v24 = vld [vmem:[#allocation23 + $0xc8] sm:$0xff] }
 0x688   :  { %10311 = vmatprep.subr.bf16.mxu1 %v12044_v10  ;;  %v10357_v25 = vpack.c.bf16 %v5453_v24, %v5452_v8  ;;  %v5625_v8 = vld [vmem:[#allocation20 + $0x168] sm:$0xff] }
 0x68b   :  { %10313 = vmatpush3.bf16.msra.mxu1 %v10312_v27  ;;  %v5455_v27 = vld [vmem:[#allocation23 + $0xd8] sm:$0xff] }
 0x68c   :  { %10314 = vmatprep.subr.bf16.mxu1 %v12044_v10  ;;  %v10360_v28 = vpack.c.bf16 %v5455_v27, %v5454_v26  ;;  %v5627_v26 = vld [vmem:[#allocation20 + $0x178] sm:$0xff] }
 0x68f   :  { %10316 = vmatpush3.bf16.msra.mxu1 %v10315_v14  ;;  %v5458_v14 = vld [vmem:[#allocation23 + $0xf0] sm:$0xff] }
 0x690   :  { %10317 = vmatprep.subr.bf16.mxu1 %v12044_v10 }
 0x693   :  { %10319 = vmatpush3.bf16.msra.mxu1 %v10318_v31  ;;  %v5459_v31 = vld [vmem:[#allocation23 + $0xf8] sm:$0xff] }
 0x694   :  { %10320 = vmatprep.subr.bf16.mxu1 %v12044_v10 }
 0x716   :  { %v5053_v33 = vpop.f32.mrb[8].mxu1 }
 0x717   :  { %v5054_v34 = vadd.f32 %v8811_v32, %v5053_v33  ;;  %v9703_v35 = vpop.f32.mrb[9].mxu1  ;;  %v10366_v32 = vpack.c.bf16 %v5459_v31, %v5458_v14  ;;  %v8814_v33 = vld [vmem:[#allocation24] ss:$0 sm:$0xff]  ;;  %v5715_v14 = vld [vmem:[#allocation23 + $0x110] sm:$0xff] }
 0x719   :  { %5059 = vst [vmem:[#allocation30] sm:$0xff] %v5054_v34 }
 0x749   :  { %v5166_v37 = vpop.f32.mrb[10].mxu1 }
 0x74a   :  { %v5167_v38 = vadd.f32 %v8812_v36, %v5166_v37  ;;  %v9738_v39 = vpop.f32.mrb[11].mxu1 }
 0x74c   :  { %v8813_v40 = vmul.f32 -1.442695, %v5167_v38 }
 0x74e   :  { %11544 = vpow2.f32 %v8813_v40  ;;  %v12047_v40 = vmov 1966171168  }
 0x758   :  { %v11545_v41 = vpop.eup %11544 }
 0x759   :  { %v5173_v43 = vadd.f32 1.0, %v11545_v41  ;;  %v5279_v41 = vunpack.c.l.s4 %v12047_v40 }
 0x75b   :  { %11546 = vrcp.f32 %v5173_v43  ;;  %v12563_v43 = vand.u32 127, %v865_v6  ;;  %v5280_v45 = vunpack.c.0.s8 %v5279_v41  ;;  %v5723_v41 = vld [vmem:[#allocation23 + $0x150] sm:$0xff] }
 0x75d   :  { %vm5068_vm1 = vcmp.lt.s32.totalorder %v12563_v43, 68  ;;  %v12567_v46 = vsub.s32 %v5280_v45, %v12489_v7  ;;  %v5724_v45 = vld [vmem:[#allocation23 + $0x158] sm:$0xff] }
 0x765   :  { %v11547_v50 = vpop.eup %11546 }
 0x766   :  { %9772 = vmatmul.mubr.f32.vlgmr.msra.gmra.mrb[12].mxu1 %v11547_v50 }
 0x767   :  { %10322 = vmatpush3.bf16.msra.mxu1 %v10321_v47  ;;  %9806 = vmatprep.mubr.msk.f32.mxu1 %vm12045_vm0, %v12046_v44 }
 0x768   :  { %10323 = vmatprep.subr.bf16.mxu1 %v12044_v10 }
 0x76b   :  { %10325 = vmatpush3.bf16.msra.mxu1 %v10324_v51  ;;  %v8820_v51 = vld [vmem:[#allocation21 + $0x1] ss:$0 sm:$0xff] }
 0x76c   :  { %10326 = vmatprep.subr.bf16.mxu1 %v12044_v10 }
 0x76f   :  { %10328 = vmatpush3.bf16.msra.mxu1 %v10327_v55 }
 0x770   :  { %10329 = vmatprep.subr.bf16.mxu1 %v12044_v10 }
 0x773   :  { %10331 = vmatpush3.bf16.msra.mxu1 %v10330_v58 }
 0x774   :  { %10332 = vmatprep.subr.bf16.mxu1 %v12044_v10 }
 0x777   :  { %10334 = vmatpush3.bf16.msra.mxu1 %v10333_v61 }
 0x778   :  { %10335 = vmatprep.subr.bf16.mxu1 %v12044_v10 }
 0x77b   :  { %10337 = vmatpush3.bf16.msra.mxu1 %v10336_v1  ;;  %v5613_v1 = vld [vmem:[#allocation20 + $0x108] sm:$0xff] }
 0x77c   :  { %10338 = vmatprep.subr.bf16.mxu1 %v12044_v10  ;;  %v10369_v2 = vpack.c.bf16 %v5613_v1, %v5612_v63  ;;  %v8828_v1 = vld [vmem:[#allocation21 + $0x2] ss:$0 sm:$0xff] }
 0x77f   :  { %10340 = vmatpush3.bf16.msra.mxu1 %v10339_v4  ;;  %v5615_v4 = vld [vmem:[#allocation20 + $0x118] sm:$0xff] }
 0x780   :  { %10341 = vmatprep.subr.bf16.mxu1 %v12044_v10  ;;  %v10372_v9 = vpack.c.bf16 %v5615_v4, %v5614_v3 }
 0x783   :  { %10343 = vmatpush3.bf16.msra.mxu1 %v10342_v12  ;;  %v5616_v12 = vld [vmem:[#allocation20 + $0x120] sm:$0xff] }
 0x784   :  { %10344 = vmatprep.subr.bf16.mxu1 %v12044_v10  ;;  %v10375_v15 = vpack.c.bf16 %v5617_v13, %v5616_v12 }
 0x786   :  { %9807 = vmatmul.mubr.f32.vlgmr.msra.gmra.mrb[14].mxu1 %v12528_v11 }
 0x787   :  { %9841 = vmatprep.mubr.msk.f32.mxu1 %vm12045_vm0, %v12046_v44  ;;  %10346 = vmatpush3.bf16.msra.mxu1 %v10345_v16  ;;  %v5618_v16 = vld [vmem:[#allocation20 + $0x130] sm:$0xff] }
 0x788   :  { %10347 = vmatprep.subr.bf16.mxu1 %v12044_v10  ;;  %v10378_v0 = vpack.c.bf16 %v5619_v17, %v5618_v16 }
 0x78b   :  { %10349 = vmatpush3.bf16.msra.mxu1 %v10348_v18  ;;  %v5620_v18 = vld [vmem:[#allocation20 + $0x140] sm:$0xff] }
 0x78c   :  { %10350 = vmatprep.subr.bf16.mxu1 %v12044_v10  ;;  %v10381_v20 = vpack.c.bf16 %v5621_v19, %v5620_v18  ;;  %v5881_v19 = vld [vmem:[#allocation20 + $0x180] sm:$0xff] }
 0x78f   :  { %10352 = vmatpush3.bf16.msra.mxu1 %v10351_v21  ;;  %v5622_v21 = vld [vmem:[#allocation20 + $0x150] sm:$0xff] }
 0x790   :  { %10353 = vmatprep.subr.bf16.mxu1 %v12044_v10  ;;  %v10384_v22 = vpack.c.bf16 %v5623_v52, %v5622_v21  ;;  %v5883_v52 = vld [vmem:[#allocation20 + $0x190] sm:$0xff] }
 0x793   :  { %10355 = vmatpush3.bf16.msra.mxu1 %v10354_v23  ;;  %v5624_v23 = vld [vmem:[#allocation20 + $0x160] sm:$0xff] }
 0x794   :  { %10356 = vmatprep.subr.bf16.mxu1 %v12044_v10  ;;  %v10387_v24 = vpack.c.bf16 %v5625_v8, %v5624_v23 }
 0x797   :  { %10358 = vmatpush3.bf16.msra.mxu1 %v10357_v25  ;;  %v5626_v25 = vld [vmem:[#allocation20 + $0x170] sm:$0xff] }
 0x798   :  { %10359 = vmatprep.subr.bf16.mxu1 %v12044_v10  ;;  %v10390_v27 = vpack.c.bf16 %v5627_v26, %v5626_v25  ;;  %v5886_v25 = vld [vmem:[#allocation20 + $0x1a8] sm:$0xff] }
 0x79b   :  { %10361 = vmatpush3.bf16.msra.mxu1 %v10360_v28  ;;  %v5713_v28 = vld [vmem:[#allocation23 + $0x100] sm:$0xff] }
 0x79c   :  { %10362 = vmatprep.subr.bf16.mxu1 %v12044_v10  ;;  %v10393_v29 = vpack.c.bf16 %v5714_v42, %v5713_v28  ;;  %v5888_v28 = vld [vmem:[#allocation20 + $0x1b8] sm:$0xff] }
 0x79f   :  { %10364 = vmatpush3.bf16.msra.mxu1 %v10363_v30  ;;  %v5716_v30 = vld [vmem:[#allocation23 + $0x118] sm:$0xff] }
 0x7a0   :  { %10365 = vmatprep.subr.bf16.mxu1 %v12044_v10  ;;  %v10396_v31 = vpack.c.bf16 %v5716_v30, %v5715_v14  ;;  %v5890_v14 = vld [vmem:[#allocation20 + $0x1c8] sm:$0xff] }
 0x7a3   :  { %10367 = vmatpush3.bf16.msra.mxu1 %v10366_v32  ;;  %v5717_v32 = vld [vmem:[#allocation23 + $0x120] sm:$0xff] }
 0x7a4   :  { %10368 = vmatprep.subr.bf16.mxu1 %v12044_v10 }
 0x839   :  { %v5265_v34 = vpop.f32.mrb[12].mxu1 }
 0x83a   :  { %v5266_v35 = vadd.f32 %v8814_v33, %v5265_v34  ;;  %v9773_v36 = vpop.f32.mrb[13].mxu1  ;;  %v5718_v33 = vld [vmem:[#allocation23 + $0x128] sm:$0xff] }
 0x83b   :  { %v10399_v34 = vpack.c.bf16 %v5718_v33, %v5717_v32  ;;  %v5720_v36 = vld [vmem:[#allocation23 + $0x138] sm:$0xff] }
 0x83c   :  { %v8815_v37 = vmul.f32 -1.442695, %v5266_v35  ;;  %v5719_v35 = vld [vmem:[#allocation23 + $0x130] sm:$0xff] }
 0x83d   :  { %v5892_v32 = vld [vmem:[#allocation20 + $0x1d8] sm:$0xff] }
 0x83e   :  { %11548 = vpow2.f32 %v8815_v37  ;;  %v10402_v37 = vpack.c.bf16 %v5720_v36, %v5719_v35  ;;  %v5894_v35 = vld [vmem:[#allocation20 + $0x1e8] sm:$0xff] }
 0x848   :  { %v11549_v38 = vpop.eup %11548 }
 0x849   :  { %v5272_v39 = vadd.f32 1.0, %v11549_v38  ;;  %v5721_v38 = vld [vmem:[#allocation23 + $0x140] sm:$0xff] }
 0x84b   :  { %11550 = vrcp.f32 %v5272_v39  ;;  %v5722_v39 = vld [vmem:[#allocation23 + $0x148] sm:$0xff] }
 0x84c   :  { %v10405_v40 = vpack.c.bf16 %v5722_v39, %v5721_v38  ;;  %v5896_v38 = vld [vmem:[#allocation20 + $0x1f8] sm:$0xff] }
 0x855   :  { %v11551_v47 = vpop.eup %11550 }
 0x856   :  { %v5275_v48 = vsel %vm5068_vm1, %v11551_v47, 0.0  ;;  %v10408_v47 = vpack.c.bf16 %v5724_v45, %v5723_v41  ;;  %v5983_v41 = vld [vmem:[#allocation23 + $0x188] sm:$0xff] }
 0x857   :  { %v5277_v49 = vcombine.high %v5275_v48, %v5275_v48  ;;  %v5284_v50 = vrot.slane %v5275_v48, %v12567_v46  ;;  %v5725_v48 = vld [vmem:[#allocation23 + $0x160] sm:$0xff] }
 0x859   :  { %v5291_v53 = vrot.slane %v5277_v49, %v12567_v46  ;;  %v5292_v54 = vcombine.high %v5284_v50, %v5284_v50  ;;  %v5300_v6 = vrot.slane %v5284_v50, %v12567_v46  ;;  %8816 = vst.sshfl [vmem:[#allocation2] sm:$0x1 pattern:$0x73625140] %v5284_v50  ;;  %v5433_v55 = vpop.f32.mrb[14].mxu1  ;;  %v5726_v49 = vld [vmem:[#allocation23 + $0x168] sm:$0xff] }
 0x85a   :  { %v5434_v57 = vadd.f32 %v8820_v51, %v5433_v55  ;;  %v9808_v56 = vpop.f32.mrb[15].mxu1  ;;  %v5727_v50 = vld [vmem:[#allocation23 + $0x170] sm:$0xff]  ;;  %v10411_v51 = vpack.c.bf16 %v5726_v49, %v5725_v48  ;;  %v5985_v48 = vld [vmem:[#allocation23 + $0x198] sm:$0xff] }
 0x85b   :  { %v5314_v7 = vrot.slane %v5292_v54, %v12567_v46  ;;  %v5322_v58 = vcombine.high %v5300_v6, %v5300_v6  ;;  %8817 = vst.sshfl [vmem:[#allocation2 + $0x8] sm:$0x1 pattern:$0x73625140] %v5292_v54  ;;  %v8822_v6 = vld [vmem:[#allocation24 + $0x1] ss:$0 sm:$0xff] }
 0x85c   :  { %8818 = vst.sshfl [vmem:[#allocation2 + $0x20] sm:$0x1 pattern:$0x73625140] %v5291_v53  ;;  %v8821_v59 = vmul.f32 -1.442695, %v5434_v57 }
 0x85d   :  { %v5324_v60 = vcombine.high %v5314_v7, %v5314_v7  ;;  %5336 = vst [vmem:[#allocation2 + $0x10] sm:$0x1] %v5322_v58  ;;  %v5728_v53 = vld [vmem:[#allocation23 + $0x178] sm:$0xff] }
 0x85e   :  { %11552 = vpow2.f32 %v8821_v59  ;;  %v10414_v54 = vpack.c.bf16 %v5728_v53, %v5727_v50  ;;  %v5986_v50 = vld [vmem:[#allocation23 + $0x1a0] sm:$0xff] }
 0x85f   :  { %5337 = vst [vmem:[#allocation2 + $0x18] sm:$0x1] %v5324_v60 }
 0x868   :  { %v11553_v61 = vpop.eup %11552 }
 0x869   :  { %v5440_v62 = vadd.f32 1.0, %v11553_v61 }
 0x86b   :  { %11554 = vrcp.f32 %v5440_v62 }
 0x875   :  { %v11555_v5 = vpop.eup %11554 }
 0x876   :  { %9842 = vmatmul.mubr.f32.vlgmr.msra.gmra.mrb[16].mxu1 %v11555_v5 }
 0x877   :  { %10370 = vmatpush3.bf16.msra.mxu1 %v10369_v2  ;;  %9876 = vmatprep.mubr.msk.f32.mxu1 %vm12045_vm0, %v12046_v44 }
 0x878   :  { %10371 = vmatprep.subr.bf16.mxu1 %v12044_v10 }
 0x87b   :  { %10373 = vmatpush3.bf16.msra.mxu1 %v10372_v9 }
 0x87c   :  { %10374 = vmatprep.subr.bf16.mxu1 %v12044_v10 }
 0x87f   :  { %10376 = vmatpush3.bf16.msra.mxu1 %v10375_v15 }
 0x880   :  { %10377 = vmatprep.subr.bf16.mxu1 %v12044_v10 }
 0x883   :  { %10379 = vmatpush3.bf16.msra.mxu1 %v10378_v0 }
 0x884   :  { %10380 = vmatprep.subr.bf16.mxu1 %v12044_v10 }
 0x887   :  { %10382 = vmatpush3.bf16.msra.mxu1 %v10381_v20  ;;  %v5882_v20 = vld [vmem:[#allocation20 + $0x188] sm:$0xff] }
 0x888   :  { %10383 = vmatprep.subr.bf16.mxu1 %v12044_v10  ;;  %v10417_v21 = vpack.c.bf16 %v5882_v20, %v5881_v19  ;;  %v8836_v20 = vld [vmem:[#allocation21 + $0x3] ss:$0 sm:$0xff] }
 0x88b   :  { %10385 = vmatpush3.bf16.msra.mxu1 %v10384_v22  ;;  %v5884_v22 = vld [vmem:[#allocation20 + $0x198] sm:$0xff] }
 0x88c   :  { %10386 = vmatprep.subr.bf16.mxu1 %v12044_v10  ;;  %v10420_v8 = vpack.c.bf16 %v5884_v22, %v5883_v52 }
 0x88f   :  { %10388 = vmatpush3.bf16.msra.mxu1 %v10387_v24  ;;  %v5885_v24 = vld [vmem:[#allocation20 + $0x1a0] sm:$0xff] }
 0x890   :  { %10389 = vmatprep.subr.bf16.mxu1 %v12044_v10  ;;  %v10423_v26 = vpack.c.bf16 %v5886_v25, %v5885_v24 }
 0x893   :  { %10391 = vmatpush3.bf16.msra.mxu1 %v10390_v27  ;;  %v5887_v27 = vld [vmem:[#allocation20 + $0x1b0] sm:$0xff] }
 0x894   :  { %10392 = vmatprep.subr.bf16.mxu1 %v12044_v10  ;;  %v10426_v42 = vpack.c.bf16 %v5888_v28, %v5887_v27 }
 0x896   :  { %9877 = vmatmul.mubr.f32.vlgmr.msra.gmra.mrb[18].mxu1 %v12528_v11 }
 0x897   :  { %9911 = vmatprep.mubr.msk.f32.mxu1 %vm12045_vm0, %v12046_v44  ;;  %10394 = vmatpush3.bf16.msra.mxu1 %v10393_v29  ;;  %v5889_v29 = vld [vmem:[#allocation20 + $0x1c0] sm:$0xff] }
 0x898   :  { %10395 = vmatprep.subr.bf16.mxu1 %v12044_v10  ;;  %v10429_v30 = vpack.c.bf16 %v5890_v14, %v5889_v29  ;;  %v6150_v14 = vld [vmem:[#allocation20 + $0x200] sm:$0xff] }
 0x89b   :  { %10397 = vmatpush3.bf16.msra.mxu1 %v10396_v31  ;;  %v5891_v31 = vld [vmem:[#allocation20 + $0x1d0] sm:$0xff] }
 0x89c   :  { %10398 = vmatprep.subr.bf16.mxu1 %v12044_v10  ;;  %v10432_v33 = vpack.c.bf16 %v5892_v32, %v5891_v31  ;;  %v6152_v32 = vld [vmem:[#allocation20 + $0x210] sm:$0xff] }
 0x89f   :  { %10400 = vmatpush3.bf16.msra.mxu1 %v10399_v34  ;;  %v5893_v34 = vld [vmem:[#allocation20 + $0x1e0] sm:$0xff] }
 0x8a0   :  { %10401 = vmatprep.subr.bf16.mxu1 %v12044_v10  ;;  %v10435_v36 = vpack.c.bf16 %v5894_v35, %v5893_v34 }
 0x8a3   :  { %10403 = vmatpush3.bf16.msra.mxu1 %v10402_v37  ;;  %v5895_v37 = vld [vmem:[#allocation20 + $0x1f0] sm:$0xff] }
 0x8a4   :  { %10404 = vmatprep.subr.bf16.mxu1 %v12044_v10  ;;  %v10438_v39 = vpack.c.bf16 %v5896_v38, %v5895_v37  ;;  %v6155_v37 = vld [vmem:[#allocation20 + $0x228] sm:$0xff] }
 0x8a7   :  { %10406 = vmatpush3.bf16.msra.mxu1 %v10405_v40  ;;  %v5982_v40 = vld [vmem:[#allocation23 + $0x180] sm:$0xff] }
 0x8a8   :  { %10407 = vmatprep.subr.bf16.mxu1 %v12044_v10  ;;  %v10441_v45 = vpack.c.bf16 %v5983_v41, %v5982_v40  ;;  %v6157_v40 = vld [vmem:[#allocation20 + $0x238] sm:$0xff] }
 0x8ab   :  { %10409 = vmatpush3.bf16.msra.mxu1 %v10408_v47  ;;  %v5984_v47 = vld [vmem:[#allocation23 + $0x190] sm:$0xff] }
 0x8ac   :  { %10410 = vmatprep.subr.bf16.mxu1 %v12044_v10  ;;  %v10444_v49 = vpack.c.bf16 %v5985_v48, %v5984_v47  ;;  %v6159_v47 = vld [vmem:[#allocation20 + $0x248] sm:$0xff] }
 0x8af   :  { %10412 = vmatpush3.bf16.msra.mxu1 %v10411_v51  ;;  %v5987_v51 = vld [vmem:[#allocation23 + $0x1a8] sm:$0xff] }
 0x8b0   :  { %10413 = vmatprep.subr.bf16.mxu1 %v12044_v10  ;;  %v10447_v53 = vpack.c.bf16 %v5987_v51, %v5986_v50  ;;  %v6161_v50 = vld [vmem:[#allocation20 + $0x258] sm:$0xff] }
 0x8b3   :  { %10415 = vmatpush3.bf16.msra.mxu1 %v10414_v54  ;;  %v5988_v54 = vld [vmem:[#allocation23 + $0x1b0] sm:$0xff] }
 0x8b4   :  { %10416 = vmatprep.subr.bf16.mxu1 %v12044_v10 }
 0x949   :  { %v5534_v55 = vpop.f32.mrb[16].mxu1 }
 0x94a   :  { %v5535_v57 = vadd.f32 %v8822_v6, %v5534_v55  ;;  %v9843_v56 = vpop.f32.mrb[17].mxu1  ;;  %v5989_v6 = vld [vmem:[#allocation23 + $0x1b8] sm:$0xff] }
 0x94b   :  { %v10450_v55 = vpack.c.bf16 %v5989_v6, %v5988_v54  ;;  %v5991_v56 = vld [vmem:[#allocation23 + $0x1c8] sm:$0xff] }
 0x94c   :  { %v8823_v7 = vmul.f32 -1.442695, %v5535_v57  ;;  %v5990_v57 = vld [vmem:[#allocation23 + $0x1c0] sm:$0xff] }
 0x94d   :  { %v6163_v54 = vld [vmem:[#allocation20 + $0x268] sm:$0xff] }
 0x94e   :  { %11556 = vpow2.f32 %v8823_v7  ;;  %v10453_v7 = vpack.c.bf16 %v5991_v56, %v5990_v57  ;;  %v6165_v57 = vld [vmem:[#allocation20 + $0x278] sm:$0xff] }
 0x958   :  { %v11557_v58 = vpop.eup %11556 }
 0x959   :  { %v5541_v59 = vadd.f32 1.0, %v11557_v58  ;;  %v5992_v58 = vld [vmem:[#allocation23 + $0x1d0] sm:$0xff] }
 0x95b   :  { %11558 = vrcp.f32 %v5541_v59  ;;  %v5993_v59 = vld [vmem:[#allocation23 + $0x1d8] sm:$0xff] }
 0x965   :  { %v11559_v60 = vpop.eup %11558 }
 0x966   :  { %v5544_v61 = vsel %vm5068_vm1, %v11559_v60, 0.0  ;;  %v10456_v60 = vpack.c.bf16 %v5993_v59, %v5992_v58  ;;  %v6252_v58 = vld [vmem:[#allocation23 + $0x208] sm:$0xff] }
 0x967   :  { %v5546_v62 = vcombine.high %v5544_v61, %v5544_v61  ;;  %v5553_v63 = vrot.slane %v5544_v61, %v12567_v46  ;;  %v5994_v61 = vld [vmem:[#allocation23 + $0x1e0] sm:$0xff] }
 0x969   :  { %v5560_v2 = vrot.slane %v5546_v62, %v12567_v46  ;;  %v5561_v3 = vcombine.high %v5553_v63, %v5553_v63  ;;  %v5569_v4 = vrot.slane %v5553_v63, %v12567_v46  ;;  %8824 = vst.sshfl [vmem:[#allocation2 + $0x1] sm:$0x1 pattern:$0x73625140] %v5553_v63  ;;  %v5702_v5 = vpop.f32.mrb[18].mxu1  ;;  %v5995_v62 = vld [vmem:[#allocation23 + $0x1e8] sm:$0xff] }
 0x96a   :  { %v5703_v9 = vadd.f32 %v8828_v1, %v5702_v5  ;;  %v9878_v12 = vpop.f32.mrb[19].mxu1  ;;  %v5996_v63 = vld [vmem:[#allocation23 + $0x1f0] sm:$0xff]  ;;  %v10459_v1 = vpack.c.bf16 %v5995_v62, %v5994_v61  ;;  %v6254_v61 = vld [vmem:[#allocation23 + $0x218] sm:$0xff] }
 0x96b   :  { %v5583_v13 = vrot.slane %v5561_v3, %v12567_v46  ;;  %v5591_v15 = vcombine.high %v5569_v4, %v5569_v4  ;;  %8825 = vst.sshfl [vmem:[#allocation2 + $0x9] sm:$0x1 pattern:$0x73625140] %v5561_v3  ;;  %v8830_v4 = vld [vmem:[#allocation24 + $0x2] ss:$0 sm:$0xff] }
 0x96c   :  { %8826 = vst.sshfl [vmem:[#allocation2 + $0x21] sm:$0x1 pattern:$0x73625140] %v5560_v2  ;;  %v8829_v16 = vmul.f32 -1.442695, %v5703_v9 }
 0x96d   :  { %v5593_v17 = vcombine.high %v5583_v13, %v5583_v13  ;;  %5605 = vst [vmem:[#allocation2 + $0x11] sm:$0x1] %v5591_v15  ;;  %v5997_v2 = vld [vmem:[#allocation23 + $0x1f8] sm:$0xff] }
 0x96e   :  { %11560 = vpow2.f32 %v8829_v16  ;;  %v10462_v3 = vpack.c.bf16 %v5997_v2, %v5996_v63  ;;  %v6255_v63 = vld [vmem:[#allocation23 + $0x220] sm:$0xff] }
 0x96f   :  { %5606 = vst [vmem:[#allocation2 + $0x19] sm:$0x1] %v5593_v17 }
 0x978   :  { %v11561_v0 = vpop.eup %11560 }
 0x979   :  { %v5709_v18 = vadd.f32 1.0, %v11561_v0 }
 0x97b   :  { %11562 = vrcp.f32 %v5709_v18 }
 0x985   :  { %v11563_v23 = vpop.eup %11562 }
 0x986   :  { %9912 = vmatmul.mubr.f32.vlgmr.msra.gmra.mrb[20].mxu1 %v11563_v23 }
 0x987   :  { %10418 = vmatpush3.bf16.msra.mxu1 %v10417_v21  ;;  %9946 = vmatprep.mubr.msk.f32.mxu1 %vm12045_vm0, %v12046_v44 }
 0x988   :  { %10419 = vmatprep.subr.bf16.mxu1 %v12044_v10 }
 0x98b   :  { %10421 = vmatpush3.bf16.msra.mxu1 %v10420_v8 }
 0x98c   :  { %10422 = vmatprep.subr.bf16.mxu1 %v12044_v10 }
 0x98f   :  { %10424 = vmatpush3.bf16.msra.mxu1 %v10423_v26 }
 0x990   :  { %10425 = vmatprep.subr.bf16.mxu1 %v12044_v10 }
 0x993   :  { %10427 = vmatpush3.bf16.msra.mxu1 %v10426_v42 }
 0x994   :  { %10428 = vmatprep.subr.bf16.mxu1 %v12044_v10 }
 0x997   :  { %10430 = vmatpush3.bf16.msra.mxu1 %v10429_v30  ;;  %v6151_v30 = vld [vmem:[#allocation20 + $0x208] sm:$0xff] }
 0x998   :  { %10431 = vmatprep.subr.bf16.mxu1 %v12044_v10  ;;  %v10465_v31 = vpack.c.bf16 %v6151_v30, %v6150_v14 }
 0x99b   :  { %10433 = vmatpush3.bf16.msra.mxu1 %v10432_v33  ;;  %v6153_v33 = vld [vmem:[#allocation20 + $0x218] sm:$0xff] }
 0x99c   :  { %10434 = vmatprep.subr.bf16.mxu1 %v12044_v10  ;;  %v10468_v35 = vpack.c.bf16 %v6153_v33, %v6152_v32 }
 0x99f   :  { %10436 = vmatpush3.bf16.msra.mxu1 %v10435_v36  ;;  %v6154_v36 = vld [vmem:[#allocation20 + $0x220] sm:$0xff] }
 0x9a0   :  { %10437 = vmatprep.subr.bf16.mxu1 %v12044_v10  ;;  %v10471_v38 = vpack.c.bf16 %v6155_v37, %v6154_v36 }
 0x9a3   :  { %10439 = vmatpush3.bf16.msra.mxu1 %v10438_v39  ;;  %v6156_v39 = vld [vmem:[#allocation20 + $0x230] sm:$0xff] }
 0x9a4   :  { %10440 = vmatprep.subr.bf16.mxu1 %v12044_v10  ;;  %v10474_v41 = vpack.c.bf16 %v6157_v40, %v6156_v39 }
 0x9a6   :  { %9947 = vmatmul.mubr.f32.vlgmr.msra.gmra.mrb[22].mxu1 %v12528_v11 }
 0x9a7   :  { %9981 = vmatprep.mubr.msk.f32.mxu1 %vm12045_vm0, %v12046_v44  ;;  %10442 = vmatpush3.bf16.msra.mxu1 %v10441_v45  ;;  %v6158_v45 = vld [vmem:[#allocation20 + $0x240] sm:$0xff] }
 0x9a8   :  { %10443 = vmatprep.subr.bf16.mxu1 %v12044_v10  ;;  %v10477_v48 = vpack.c.bf16 %v6159_v47, %v6158_v45  ;;  %v8846_v45 = vld [vmem:[#allocation24 + $0x4] ss:$0 sm:$0xff] }
 0x9ab   :  { %10445 = vmatpush3.bf16.msra.mxu1 %v10444_v49  ;;  %v6160_v49 = vld [vmem:[#allocation20 + $0x250] sm:$0xff] }
 0x9ac   :  { %10446 = vmatprep.subr.bf16.mxu1 %v12044_v10  ;;  %v10480_v51 = vpack.c.bf16 %v6161_v50, %v6160_v49 }
 0x9af   :  { %10448 = vmatpush3.bf16.msra.mxu1 %v10447_v53  ;;  %v6162_v53 = vld [vmem:[#allocation20 + $0x260] sm:$0xff] }
 0x9b0   :  { %10449 = vmatprep.subr.bf16.mxu1 %v12044_v10  ;;  %v10483_v6 = vpack.c.bf16 %v6163_v54, %v6162_v53 }
 0x9b3   :  { %10451 = vmatpush3.bf16.msra.mxu1 %v10450_v55  ;;  %v6164_v55 = vld [vmem:[#allocation20 + $0x270] sm:$0xff] }
 0x9b4   :  { %10452 = vmatprep.subr.bf16.mxu1 %v12044_v10  ;;  %v10486_v56 = vpack.c.bf16 %v6165_v57, %v6164_v55 }
 0x9b7   :  { %10454 = vmatpush3.bf16.msra.mxu1 %v10453_v7  ;;  %v6251_v7 = vld [vmem:[#allocation23 + $0x200] sm:$0xff] }
 0x9b8   :  { %10455 = vmatprep.subr.bf16.mxu1 %v12044_v10  ;;  %v10489_v59 = vpack.c.bf16 %v6252_v58, %v6251_v7 }
 0x9bb   :  { %10457 = vmatpush3.bf16.msra.mxu1 %v10456_v60  ;;  %v6253_v60 = vld [vmem:[#allocation23 + $0x210] sm:$0xff] }
 0x9bc   :  { %10458 = vmatprep.subr.bf16.mxu1 %v12044_v10  ;;  %v10492_v62 = vpack.c.bf16 %v6254_v61, %v6253_v60 }
 0x9bf   :  { %10460 = vmatpush3.bf16.msra.mxu1 %v10459_v1  ;;  %v6256_v1 = vld [vmem:[#allocation23 + $0x228] sm:$0xff] }
 0x9c0   :  { %10461 = vmatprep.subr.bf16.mxu1 %v12044_v10  ;;  %v10495_v2 = vpack.c.bf16 %v6256_v1, %v6255_v63 }
 0x9c3   :  { %10463 = vmatpush3.bf16.msra.mxu1 %v10462_v3 }
 0x9c4   :  { %10464 = vmatprep.subr.bf16.mxu1 %v12044_v10 }
 0xa59   :  { %v5803_v5 = vpop.f32.mrb[20].mxu1 }
 0xa5a   :  { %v5804_v9 = vadd.f32 %v8830_v4, %v5803_v5  ;;  %v9913_v12 = vpop.f32.mrb[21].mxu1  ;;  %v6259_v4 = vld [vmem:[#allocation23 + $0x240] sm:$0xff]  ;;  %v6260_v5 = vld [vmem:[#allocation23 + $0x248] sm:$0xff] }
 0xa5b   :  { %v6261_v12 = vld [vmem:[#allocation23 + $0x250] sm:$0xff] }
 0xa5c   :  { %v8831_v13 = vmul.f32 -1.442695, %v5804_v9  ;;  %v10501_v9 = vpack.c.bf16 %v6260_v5, %v6259_v4 }
 0xa5e   :  { %11564 = vpow2.f32 %v8831_v13  ;;  %v6262_v13 = vld [vmem:[#allocation23 + $0x258] sm:$0xff] }
 0xa68   :  { %v11565_v15 = vpop.eup %11564 }
 0xa69   :  { %v5810_v16 = vadd.f32 1.0, %v11565_v15  ;;  %v10504_v15 = vpack.c.bf16 %v6262_v13, %v6261_v12 }
 0xa6b   :  { %11566 = vrcp.f32 %v5810_v16  ;;  %v6263_v16 = vld [vmem:[#allocation23 + $0x260] sm:$0xff] }
 0xa75   :  { %v11567_v17 = vpop.eup %11566 }
 0xa76   :  { %v5813_v0 = vsel %vm5068_vm1, %v11567_v17, 0.0  ;;  %v6264_v17 = vld [vmem:[#allocation23 + $0x268] sm:$0xff] }
 0xa77   :  { %v5815_v18 = vcombine.high %v5813_v0, %v5813_v0  ;;  %v5822_v19 = vrot.slane %v5813_v0, %v12567_v46  ;;  %v10507_v0 = vpack.c.bf16 %v6264_v17, %v6263_v16 }
 0xa79   :  { %v5829_v21 = vrot.slane %v5815_v18, %v12567_v46  ;;  %v5830_v52 = vcombine.high %v5822_v19, %v5822_v19  ;;  %v5838_v22 = vrot.slane %v5822_v19, %v12567_v46  ;;  %8832 = vst.sshfl [vmem:[#allocation2 + $0x2] sm:$0x1 pattern:$0x73625140] %v5822_v19  ;;  %v5971_v23 = vpop.f32.mrb[22].mxu1  ;;  %v6265_v18 = vld [vmem:[#allocation23 + $0x270] sm:$0xff] }
 0xa7a   :  { %v5972_v8 = vadd.f32 %v8836_v20, %v5971_v23  ;;  %v9948_v24 = vpop.f32.mrb[23].mxu1  ;;  %v6266_v19 = vld [vmem:[#allocation23 + $0x278] sm:$0xff] }
 0xa7b   :  { %v5852_v25 = vrot.slane %v5830_v52, %v12567_v46  ;;  %v5860_v26 = vcombine.high %v5838_v22, %v5838_v22  ;;  %8833 = vst.sshfl [vmem:[#allocation2 + $0xa] sm:$0x1 pattern:$0x73625140] %v5830_v52  ;;  %v10510_v20 = vpack.c.bf16 %v6266_v19, %v6265_v18  ;;  %v8838_v52 = vld [vmem:[#allocation24 + $0x3] ss:$0 sm:$0xff] }
 0xa7c   :  { %8834 = vst.sshfl [vmem:[#allocation2 + $0x22] sm:$0x1 pattern:$0x73625140] %v5829_v21  ;;  %v8837_v27 = vmul.f32 -1.442695, %v5972_v8 }
 0xa7d   :  { %v5862_v28 = vcombine.high %v5852_v25, %v5852_v25  ;;  %5874 = vst [vmem:[#allocation2 + $0x12] sm:$0x1] %v5860_v26  ;;  %v6434_v21 = vld [vmem:[%s12930_s15] sm:$0xff]  ;;  %s12048_s15 = smov [#allocation28]  }
 0xa7e   :  { %11568 = vpow2.f32 %v8837_v27  ;;  %6438 = vperm.xlu0 %10616, %v6434_v21   ;;  %s8131_s27 = sshll.u32 %s12048_s15, 4  ;;  %s8132_s27 = int_to_ptr.vmem [resolvable:$true] %s8131_s27 }
 0xa7f   :  { %5875 = vst [vmem:[#allocation2 + $0x1a] sm:$0x1] %v5862_v28  ;;  %s11914_s9 = scalar_lea.vmem %s8132_s27, 128  ;;  %p11919_p9 = scmp.lt.s32.totalorder %s8132_s27, %s8132_s27 }
 0xa80   :  { %p11915_p8 = scmp.ne.s32.totalorder %s8132_s27, %s11914_s9  ;;  %p11920_p10 = scmp.lt.s32.totalorder %s11914_s9, %s11914_s9 }
 0xa82   :  { %p11921_p11 = por %p11920_p10, %p11919_p9 }
 0xa84   :  { %p11922_p12 = pnand %p11921_p11, %p11915_p8 }
 0xa88   :  { %v11569_v42 = vpop.eup %11568 }
 0xa89   :  { %v5978_v29 = vadd.f32 1.0, %v11569_v42 }
 0xa8b   :  { %11570 = vrcp.f32 %v5978_v29  ;;  %v8844_v29 = vld [vmem:[#allocation21 + $0x4] ss:$0 sm:$0xff] }
 0xa95   :  { %v11571_v34 = vpop.eup %11570 }
 0xa96   :  { %9982 = vmatmul.mubr.f32.vlgmr.msra.gmra.mrb[24].mxu1 %v11571_v34 }
 0xa97   :  { %10466 = vmatpush3.bf16.msra.mxu1 %v10465_v31  ;;  %10016 = vmatprep.mubr.msk.f32.mxu1 %vm12045_vm0, %v12046_v44 }
 0xa98   :  { %10467 = vmatprep.subr.bf16.mxu1 %v12044_v10 }
 0xa9b   :  { %10469 = vmatpush3.bf16.msra.mxu1 %v10468_v35 }
 0xa9c   :  { %10470 = vmatprep.subr.bf16.mxu1 %v12044_v10 }
 0xa9f   :  { %10472 = vmatpush3.bf16.msra.mxu1 %v10471_v38 }
 0xaa0   :  { %10473 = vmatprep.subr.bf16.mxu1 %v12044_v10 }
 0xaa3   :  { %10475 = vmatpush3.bf16.msra.mxu1 %v10474_v41 }
 0xaa4   :  { %10476 = vmatprep.subr.bf16.mxu1 %v12044_v10 }
 0xaa7   :  { %10478 = vmatpush3.bf16.msra.mxu1 %v10477_v48 }
 0xaa8   :  { %10479 = vmatprep.subr.bf16.mxu1 %v12044_v10 }
 0xaab   :  { %10481 = vmatpush3.bf16.msra.mxu1 %v10480_v51 }
 0xaac   :  { %10482 = vmatprep.subr.bf16.mxu1 %v12044_v10 }
 0xaaf   :  { %10484 = vmatpush3.bf16.msra.mxu1 %v10483_v6 }
 0xab0   :  { %10485 = vmatprep.subr.bf16.mxu1 %v12044_v10 }
 0xab3   :  { %10487 = vmatpush3.bf16.msra.mxu1 %v10486_v56 }
 0xab4   :  { %10488 = vmatprep.subr.bf16.mxu1 %v12044_v10 }
 0xab6   :  { %10017 = vmatmul.mubr.f32.vlgmr.msra.gmra.mrb[26].mxu1 %v12528_v11  ;;  %v6257_v11 = vld [vmem:[#allocation23 + $0x230] sm:$0xff] }
 0xab7   :  { %10051 = vmatprep.mubr.msk.f32.mxu1 %vm12045_vm0, %v12046_v44  ;;  %10490 = vmatpush3.bf16.msra.mxu1 %v10489_v59  ;;  %v6258_v44 = vld [vmem:[#allocation23 + $0x238] sm:$0xff] }
 0xab8   :  { %10491 = vmatprep.subr.bf16.mxu1 %v12044_v10  ;;  %v10498_v3 = vpack.c.bf16 %v6258_v44, %v6257_v11 }
 0xabb   :  { %10493 = vmatpush3.bf16.msra.mxu1 %v10492_v62 }
 0xabc   :  { %10494 = vmatprep.subr.bf16.mxu1 %v12044_v10 }
 0xabf   :  { %10496 = vmatpush3.bf16.msra.mxu1 %v10495_v2 }
 0xac0   :  { %10497 = vmatprep.subr.bf16.mxu1 %v12044_v10 }
 0xac3   :  { %10499 = vmatpush3.bf16.msra.mxu1 %v10498_v3 }
 0xac4   :  { %10500 = vmatprep.subr.bf16.mxu1 %v12044_v10 }
 0xac7   :  { %10502 = vmatpush3.bf16.msra.mxu1 %v10501_v9 }
 0xac8   :  { %10503 = vmatprep.subr.bf16.mxu1 %v12044_v10 }
 0xacb   :  { %10505 = vmatpush3.bf16.msra.mxu1 %v10504_v15 }
 0xacc   :  { %10506 = vmatprep.subr.bf16.mxu1 %v12044_v10 }
 0xacf   :  { %10508 = vmatpush3.bf16.msra.mxu1 %v10507_v0 }
 0xad0   :  { %10509 = vmatprep.subr.bf16.mxu1 %v12044_v10 }
 0xad3   :  { %10511 = vmatpush3.bf16.msra.mxu1 %v10510_v20 }
 0xafd   :  { %v12664_v62 = vpop.permute.xlu0 %6438 }
 0xb69   :  { %v6072_v22 = vpop.f32.mrb[24].mxu1 }
 0xb6a   :  { %v6073_v23 = vadd.f32 %v8838_v52, %v6072_v22  ;;  %v9983_v8 = vpop.f32.mrb[25].mxu1 }
 0xb6c   :  { %v8839_v24 = vmul.f32 -1.442695, %v6073_v23 }
 0xb6e   :  { %11572 = vpow2.f32 %v8839_v24 }
 0xb78   :  { %v11573_v25 = vpop.eup %11572 }
 0xb79   :  { %v6079_v26 = vadd.f32 1.0, %v11573_v25 }
 0xb7b   :  { %11574 = vrcp.f32 %v6079_v26 }
 0xb85   :  { %v11575_v27 = vpop.eup %11574 }
 0xb86   :  { %v6082_v28 = vsel %vm5068_vm1, %v11575_v27, 0.0 }
 0xb87   :  { %v6084_v10 = vcombine.high %v6082_v28, %v6082_v28  ;;  %v6091_v42 = vrot.slane %v6082_v28, %v12567_v46 }
 0xb89   :  { %v6098_v14 = vrot.slane %v6084_v10, %v12567_v46  ;;  %v6099_v30 = vcombine.high %v6091_v42, %v6091_v42  ;;  %v6107_v31 = vrot.slane %v6091_v42, %v12567_v46  ;;  %8840 = vst.sshfl [vmem:[#allocation2 + $0x3] sm:$0x1 pattern:$0x73625140] %v6091_v42  ;;  %v6240_v32 = vpop.f32.mrb[26].mxu1 }
 0xb8a   :  { %v6241_v33 = vadd.f32 %v8844_v29, %v6240_v32  ;;  %v10018_v34 = vpop.f32.mrb[27].mxu1 }
 0xb8b   :  { %v6121_v35 = vrot.slane %v6099_v30, %v12567_v46  ;;  %v6129_v36 = vcombine.high %v6107_v31, %v6107_v31  ;;  %8841 = vst.sshfl [vmem:[#allocation2 + $0xb] sm:$0x1 pattern:$0x73625140] %v6099_v30 }
 0xb8c   :  { %8842 = vst.sshfl [vmem:[#allocation2 + $0x23] sm:$0x1 pattern:$0x73625140] %v6098_v14  ;;  %v8845_v37 = vmul.f32 -1.442695, %v6241_v33 }
 0xb8d   :  { %v6131_v38 = vcombine.high %v6121_v35, %v6121_v35  ;;  %6143 = vst [vmem:[#allocation2 + $0x13] sm:$0x1] %v6129_v36 }
 0xb8e   :  { %11576 = vpow2.f32 %v8845_v37 }
 0xb8f   :  { %6144 = vst [vmem:[#allocation2 + $0x1b] sm:$0x1] %v6131_v38 }
 0xb98   :  { %v11577_v39 = vpop.eup %11576 }
 0xb99   :  { %v6247_v40 = vadd.f32 1.0, %v11577_v39 }
 0xb9b   :  { %11578 = vrcp.f32 %v6247_v40 }
 0xba5   :  { %v11579_v41 = vpop.eup %11578 }
 0xba6   :  { %10052 = vmatmul.mubr.f32.vlgmr.msra.gmra.mrb[28].mxu1 %v11579_v41 }
 0xc79   :  { %v6341_v47 = vpop.f32.mrb[28].mxu1 }
 0xc7a   :  { %v6342_v48 = vadd.f32 %v8846_v45, %v6341_v47  ;;  %v10053_v49 = vpop.f32.mrb[29].mxu1 }
 0xc7c   :  { %v8847_v50 = vmul.f32 -1.442695, %v6342_v48 }
 0xc7e   :  { %11580 = vpow2.f32 %v8847_v50 }
 0xc88   :  { %v11581_v51 = vpop.eup %11580 }
 0xc89   :  { %v6348_v53 = vadd.f32 1.0, %v11581_v51 }
 0xc8b   :  { %11582 = vrcp.f32 %v6348_v53 }
 0xc95   :  { %v11583_v54 = vpop.eup %11582 }
 0xc96   :  { %v6351_v6 = vsel %vm5068_vm1, %v11583_v54, 0.0 }
 0xc97   :  { %v6353_v55 = vcombine.high %v6351_v6, %v6351_v6  ;;  %v6360_v57 = vrot.slane %v6351_v6, %v12567_v46 }
 0xc99   :  { %v6367_v56 = vrot.slane %v6353_v55, %v12567_v46  ;;  %v6368_v7 = vcombine.high %v6360_v57, %v6360_v57  ;;  %v6376_v58 = vrot.slane %v6360_v57, %v12567_v46  ;;  %8848 = vst.sshfl [vmem:[#allocation2 + $0x4] sm:$0x1 pattern:$0x73625140] %v6360_v57 }
 0xc9b   :  { %v6390_v59 = vrot.slane %v6368_v7, %v12567_v46  ;;  %v6398_v60 = vcombine.high %v6376_v58, %v6376_v58  ;;  %8849 = vst.sshfl [vmem:[#allocation2 + $0xc] sm:$0x1 pattern:$0x73625140] %v6368_v7 }
 0xc9c   :  { %8850 = vst.sshfl [vmem:[#allocation2 + $0x24] sm:$0x1 pattern:$0x73625140] %v6367_v56 }
 0xc9d   :  { %v6400_v61 = vcombine.high %v6390_v59, %v6390_v59  ;;  %6412 = vst [vmem:[#allocation2 + $0x14] sm:$0x1] %v6398_v60 }
 0xc9f   :  { %6413 = vst [vmem:[#allocation2 + $0x1c] sm:$0x1] %v6400_v61 }
 0xca0   :  { %v6435_v43 = vld [vmem:[#allocation2] sm:$0xff] }
 0xca1   :  { %6442 = vxpose.xlu0.b32.start.end [1/1] (short) %v6435_v43, 128  ;;  %v6441_v63 = vmul.f32 %v12664_v62, %v6435_v43 }
 0xca2   :  { %v6765_v1 = vld [vmem:[#allocation2 + $0x8] sm:$0xff] }
 0xca3   :  { %10054 = vmatprep.subr.mxu0 %v6441_v63  ;;  %10512 = vmatprep.subr.mxu1 %v6441_v63  ;;  %v6766_v2 = vmul.f32 %v6765_v1, %v12664_v62  ;;  %v12668_v44 = vld [vmem:[#allocation2 + $0x20] sm:$0xff] }
 0xca4   :  { %6767 = vxpose.xlu1.b32.start.end [1/1] (short) %v6765_v1, 128  ;;  %10055 = vmatpush3.msra.mxu0 %v6441_v63  ;;  %v7090_v11 = vld [vmem:[#allocation2 + $0x10] sm:$0xff]  ;;  %v7741_v6 = vmul.f32 %v12668_v44, %v12664_v62 }
 0xca5   :  { %10513 = vmatpush3.msra.mxu1 %v6441_v63  ;;  %v7091_v22 = vmul.f32 %v7090_v11, %v12664_v62 }
 0xca6   :  { %10080 = vmatprep.subr.mxu1 %v6766_v2  ;;  %v7415_v46 = vld [vmem:[#allocation2 + $0x18] sm:$0xff] }
 0xca7   :  { %v7416_v36 = vmul.f32 %v7415_v46, %v12664_v62 }
 0xcde   :  { %7417 = vxpose.xlu0.b32.start.end [1/1] (short) %v7415_v46, 128 }
 0xce1   :  { %7092 = vxpose.xlu1.b32.start.end [1/1] (short) %v7090_v11, 128 }
 0xd1e   :  { %7742 = vxpose.xlu1.b32.start.end [1/1] (short) %v12668_v44, 128 }
 0xd21   :  { %v6458_v3 = vpop.trf.xlu0 }
 0xd22   :  { %10056 = vmatprep.mubr.msk.f32.mxu0 %vm6474_vm2, %v6458_v3 }
 0xd24   :  { %v6783_v4 = vpop.trf.xlu1 }
 0xd25   :  { %v6459_v5 = vpop.trf.xlu0 }
 0xd26   :  { %10057 = vmatmul.mubr.msk.f32.vlgmr.msra.gmra.mrb[4].mxu0 %vm6474_vm2, %v6459_v5 }
 0xd28   :  { %v6784_v9 = vpop.trf.xlu1 }
 0xd29   :  { %v6460_v12 = vpop.trf.xlu0 }
 0xd2a   :  { %10059 = vmatprep.mubr.msk.f32.mxu0 %vm6474_vm2, %v6460_v12 }
 0xd2c   :  { %v6785_v13 = vpop.trf.xlu1 }
 0xd2d   :  { %v6461_v15 = vpop.trf.xlu0 }
 0xd2e   :  { %10060 = vmatmul.mubr.msk.f32.gmra.mrb[6].mxu0 %vm6474_vm2, %v6461_v15 }
 0xd30   :  { %v6786_v16 = vpop.trf.xlu1 }
 0xd31   :  { %v6462_v17 = vpop.trf.xlu0 }
 0xd32   :  { %10062 = vmatprep.mubr.msk.f32.mxu0 %vm6474_vm2, %v6462_v17 }
 0xd34   :  { %v6787_v0 = vpop.trf.xlu1 }
 0xd35   :  { %v6463_v18 = vpop.trf.xlu0 }
 0xd36   :  { %10063 = vmatmul.mubr.msk.f32.gmra.mrb[8].mxu0 %vm6474_vm2, %v6463_v18 }
 0xd38   :  { %v6788_v19 = vpop.trf.xlu1 }
 0xd39   :  { %v6464_v20 = vpop.trf.xlu0 }
 0xd3a   :  { %10065 = vmatprep.mubr.msk.f32.mxu1 %vm6474_vm2, %v6464_v20 }
 0xd3c   :  { %v6789_v21 = vpop.trf.xlu1 }
 0xd3d   :  { %v6465_v52 = vpop.trf.xlu0 }
 0xd3e   :  { %10066 = vmatmul.mubr.msk.f32.vlgmr.msra.gmra.mrb[30].mxu1 %vm6474_vm2, %v6465_v52 }
 0xd3f   :  { %10081 = vmatpush3.msra.mxu1 %v6766_v2 }
 0xd40   :  { %v6790_v23 = vpop.trf.xlu1  ;;  %10106 = vmatprep.subr.mxu1 %v7091_v22 }
 0xd41   :  { %v6466_v8 = vpop.trf.xlu0 }
 0xd42   :  { %10068 = vmatprep.mubr.msk.f32.mxu1 %vm6474_vm2, %v6466_v8 }
 0xd44   :  { %v6791_v24 = vpop.trf.xlu1 }
 0xd45   :  { %v6467_v25 = vpop.trf.xlu0 }
 0xd46   :  { %10069 = vmatmul.mubr.msk.f32.gmra.mrb[32].mxu1 %vm6474_vm2, %v6467_v25  ;;  %v12755_v25 = vld [vmem:[#allocation26 + $0x8] sm:$0xff] }
 0xd48   :  { %v6792_v26 = vpop.trf.xlu1 }
 0xd49   :  { %v6468_v27 = vpop.trf.xlu0 }
 0xd4a   :  { %10071 = vmatprep.mubr.msk.f32.mxu1 %vm6474_vm2, %v6468_v27 }
 0xd4c   :  { %v6793_v28 = vpop.trf.xlu1 }
 0xd4d   :  { %v6469_v10 = vpop.trf.xlu0 }
 0xd4e   :  { %10072 = vmatmul.mubr.msk.f32.gmra.mrb[34].mxu1 %vm6474_vm2, %v6469_v10 }
 0xd50   :  { %v6794_v42 = vpop.trf.xlu1 }
 0xd51   :  { %v6470_v29 = vpop.trf.xlu0 }
 0xd52   :  { %10074 = vmatprep.mubr.msk.f32.mxu1 %vm6474_vm2, %v6470_v29 }
 0xd54   :  { %v6795_v14 = vpop.trf.xlu1 }
 0xd55   :  { %v6471_v30 = vpop.trf.xlu0 }
 0xd56   :  { %10075 = vmatmul.mubr.msk.f32.gmra.mrb[36].mxu1 %vm6474_vm2, %v6471_v30  ;;  %v12763_v30 = vld [vmem:[#allocation26 + $0x10] sm:$0xff] }
 0xd58   :  { %v6796_v31 = vpop.trf.xlu1 }
 0xd59   :  { %v6472_v32 = vpop.trf.xlu0 }
 0xd5a   :  { %10077 = vmatprep.mubr.msk.f32.mxu1 %vm6474_vm2, %v6472_v32 }
 0xd5c   :  { %v6797_v33 = vpop.trf.xlu1 }
 0xd5d   :  { %v6473_v34 = vpop.trf.xlu0 }
 0xd5e   :  { %10078 = vmatmul.mubr.msk.f32.gmra.mrb[38].mxu1 %vm6474_vm2, %v6473_v34 }
 0xd5f   :  { %10082 = vmatprep.mubr.msk.f32.mxu1 %vm6474_vm2, %v6783_v4 }
 0xd60   :  { %v6798_v35 = vpop.trf.xlu1 }
 0xd61   :  { %v7433_v38 = vpop.trf.xlu0 }
 0xd62   :  { %10083 = vmatmul.mubr.msk.f32.vlgmr.msra.gmra.mrb[40].mxu1 %vm6474_vm2, %v6784_v9 }
 0xd63   :  { %10107 = vmatpush3.msra.mxu1 %v7091_v22  ;;  %10085 = vmatprep.mubr.msk.f32.mxu1 %vm6474_vm2, %v6785_v13 }
 0xd64   :  { %v7108_v37 = vpop.trf.xlu1  ;;  %10132 = vmatprep.subr.mxu1 %v7416_v36 }
 0xd65   :  { %v7434_v40 = vpop.trf.xlu0 }
 0xd66   :  { %10086 = vmatmul.mubr.msk.f32.gmra.mrb[42].mxu1 %vm6474_vm2, %v6786_v16 }
 0xd67   :  { %10088 = vmatprep.mubr.msk.f32.mxu1 %vm6474_vm2, %v6787_v0 }
 0xd68   :  { %v7109_v39 = vpop.trf.xlu1 }
 0xd69   :  { %v7435_v47 = vpop.trf.xlu0 }
 0xd6a   :  { %10089 = vmatmul.mubr.msk.f32.gmra.mrb[44].mxu1 %vm6474_vm2, %v6788_v19 }
 0xd6b   :  { %10091 = vmatprep.mubr.msk.f32.mxu1 %vm6474_vm2, %v6789_v21 }
 0xd6c   :  { %v7110_v41 = vpop.trf.xlu1 }
 0xd6d   :  { %v7436_v49 = vpop.trf.xlu0 }
 0xd6e   :  { %10092 = vmatmul.mubr.msk.f32.gmra.mrb[46].mxu1 %vm6474_vm2, %v6790_v23 }
 0xd6f   :  { %10094 = vmatprep.mubr.msk.f32.mxu1 %vm6474_vm2, %v6791_v24 }
 0xd70   :  { %v7111_v45 = vpop.trf.xlu1 }
 0xd71   :  { %v7437_v53 = vpop.trf.xlu0 }
 0xd72   :  { %10095 = vmatmul.mubr.msk.f32.gmra.mrb[48].mxu1 %vm6474_vm2, %v6792_v26  ;;  %v12757_v26 = vld [vmem:[#allocation26] sm:$0xff] }
 0xd73   :  { %10097 = vmatprep.mubr.msk.f32.mxu1 %vm6474_vm2, %v6793_v28 }
 0xd74   :  { %v7112_v48 = vpop.trf.xlu1 }
 0xd75   :  { %v7438_v55 = vpop.trf.xlu0 }
 0xd76   :  { %10098 = vmatmul.mubr.msk.f32.gmra.mrb[50].mxu1 %vm6474_vm2, %v6794_v42 }
 0xd77   :  { %10100 = vmatprep.mubr.msk.f32.mxu1 %vm6474_vm2, %v6795_v14  ;;  %v12761_v14 = vld [vmem:[#allocation26 + $0x18] sm:$0xff] }
 0xd78   :  { %v7113_v50 = vpop.trf.xlu1 }
 0xd79   :  { %v7439_v7 = vpop.trf.xlu0 }
 0xd7a   :  { %10101 = vmatmul.mubr.msk.f32.gmra.mrb[52].mxu1 %vm6474_vm2, %v6796_v31 }
 0xd7b   :  { %10103 = vmatprep.mubr.msk.f32.mxu1 %vm6474_vm2, %v6797_v33 }
 0xd7c   :  { %v7114_v51 = vpop.trf.xlu1 }
 0xd7d   :  { %v7440_v59 = vpop.trf.xlu0 }
 0xd7e   :  { %10104 = vmatmul.mubr.msk.f32.gmra.mrb[54].mxu1 %vm6474_vm2, %v6798_v35 }
 0xd7f   :  { %10108 = vmatprep.mubr.msk.f32.mxu1 %vm6474_vm2, %v7108_v37  ;;  %v12769_v37 = vld [vmem:[#allocation26 + $0x20] sm:$0xff] }
 0xd80   :  { %v7115_v54 = vpop.trf.xlu1 }
 0xd81   :  { %v7441_v62 = vpop.trf.xlu0 }
 0xd82   :  { %10109 = vmatmul.mubr.msk.f32.vlgmr.msra.gmra.mrb[56].mxu1 %vm6474_vm2, %v7109_v39 }
 0xd83   :  { %10133 = vmatpush3.msra.mxu1 %v7416_v36  ;;  %10111 = vmatprep.mubr.msk.f32.mxu1 %vm6474_vm2, %v7110_v41  ;;  %v12767_v36 = vld [vmem:[#allocation26 + $0x28] sm:$0xff] }
 0xd84   :  { %v7116_v57 = vpop.trf.xlu1  ;;  %10158 = vmatprep.subr.mxu1 %v7741_v6 }
 0xd85   :  { %v7442_v63 = vpop.trf.xlu0 }
 0xd86   :  { %10112 = vmatmul.mubr.msk.f32.gmra.mrb[58].mxu1 %vm6474_vm2, %v7111_v45 }
 0xd87   :  { %10114 = vmatprep.mubr.msk.f32.mxu1 %vm6474_vm2, %v7112_v48  ;;  %v12775_v48 = vld [vmem:[#allocation26 + $0x30] sm:$0xff] }
 0xd88   :  { %v7117_v56 = vpop.trf.xlu1 }
 0xd89   :  { %v7443_v46 = vpop.trf.xlu0 }
 0xd8a   :  { %10115 = vmatmul.mubr.msk.f32.gmra.mrb[60].mxu1 %vm6474_vm2, %v7113_v50 }
 0xd8b   :  { %10117 = vmatprep.mubr.msk.f32.mxu1 %vm6474_vm2, %v7114_v51 }
 0xd8c   :  { %v7118_v58 = vpop.trf.xlu1 }
 0xd8d   :  { %v7444_v44 = vpop.trf.xlu0 }
 0xd8e   :  { %10118 = vmatmul.mubr.msk.f32.gmra.mrb[62].mxu1 %vm6474_vm2, %v7115_v54 }
 0xd8f   :  { %10120 = vmatprep.mubr.msk.f32.mxu1 %vm6474_vm2, %v7116_v57 }
 0xd90   :  { %v7119_v60 = vpop.trf.xlu1 }
 0xd91   :  { %v7445_v5 = vpop.trf.xlu0 }
 0xd92   :  { %10121 = vmatmul.mubr.msk.f32.gmra.mrb[64].mxu1 %vm6474_vm2, %v7117_v56 }
 0xd93   :  { %10123 = vmatprep.mubr.msk.f32.mxu1 %vm6474_vm2, %v7118_v58 }
 0xd94   :  { %v7120_v61 = vpop.trf.xlu1 }
 0xd95   :  { %v7446_v12 = vpop.trf.xlu0 }
 0xd96   :  { %10124 = vmatmul.mubr.msk.f32.gmra.mrb[66].mxu1 %vm6474_vm2, %v7119_v60  ;;  %v12785_v60 = vld [vmem:[#allocation26 + $0x58] sm:$0xff] }
 0xd97   :  { %10126 = vmatprep.mubr.msk.f32.mxu1 %vm6474_vm2, %v7120_v61  ;;  %v12787_v61 = vld [vmem:[#allocation26 + $0x50] sm:$0xff] }
 0xd98   :  { %v7121_v43 = vpop.trf.xlu1 }
 0xd99   :  { %v7447_v16 = vpop.trf.xlu0 }
 0xd9a   :  { %10127 = vmatmul.mubr.msk.f32.gmra.mrb[68].mxu1 %vm6474_vm2, %v7121_v43 }
 0xd9c   :  { %v7122_v1 = vpop.trf.xlu1 }
 0xd9d   :  { %10129 = vmatprep.mubr.msk.f32.mxu1 %vm6474_vm2, %v7122_v1  ;;  %v7448_v0 = vpop.trf.xlu0 }
 0xda0   :  { %v7123_v2 = vpop.trf.xlu1 }
 0xda1   :  { %10130 = vmatmul.mubr.msk.f32.gmra.mrb[70].mxu1 %vm6474_vm2, %v7123_v2 }
 0xda2   :  { %10134 = vmatprep.mubr.msk.f32.mxu1 %vm6474_vm2, %v7433_v38 }
 0xda4   :  { %v7758_v11 = vpop.trf.xlu1 }
 0xda5   :  { %10135 = vmatmul.mubr.msk.f32.vlgmr.msra.gmra.mrb[72].mxu1 %vm6474_vm2, %v7434_v40 }
 0xda6   :  { %10159 = vmatpush3.msra.mxu1 %v7741_v6  ;;  %10137 = vmatprep.mubr.msk.f32.mxu1 %vm6474_vm2, %v7435_v47  ;;  %v12773_v47 = vld [vmem:[#allocation26 + $0x38] sm:$0xff]  ;;  %v12779_v6 = vld [vmem:[#allocation26 + $0x48] sm:$0xff] }
 0xda8   :  { %v7759_v3 = vpop.trf.xlu1 }
 0xda9   :  { %10138 = vmatmul.mubr.msk.f32.gmra.mrb[74].mxu1 %vm6474_vm2, %v7436_v49 }
 0xdaa   :  { %10140 = vmatprep.mubr.msk.f32.mxu1 %vm6474_vm2, %v7437_v53 }
 0xdac   :  { %v7760_v4 = vpop.trf.xlu1 }
 0xdad   :  { %10141 = vmatmul.mubr.msk.f32.gmra.mrb[76].mxu1 %vm6474_vm2, %v7438_v55  ;;  %v12781_v55 = vld [vmem:[#allocation26 + $0x40] sm:$0xff] }
 0xdae   :  { %10143 = vmatprep.mubr.msk.f32.mxu1 %vm6474_vm2, %v7439_v7 }
 0xdb0   :  { %v7761_v9 = vpop.trf.xlu1 }
 0xdb1   :  { %10144 = vmatmul.mubr.msk.f32.gmra.mrb[78].mxu1 %vm6474_vm2, %v7440_v59 }
 0xdb2   :  { %10146 = vmatprep.mubr.msk.f32.mxu1 %vm6474_vm2, %v7441_v62 }
 0xdb4   :  { %v7762_v13 = vpop.trf.xlu1 }
 0xdb5   :  { %10147 = vmatmul.mubr.msk.f32.gmra.mrb[80].mxu1 %vm6474_vm2, %v7442_v63 }
 0xdb6   :  { %10149 = vmatprep.mubr.msk.f32.mxu1 %vm6474_vm2, %v7443_v46  ;;  %v12791_v46 = vld [vmem:[#allocation26 + $0x68] sm:$0xff] }
 0xdb8   :  { %v7763_v15 = vpop.trf.xlu1 }
 0xdb9   :  { %10150 = vmatmul.mubr.msk.f32.gmra.mrb[82].mxu1 %vm6474_vm2, %v7444_v44 }
 0xdba   :  { %10152 = vmatprep.mubr.msk.f32.mxu1 %vm6474_vm2, %v7445_v5 }
 0xdbc   :  { %v7764_v17 = vpop.trf.xlu1 }
 0xdbd   :  { %10153 = vmatmul.mubr.msk.f32.gmra.mrb[84].mxu1 %vm6474_vm2, %v7446_v12  ;;  %v12797_v12 = vld [vmem:[#allocation26 + $0x78] sm:$0xff] }
 0xdbe   :  { %10155 = vmatprep.mubr.msk.f32.mxu1 %vm6474_vm2, %v7447_v16 }
 0xdc0   :  { %v7765_v18 = vpop.trf.xlu1 }
 0xdc1   :  { %10156 = vmatmul.mubr.msk.f32.gmra.mrb[86].mxu1 %vm6474_vm2, %v7448_v0 }
 0xdc2   :  { %10160 = vmatprep.mubr.msk.f32.mxu1 %vm6474_vm2, %v7758_v11  ;;  %v12793_v11 = vld [vmem:[#allocation26 + $0x60] sm:$0xff] }
 0xdc4   :  { %v7766_v19 = vpop.trf.xlu1 }
 0xdc5   :  { %10161 = vmatmul.mubr.msk.f32.vlgmr.msra.gmra.mrb[88].mxu1 %vm6474_vm2, %v7759_v3 }
 0xdc6   :  { %10163 = vmatprep.mubr.msk.f32.mxu1 %vm6474_vm2, %v7760_v4 }
 0xdc8   :  { %v7767_v20 = vpop.trf.xlu1 }
 0xdc9   :  { %10164 = vmatmul.mubr.msk.f32.gmra.mrb[90].mxu1 %vm6474_vm2, %v7761_v9 }
 0xdca   :  { %10166 = vmatprep.mubr.msk.f32.mxu1 %vm6474_vm2, %v7762_v13  ;;  %v12799_v13 = vld [vmem:[#allocation26 + $0x70] sm:$0xff] }
 0xdcc   :  { %v7768_v21 = vpop.trf.xlu1 }
 0xdcd   :  { %10167 = vmatmul.mubr.msk.f32.gmra.mrb[92].mxu1 %vm6474_vm2, %v7763_v15 }
 0xdce   :  { %10169 = vmatprep.mubr.msk.f32.mxu1 %vm6474_vm2, %v7764_v17 }
 0xdd0   :  { %v7769_v52 = vpop.trf.xlu1 }
 0xdd1   :  { %10170 = vmatmul.mubr.msk.f32.gmra.mrb[94].mxu1 %vm6474_vm2, %v7765_v18 }
 0xdd2   :  { %10172 = vmatprep.mubr.msk.f32.mxu1 %vm6474_vm2, %v7766_v19 }
 0xdd4   :  { %v7770_v22 = vpop.trf.xlu1 }
 0xdd5   :  { %10173 = vmatmul.mubr.msk.f32.gmra.mrb[96].mxu1 %vm6474_vm2, %v7767_v20 }
 0xdd6   :  { %10175 = vmatprep.mubr.msk.f32.mxu1 %vm6474_vm2, %v7768_v21 }
 0xdd8   :  { %v7771_v23 = vpop.trf.xlu1 }
 0xdd9   :  { %10176 = vmatmul.mubr.msk.f32.gmra.mrb[98].mxu1 %vm6474_vm2, %v7769_v52 }
 0xdda   :  { %10178 = vmatprep.mubr.msk.f32.mxu1 %vm6474_vm2, %v7770_v22 }
 0xddc   :  { %v7772_v8 = vpop.trf.xlu1 }
 0xddd   :  { %10179 = vmatmul.mubr.msk.f32.gmra.mrb[100].mxu1 %vm6474_vm2, %v7771_v23 }
 0xdde   :  { %10181 = vmatprep.mubr.msk.f32.mxu1 %vm6474_vm2, %v7772_v8 }
 0xde0   :  { %v7773_v24 = vpop.trf.xlu1 }
 0xde1   :  { %10182 = vmatmul.mubr.msk.f32.gmra.mrb[102].mxu1 %vm6474_vm2, %v7773_v24 }
 0xdf9   :  { %v10058_v27 = vpop.f32.mrb[4].mxu0 }
 0xdfa   :  { %v6669_v28 = vadd.f32 %v10058_v27, %v12755_v25  ;;  %v6589_v10 = vpop.f32.mrb[5].mxu0 }
 0xdfb   :  { %v6668_v42 = vadd.f32 %v6589_v10, %v12757_v26 }
 0xdfd   :  { %v9095_v29 = vpack.c.bf16 %v6669_v28, %v6668_v42 }
 0xdff   :  { %9096 = vst [vmem:[#allocation31] sm:$0xff] %v9095_v29  }
 0xe01   :  { %v10061_v31 = vpop.f32.mrb[6].mxu0 }
 0xe02   :  { %v6671_v32 = vadd.f32 %v10061_v31, %v12761_v14  ;;  %v6599_v33 = vpop.f32.mrb[7].mxu0 }
 0xe03   :  { %v6670_v34 = vadd.f32 %v6599_v33, %v12763_v30 }
 0xe05   :  { %v9100_v35 = vpack.c.bf16 %v6671_v32, %v6670_v34 }
 0xe07   :  { %9292 = vst [vmem:[#allocation31 + $0x8] sm:$0xff] %v9100_v35  }
 0xe09   :  { %v10064_v38 = vpop.f32.mrb[8].mxu0 }
 0xe0a   :  { %v6673_v39 = vadd.f32 %v10064_v38, %v12767_v36  ;;  %v6609_v40 = vpop.f32.mrb[9].mxu0 }
 0xe0b   :  { %v6672_v41 = vadd.f32 %v6609_v40, %v12769_v37 }
 0xe0d   :  { %v9105_v45 = vpack.c.bf16 %v6673_v39, %v6672_v41 }
 0xe0f   :  { %9293 = vst [vmem:[#allocation31 + $0x10] sm:$0xff] %v9105_v45  }
 0xe11   :  { %v10067_v49 = vpop.f32.mrb[30].mxu1 }
 0xe12   :  { %v6675_v50 = vadd.f32 %v10067_v49, %v12773_v47  ;;  %v6619_v51 = vpop.f32.mrb[31].mxu1 }
 0xe13   :  { %v6674_v53 = vadd.f32 %v6619_v51, %v12775_v48 }
 0xe15   :  { %v9110_v54 = vpack.c.bf16 %v6675_v50, %v6674_v53 }
 0xe17   :  { %9294 = vst [vmem:[#allocation31 + $0x18] sm:$0xff] %v9110_v54  }
 0xe19   :  { %v10070_v57 = vpop.f32.mrb[32].mxu1 }
 0xe1a   :  { %v6677_v56 = vadd.f32 %v10070_v57, %v12779_v6  ;;  %v6629_v7 = vpop.f32.mrb[33].mxu1 }
 0xe1b   :  { %v6676_v58 = vadd.f32 %v6629_v7, %v12781_v55 }
 0xe1d   :  { %v9115_v59 = vpack.c.bf16 %v6677_v56, %v6676_v58 }
 0xe1f   :  { %9295 = vst [vmem:[#allocation31 + $0x20] sm:$0xff] %v9115_v59  }
 0xe21   :  { %v10073_v62 = vpop.f32.mrb[34].mxu1 }
 0xe22   :  { %v6679_v43 = vadd.f32 %v10073_v62, %v12785_v60  ;;  %v6639_v63 = vpop.f32.mrb[35].mxu1 }
 0xe23   :  { %v6678_v1 = vadd.f32 %v6639_v63, %v12787_v61 }
 0xe25   :  { %v9120_v2 = vpack.c.bf16 %v6679_v43, %v6678_v1 }
 0xe27   :  { %9296 = vst [vmem:[#allocation31 + $0x28] sm:$0xff] %v9120_v2  }
 0xe29   :  { %v10076_v44 = vpop.f32.mrb[36].mxu1 }
 0xe2a   :  { %v6681_v3 = vadd.f32 %v10076_v44, %v12791_v46  ;;  %v6649_v4 = vpop.f32.mrb[37].mxu1 }
 0xe2b   :  { %v6680_v5 = vadd.f32 %v6649_v4, %v12793_v11 }
 0xe2d   :  { %v9125_v9 = vpack.c.bf16 %v6681_v3, %v6680_v5 }
 0xe2f   :  { %9297 = vst [vmem:[#allocation31 + $0x30] sm:$0xff] %v9125_v9  }
 0xe31   :  { %v10079_v15 = vpop.f32.mrb[38].mxu1 }
 0xe32   :  { %v6683_v16 = vadd.f32 %v10079_v15, %v12797_v12  ;;  %v6659_v17 = vpop.f32.mrb[39].mxu1 }
 0xe33   :  { %v6682_v0 = vadd.f32 %v6659_v17, %v12799_v13 }
 0xe35   :  { %v9130_v18 = vpack.c.bf16 %v6683_v16, %v6682_v0  ;;  %v10084_v19 = vpop.f32.mrb[40].mxu1 }
 0xe36   :  { %v6993_v20 = vadd.f32 %v10084_v19, %v12755_v25  ;;  %v6913_v21 = vpop.f32.mrb[41].mxu1 }
 0xe37   :  { %9298 = vst [vmem:[#allocation31 + $0x38] sm:$0xff] %v9130_v18   ;;  %v6992_v52 = vadd.f32 %v6913_v21, %v12757_v26 }
 0xe39   :  { %v9135_v22 = vpack.c.bf16 %v6993_v20, %v6992_v52  ;;  %v10087_v23 = vpop.f32.mrb[42].mxu1 }
 0xe3a   :  { %v6995_v8 = vadd.f32 %v10087_v23, %v12761_v14  ;;  %v6923_v24 = vpop.f32.mrb[43].mxu1 }
 0xe3b   :  { %9136 = vst [vmem:[#allocation31 + $0x40] sm:$0xff] %v9135_v22   ;;  %v6994_v27 = vadd.f32 %v6923_v24, %v12763_v30 }
 0xe3c   :  { %11925 = shalt.err (!%p11922_p12)
}
 0xe3d   :  { %s11926_s25 = scalar_lea.hbm %s12932_s17, 128 }
 0xe3e   :  { %p11927_p13 = scmp.ne.s32.totalorder %s12932_s17, %s11926_s25  ;;  %p11930_p0 = scmp.lt.u32.totalorder %s11926_s25, %s12932_s17 }
 0xe40   :  { %p11932_p1 = pnand %p11930_p0, %p11927_p13 }
 0xe42   :  { %11935 = shalt.err (!%p11932_p1)
}
 0xe43   :  { %8134 = dma.vmem_to_hbm [thread:$0]  %s8132_s27, 128, %s12932_s17, [#allocation29]   ;;  %v9140_v28 = vpack.c.bf16 %v6995_v8, %v6994_v27  ;;  %v10090_v10 = vpop.f32.mrb[44].mxu1 }
 0xe44   :  { %s11936_s10 = scalar_lea.vmem %s8122_s8, 128  ;;  %p11941_p3 = scmp.lt.s32.totalorder %s8122_s8, %s8122_s8 }
 0xe45   :  { %p11937_p2 = scmp.ne.s32.totalorder %s8122_s8, %s11936_s10  ;;  %p11942_p4 = scmp.lt.s32.totalorder %s11936_s10, %s11936_s10 }
 0xe47   :  { %p11943_p5 = por %p11942_p4, %p11941_p3 }
 0xe49   :  { %p11944_p6 = pnand %p11943_p5, %p11937_p2 }
 0xe4b   :  { %11947 = shalt.err (!%p11944_p6)
}
 0xe4c   :  { %s12953_s30 = sld [smem:[#allocation48_spill]] }
 0xe52   :  { %s11948_s19 = scalar_lea.hbm %s12953_s30, 128 }
 0xe53   :  { %p11949_p7 = scmp.ne.s32.totalorder %s12953_s30, %s11948_s19  ;;  %p11952_p8 = scmp.lt.u32.totalorder %s11948_s19, %s12953_s30 }
 0xe55   :  { %p11954_p9 = pnand %p11952_p8, %p11949_p7 }
 0xe57   :  { %11957 = shalt.err (!%p11954_p9)
}
 0xe58   :  { %8124 = dma.vmem_to_hbm [thread:$0]  %s8122_s8, 128, %s12953_s30, [#allocation5]   ;;  %v6997_v42 = vadd.f32 %v10090_v10, %v12767_v36  ;;  %v6933_v29 = vpop.f32.mrb[45].mxu1  ;;  %9299 = vst [vmem:[#allocation31 + $0x48] sm:$0xff] %v9140_v28  }
 0xe59   :  { %s12050_s2 = smov [#allocation30]   ;;  %v6996_v31 = vadd.f32 %v6933_v29, %v12769_v37 }
 0xe5a   :  { %s8141_s21 = sshll.u32 %s12050_s2, 4  ;;  %s8142_s21 = int_to_ptr.vmem [resolvable:$true] %s8141_s21 }
 0xe5b   :  { %s11958_s12 = scalar_lea.vmem %s8142_s21, 128  ;;  %p11963_p11 = scmp.lt.s32.totalorder %s8142_s21, %s8142_s21 }
 0xe5c   :  { %p11959_p10 = scmp.ne.s32.totalorder %s8142_s21, %s11958_s12  ;;  %p11964_p12 = scmp.lt.s32.totalorder %s11958_s12, %s11958_s12 }
 0xe5e   :  { %p11965_p13 = por %p11964_p12, %p11963_p11 }
 0xe60   :  { %p11966_p0 = pnand %p11965_p13, %p11959_p10 }
 0xe62   :  { %11969 = shalt.err (!%p11966_p0)
}
 0xe63   :  { %s12954_s26 = sld [smem:[#allocation49_spill]] }
 0xe69   :  { %s11970_s15 = scalar_lea.hbm %s12954_s26, 128 }
 0xe6a   :  { %p11971_p1 = scmp.ne.s32.totalorder %s12954_s26, %s11970_s15  ;;  %p11974_p2 = scmp.lt.u32.totalorder %s11970_s15, %s12954_s26 }
 0xe6c   :  { %p11976_p3 = pnand %p11974_p2, %p11971_p1 }
 0xe6e   :  { %11979 = shalt.err (!%p11976_p3)
}
 0xe6f   :  { %8144 = dma.vmem_to_hbm [thread:$0]  %s8142_s21, 128, %s12954_s26, [#allocation29]   ;;  %v9145_v32 = vpack.c.bf16 %v6997_v42, %v6996_v31  ;;  %v10093_v33 = vpop.f32.mrb[46].mxu1 }
 0xe70   :  { %v6999_v34 = vadd.f32 %v10093_v33, %v12773_v47  ;;  %v6943_v35 = vpop.f32.mrb[47].mxu1  ;;  %s12051_s25 = smov [#allocation31]  }
 0xe71   :  { %9300 = vst [vmem:[#allocation31 + $0x50] sm:$0xff] %v9145_v32   ;;  %v6998_v38 = vadd.f32 %v6943_v35, %v12775_v48  ;;  %v10096_v40 = vpop.f32.mrb[48].mxu1  ;;  %s8150_s22 = sshll.u32 %s12051_s25, 4  ;;  %s8151_s22 = int_to_ptr.vmem [resolvable:$true] %s8150_s22 }
 0xe72   :  { %v7001_v41 = vadd.f32 %v10096_v40, %v12779_v6  ;;  %v6953_v45 = vpop.f32.mrb[49].mxu1  ;;  %s11980_s23 = scalar_lea.vmem %s8151_s22, 8192  ;;  %p11985_p5 = scmp.lt.s32.totalorder %s8151_s22, %s8151_s22 }
 0xe73   :  { %v9150_v39 = vpack.c.bf16 %v6999_v34, %v6998_v38  ;;  %v7000_v49 = vadd.f32 %v6953_v45, %v12781_v55  ;;  %v10099_v51 = vpop.f32.mrb[50].mxu1  ;;  %p11981_p4 = scmp.ne.s32.totalorder %s8151_s22, %s11980_s23  ;;  %p11986_p6 = scmp.lt.s32.totalorder %s11980_s23, %s11980_s23 }
 0xe74   :  { %v7003_v53 = vadd.f32 %v10099_v51, %v12785_v60  ;;  %v6963_v54 = vpop.f32.mrb[51].mxu1 }
 0xe75   :  { %9301 = vst [vmem:[#allocation31 + $0x58] sm:$0xff] %v9150_v39   ;;  %v9155_v50 = vpack.c.bf16 %v7001_v41, %v7000_v49  ;;  %v7002_v57 = vadd.f32 %v6963_v54, %v12787_v61  ;;  %v10102_v7 = vpop.f32.mrb[52].mxu1  ;;  %p11987_p7 = por %p11986_p6, %p11985_p5 }
 0xe76   :  { %v7005_v58 = vadd.f32 %v10102_v7, %v12791_v46  ;;  %v6973_v59 = vpop.f32.mrb[53].mxu1 }
 0xe77   :  { %9302 = vst [vmem:[#allocation31 + $0x60] sm:$0xff] %v9155_v50   ;;  %v9160_v56 = vpack.c.bf16 %v7003_v53, %v7002_v57  ;;  %v7004_v62 = vadd.f32 %v6973_v59, %v12793_v11  ;;  %v10105_v63 = vpop.f32.mrb[54].mxu1  ;;  %p11988_p8 = pnand %p11987_p7, %p11981_p4 }
 0xe78   :  { %v7007_v1 = vadd.f32 %v10105_v63, %v12797_v12  ;;  %v6983_v2 = vpop.f32.mrb[55].mxu1 }
 0xe79   :  { %9303 = vst [vmem:[#allocation31 + $0x68] sm:$0xff] %v9160_v56   ;;  %v9165_v43 = vpack.c.bf16 %v7005_v58, %v7004_v62  ;;  %v7006_v44 = vadd.f32 %v6983_v2, %v12799_v13  ;;  %v10110_v4 = vpop.f32.mrb[56].mxu1 }
 0xe7a   :  { %v7318_v5 = vadd.f32 %v10110_v4, %v12755_v25  ;;  %v7238_v9 = vpop.f32.mrb[57].mxu1 }
 0xe7b   :  { %9304 = vst [vmem:[#allocation31 + $0x70] sm:$0xff] %v9165_v43   ;;  %v9170_v3 = vpack.c.bf16 %v7007_v1, %v7006_v44  ;;  %v7317_v15 = vadd.f32 %v7238_v9, %v12757_v26  ;;  %v10113_v17 = vpop.f32.mrb[58].mxu1 }
 0xe7c   :  { %v7320_v0 = vadd.f32 %v10113_v17, %v12761_v14  ;;  %v7248_v18 = vpop.f32.mrb[59].mxu1 }
 0xe7d   :  { %9305 = vst [vmem:[#allocation31 + $0x78] sm:$0xff] %v9170_v3   ;;  %v9175_v16 = vpack.c.bf16 %v7318_v5, %v7317_v15  ;;  %v7319_v19 = vadd.f32 %v7248_v18, %v12763_v30  ;;  %v10116_v21 = vpop.f32.mrb[60].mxu1 }
 0xe7e   :  { %v7322_v52 = vadd.f32 %v10116_v21, %v12767_v36  ;;  %v7258_v22 = vpop.f32.mrb[61].mxu1 }
 0xe7f   :  { %9176 = vst [vmem:[#allocation31 + $0x80] sm:$0xff] %v9175_v16   ;;  %v9180_v20 = vpack.c.bf16 %v7320_v0, %v7319_v19  ;;  %v7321_v23 = vadd.f32 %v7258_v22, %v12769_v37  ;;  %v10119_v24 = vpop.f32.mrb[62].mxu1 }
 0xe80   :  { %v7324_v27 = vadd.f32 %v10119_v24, %v12773_v47  ;;  %v7268_v28 = vpop.f32.mrb[63].mxu1 }
 0xe81   :  { %9306 = vst [vmem:[#allocation31 + $0x88] sm:$0xff] %v9180_v20   ;;  %v9185_v8 = vpack.c.bf16 %v7322_v52, %v7321_v23  ;;  %v7323_v10 = vadd.f32 %v7268_v28, %v12775_v48  ;;  %v10122_v29 = vpop.f32.mrb[64].mxu1 }
 0xe82   :  { %v7326_v31 = vadd.f32 %v10122_v29, %v12779_v6  ;;  %v7278_v32 = vpop.f32.mrb[65].mxu1 }
 0xe83   :  { %9307 = vst [vmem:[#allocation31 + $0x90] sm:$0xff] %v9185_v8   ;;  %v9190_v42 = vpack.c.bf16 %v7324_v27, %v7323_v10  ;;  %v7325_v33 = vadd.f32 %v7278_v32, %v12781_v55  ;;  %v10125_v35 = vpop.f32.mrb[66].mxu1 }
 0xe84   :  { %v7328_v38 = vadd.f32 %v10125_v35, %v12785_v60  ;;  %v7288_v39 = vpop.f32.mrb[67].mxu1 }
 0xe85   :  { %9308 = vst [vmem:[#allocation31 + $0x98] sm:$0xff] %v9190_v42   ;;  %v9195_v34 = vpack.c.bf16 %v7326_v31, %v7325_v33  ;;  %v7327_v40 = vadd.f32 %v7288_v39, %v12787_v61  ;;  %v10128_v45 = vpop.f32.mrb[68].mxu1 }
 0xe86   :  { %v7330_v49 = vadd.f32 %v10128_v45, %v12791_v46  ;;  %v7298_v50 = vpop.f32.mrb[69].mxu1 }
 0xe87   :  { %9309 = vst [vmem:[#allocation31 + $0xa0] sm:$0xff] %v9195_v34   ;;  %v9200_v41 = vpack.c.bf16 %v7328_v38, %v7327_v40  ;;  %v7329_v51 = vadd.f32 %v7298_v50, %v12793_v11  ;;  %v10131_v54 = vpop.f32.mrb[70].mxu1 }
 0xe88   :  { %v7332_v57 = vadd.f32 %v10131_v54, %v12797_v12  ;;  %v7308_v56 = vpop.f32.mrb[71].mxu1 }
 0xe89   :  { %9310 = vst [vmem:[#allocation31 + $0xa8] sm:$0xff] %v9200_v41   ;;  %v9205_v53 = vpack.c.bf16 %v7330_v49, %v7329_v51  ;;  %v7331_v7 = vadd.f32 %v7308_v56, %v12799_v13  ;;  %v10136_v59 = vpop.f32.mrb[72].mxu1 }
 0xe8a   :  { %v7643_v62 = vadd.f32 %v10136_v59, %v12755_v25  ;;  %v7563_v43 = vpop.f32.mrb[73].mxu1 }
 0xe8b   :  { %9311 = vst [vmem:[#allocation31 + $0xb0] sm:$0xff] %v9205_v53   ;;  %v9210_v58 = vpack.c.bf16 %v7332_v57, %v7331_v7  ;;  %v7642_v63 = vadd.f32 %v7563_v43, %v12757_v26  ;;  %v10139_v2 = vpop.f32.mrb[74].mxu1 }
 0xe8c   :  { %v7645_v44 = vadd.f32 %v10139_v2, %v12761_v14  ;;  %v7573_v3 = vpop.f32.mrb[75].mxu1 }
 0xe8d   :  { %9312 = vst [vmem:[#allocation31 + $0xb8] sm:$0xff] %v9210_v58   ;;  %v9215_v1 = vpack.c.bf16 %v7643_v62, %v7642_v63  ;;  %v7644_v4 = vadd.f32 %v7573_v3, %v12763_v30  ;;  %v10142_v9 = vpop.f32.mrb[76].mxu1 }
 0xe8e   :  { %v7647_v15 = vadd.f32 %v10142_v9, %v12767_v36  ;;  %v7583_v16 = vpop.f32.mrb[77].mxu1 }
 0xe8f   :  { %9216 = vst [vmem:[#allocation31 + $0xc0] sm:$0xff] %v9215_v1   ;;  %v9220_v5 = vpack.c.bf16 %v7645_v44, %v7644_v4  ;;  %v7646_v17 = vadd.f32 %v7583_v16, %v12769_v37  ;;  %v10145_v18 = vpop.f32.mrb[78].mxu1 }
 0xe90   :  { %v7649_v19 = vadd.f32 %v10145_v18, %v12773_v47  ;;  %v7593_v20 = vpop.f32.mrb[79].mxu1 }
 0xe91   :  { %9313 = vst [vmem:[#allocation31 + $0xc8] sm:$0xff] %v9220_v5   ;;  %v9225_v0 = vpack.c.bf16 %v7647_v15, %v7646_v17  ;;  %v7648_v21 = vadd.f32 %v7593_v20, %v12775_v48  ;;  %v10148_v22 = vpop.f32.mrb[80].mxu1 }
 0xe92   :  { %v7651_v23 = vadd.f32 %v10148_v22, %v12779_v6  ;;  %v7603_v8 = vpop.f32.mrb[81].mxu1 }
 0xe93   :  { %9314 = vst [vmem:[#allocation31 + $0xd0] sm:$0xff] %v9225_v0   ;;  %v9230_v52 = vpack.c.bf16 %v7649_v19, %v7648_v21  ;;  %v7650_v24 = vadd.f32 %v7603_v8, %v12781_v55  ;;  %v10151_v28 = vpop.f32.mrb[82].mxu1 }
 0xe94   :  { %v7653_v10 = vadd.f32 %v10151_v28, %v12785_v60  ;;  %v7613_v42 = vpop.f32.mrb[83].mxu1 }
 0xe95   :  { %9315 = vst [vmem:[#allocation31 + $0xd8] sm:$0xff] %v9230_v52   ;;  %v9235_v27 = vpack.c.bf16 %v7651_v23, %v7650_v24  ;;  %v7652_v29 = vadd.f32 %v7613_v42, %v12787_v61  ;;  %v10154_v32 = vpop.f32.mrb[84].mxu1 }
 0xe96   :  { %v7655_v33 = vadd.f32 %v10154_v32, %v12791_v46  ;;  %v7623_v34 = vpop.f32.mrb[85].mxu1 }
 0xe97   :  { %9316 = vst [vmem:[#allocation31 + $0xe0] sm:$0xff] %v9235_v27   ;;  %v9240_v31 = vpack.c.bf16 %v7653_v10, %v7652_v29  ;;  %v7654_v35 = vadd.f32 %v7623_v34, %v12793_v11  ;;  %v10157_v39 = vpop.f32.mrb[86].mxu1 }
 0xe98   :  { %v7657_v40 = vadd.f32 %v10157_v39, %v12797_v12  ;;  %v7633_v41 = vpop.f32.mrb[87].mxu1 }
 0xe99   :  { %9317 = vst [vmem:[#allocation31 + $0xe8] sm:$0xff] %v9240_v31   ;;  %v9245_v38 = vpack.c.bf16 %v7655_v33, %v7654_v35  ;;  %v7656_v45 = vadd.f32 %v7633_v41, %v12799_v13  ;;  %v10162_v50 = vpop.f32.mrb[88].mxu1 }
 0xe9a   :  { %v7968_v51 = vadd.f32 %v10162_v50, %v12755_v25  ;;  %v7888_v53 = vpop.f32.mrb[89].mxu1 }
 0xe9b   :  { %9318 = vst [vmem:[#allocation31 + $0xf0] sm:$0xff] %v9245_v38   ;;  %v9250_v49 = vpack.c.bf16 %v7657_v40, %v7656_v45  ;;  %v7967_v54 = vadd.f32 %v7888_v53, %v12757_v26 }
 0xe9c   :  { %v10165_v56 = vpop.f32.mrb[90].mxu1 }
 0xe9d   :  { %9319 = vst [vmem:[#allocation31 + $0xf8] sm:$0xff] %v9250_v49   ;;  %v9255_v57 = vpack.c.bf16 %v7968_v51, %v7967_v54  ;;  %v7970_v7 = vadd.f32 %v10165_v56, %v12761_v14  ;;  %v7898_v58 = vpop.f32.mrb[91].mxu1 }
 0xe9e   :  { %v7969_v59 = vadd.f32 %v7898_v58, %v12763_v30 }
 0xe9f   :  { %9256 = vst [vmem:[#allocation31 + $0x100] sm:$0xff] %v9255_v57  }
 0xea0   :  { %v9260_v62 = vpack.c.bf16 %v7970_v7, %v7969_v59  ;;  %v10168_v43 = vpop.f32.mrb[92].mxu1 }
 0xea1   :  { %v7972_v63 = vadd.f32 %v10168_v43, %v12767_v36  ;;  %v7908_v1 = vpop.f32.mrb[93].mxu1 }
 0xea2   :  { %9320 = vst [vmem:[#allocation31 + $0x108] sm:$0xff] %v9260_v62   ;;  %v7971_v25 = vadd.f32 %v7908_v1, %v12769_v37 }
 0xea4   :  { %v9265_v2 = vpack.c.bf16 %v7972_v63, %v7971_v25  ;;  %v10171_v44 = vpop.f32.mrb[94].mxu1 }
 0xea5   :  { %v7974_v26 = vadd.f32 %v10171_v44, %v12773_v47  ;;  %v7918_v3 = vpop.f32.mrb[95].mxu1 }
 0xea6   :  { %9321 = vst [vmem:[#allocation31 + $0x110] sm:$0xff] %v9265_v2   ;;  %v7973_v14 = vadd.f32 %v7918_v3, %v12775_v48 }
 0xea8   :  { %v9270_v4 = vpack.c.bf16 %v7974_v26, %v7973_v14  ;;  %v10174_v5 = vpop.f32.mrb[96].mxu1 }
 0xea9   :  { %v7976_v30 = vadd.f32 %v10174_v5, %v12779_v6  ;;  %v7928_v9 = vpop.f32.mrb[97].mxu1 }
 0xeaa   :  { %9322 = vst [vmem:[#allocation31 + $0x118] sm:$0xff] %v9270_v4   ;;  %v7975_v36 = vadd.f32 %v7928_v9, %v12781_v55 }
 0xeac   :  { %v9275_v15 = vpack.c.bf16 %v7976_v30, %v7975_v36  ;;  %v10177_v16 = vpop.f32.mrb[98].mxu1 }
 0xead   :  { %v7978_v37 = vadd.f32 %v10177_v16, %v12785_v60  ;;  %v7938_v17 = vpop.f32.mrb[99].mxu1 }
 0xeae   :  { %9323 = vst [vmem:[#allocation31 + $0x120] sm:$0xff] %v9275_v15   ;;  %v7977_v47 = vadd.f32 %v7938_v17, %v12787_v61 }
 0xeb0   :  { %v9280_v0 = vpack.c.bf16 %v7978_v37, %v7977_v47  ;;  %v10180_v18 = vpop.f32.mrb[100].mxu1 }
 0xeb1   :  { %v7980_v48 = vadd.f32 %v10180_v18, %v12791_v46  ;;  %v7948_v19 = vpop.f32.mrb[101].mxu1 }
 0xeb2   :  { %9324 = vst [vmem:[#allocation31 + $0x128] sm:$0xff] %v9280_v0   ;;  %v7979_v6 = vadd.f32 %v7948_v19, %v12793_v11 }
 0xeb4   :  { %v9285_v20 = vpack.c.bf16 %v7980_v48, %v7979_v6  ;;  %v10183_v21 = vpop.f32.mrb[102].mxu1 }
 0xeb5   :  { %v7982_v55 = vadd.f32 %v10183_v21, %v12797_v12  ;;  %v7958_v52 = vpop.f32.mrb[103].mxu1 }
 0xeb6   :  { %9325 = vst [vmem:[#allocation31 + $0x130] sm:$0xff] %v9285_v20   ;;  %v7981_v60 = vadd.f32 %v7958_v52, %v12799_v13 }
 0xeb8   :  { %v9290_v61 = vpack.c.bf16 %v7982_v55, %v7981_v60 }
 0xeba   :  { %9326 = vst [vmem:[#allocation31 + $0x138] sm:$0xff] %v9290_v61  }
 0xebb   :  { %11991 = shalt.err (!%p11988_p8)
}
 0xebc   :  { %s12955_s29 = sld [smem:[#allocation50_spill]] }
 0xec2   :  { %s11992_s24 = scalar_lea.hbm %s12955_s29, 8192 }
 0xec3   :  { %p11993_p9 = scmp.ne.s32.totalorder %s12955_s29, %s11992_s24  ;;  %p11996_p10 = scmp.lt.u32.totalorder %s11992_s24, %s12955_s29 }
 0xec5   :  { %p11998_p11 = pnand %p11996_p10, %p11993_p9 }
 0xec7   :  { %12001 = shalt.err (!%p11998_p11)
}
 0xec8   :  { %s12052_s19 = smov 64   ;;  %s12053_s3 = smov 4  }
 0xec9   :  { %8156 = dma.vmem_to_hbm [thread:$0]  %s8151_s22, 8192, %s12955_s29, [#allocation32], %s12052_s19, %s12052_s19, %s12053_s3  }
 0xeca   :  { %12018 = dma.done.wait [#allocation5], 128  }
 0xecb   :  { %12019 = vsyncadd [#allocation5], 4294967168 }
 0xecc   :  { %12020 = dma.done.wait [#allocation29], 256  }
 0xecd   :  { %12021 = vsyncadd [#allocation29], 4294967040 }
 0xece   :  { %12022 = dma.done.wait [#allocation32], 8192  }
 0xecf   :  { %12023 = vsyncadd [#allocation32], 4294959104 }
 0xed0   :  { %8169 = vsyncpa [#allocation4], 1 }
 0xed1   :  { %8170 = vsyncpa [#allocation7], 1 }
 0xed2   :  { %8171 = vsyncpa [#allocation10], 1 }
 0xed3   :  { %8172 = vsyncpa [#allocation13], 1 }
 0xed4   :  { %8173 = vsyncpa [#allocation16], 1 }
 0xed5   :  { %8174 = vsyncpa [#allocation19], 1 }
 0xed6   :  { %8175 = vsyncpa [#allocation22], 1 }
 0xed7   :  { %8176 = vsyncpa [#allocation25], 1 }
 0xed8   :  { %8177 = vsyncpa [#allocation5], 1 }
 0xed9   :  { %8178 = vsyncpa [#allocation29], 1 }
 0xeda   :  { %8179 = vsyncpa [#allocation32], 1 }

</bundles_post_ra>
